<compile_context>
chip_gen: v5e
topology: v5e:2x2
jax: 0.10.0
libtpu: 0.0.40
codegen_flags: <defaults>
</compile_context>

<pallas_src>
import jax
import jax.numpy as jnp
from jax.experimental import pallas as pl
from jax.experimental.pallas import tpu as pltpu

HID = 512


def nbeats_stack_kernel(x_ref, w0_ref, wsq_ref, wfb_ref, wff_ref, bpk_ref,
                        res_ref, fc_ref):
    # grid = (batch_tiles, K); K is the sequential block-recursion axis.
    k = pl.program_id(1)

    @pl.when(k == 0)
    def _():
        res_ref[...] = x_ref[...]
        fc_ref[...] = jnp.zeros_like(fc_ref)

    r = res_ref[...]                                   # (Bt, IN) f32, resident
    IN = res_ref.shape[-1]
    H = fc_ref.shape[-1]

    def mm(h, w):
        # bf16 x bf16 MXU matmul with f32 accumulation.
        return jnp.dot(h.astype(jnp.bfloat16), w,
                       preferred_element_type=jnp.float32)

    # stem: 4 x (Linear -> ReLU).  Dropout == identity in eval mode.
    h = jnp.maximum(mm(r, w0_ref[0])     + bpk_ref[0, 0:1, :], 0.0)
    h = jnp.maximum(mm(h, wsq_ref[0, 0]) + bpk_ref[0, 1:2, :], 0.0)
    h = jnp.maximum(mm(h, wsq_ref[0, 1]) + bpk_ref[0, 2:3, :], 0.0)
    h = jnp.maximum(mm(h, wsq_ref[0, 2]) + bpk_ref[0, 3:4, :], 0.0)

    # folded projections: (b1 then g_b) and (b2 then g_f) each as one matmul.
    # NOTE: outputs are lane-sparse (IN=32, H=8 < 128) at these toy sizes.
    x_bc = mm(h, wfb_ref[0]) + bpk_ref[0, 4:5, :IN]    # (Bt, IN)
    x_fc = mm(h, wff_ref[0]) + bpk_ref[0, 5:6, :H]     # (Bt, H)

    res_ref[...] = r - x_bc
    fc_ref[...] = fc_ref[...] + x_fc


def nbeats_stack(x, packed, K, H, n, *, batch_tile=256):
    W0, Wsq, Wfb, Wff, Bpk = packed
    B, IN = x.shape
    assert IN == H * n

    # batch tiling: one tile if the batch is small, else 256-row tiles
    # (each tile runs its own sequential K recursion; tiles are independent).
    bt = B if B <= batch_tile else batch_tile
    Bp = -(-B // bt) * bt
    xp = x if Bp == B else jnp.pad(x, ((0, Bp - B), (0, 0)))
    NB = Bp // bt

    grid_spec = pltpu.PrefetchScalarGridSpec(
        num_scalar_prefetch=0,
        grid=(NB, K),
        in_specs=[
            pl.BlockSpec((bt, IN), lambda bi, k: (bi, 0)),          # x (read once/tile)
            pl.BlockSpec((1, IN, HID), lambda bi, k: (k, 0, 0)),    # W0        (bf16)
            pl.BlockSpec((1, 3, HID, HID), lambda bi, k: (k, 0, 0, 0)),  # W1..W3 (bf16)
            pl.BlockSpec((1, HID, IN), lambda bi, k: (k, 0, 0)),    # folded g_b (bf16)
            pl.BlockSpec((1, HID, H), lambda bi, k: (k, 0, 0)),     # folded g_f (bf16)
            pl.BlockSpec((1, 6, HID), lambda bi, k: (k, 0, 0)),     # packed biases (f32)
        ],
        out_specs=[
            pl.BlockSpec((bt, IN), lambda bi, k: (bi, 0)),   # residual, resident over k
            pl.BlockSpec((bt, H), lambda bi, k: (bi, 0)),    # forecast sum, resident over k
        ],
    )

    res, fc = pl.pallas_call(
        nbeats_stack_kernel,
        out_shape=(
            jax.ShapeDtypeStruct((Bp, IN), jnp.float32),
            jax.ShapeDtypeStruct((Bp, H), jnp.float32),
        ),
        grid_spec=grid_spec,
        compiler_params=pltpu.CompilerParams(
            dimension_semantics=("parallel", "arbitrary"),
            vmem_limit_bytes=32 * 1024 * 1024,
        ),
    )(xp, W0, Wsq, Wfb, Wff, Bpk)

    if Bp != B:
        res = res[:B]
        fc = fc[:B]
    return res, fc


def init_params(key, K, H, n):
    """PyTorch-Linear-style init: U(-1/sqrt(fan_in), 1/sqrt(fan_in)), f32 masters."""
    IN = H * n
    dims = [
        (IN, HID),    # stem linear 0
        (HID, HID),   # stem linear 1
        (HID, HID),   # stem linear 2
        (HID, HID),   # stem linear 3
        (HID, HID),   # b1
        (HID, HID),   # b2
        (HID, IN),    # g_b
        (HID, H),     # g_f
    ]
    Ws, bs = [], []
    for (din, dout) in dims:
        key, kw, kb = jax.random.split(key, 3)
        scale = 1.0 / jnp.sqrt(jnp.float32(din))
        Ws.append(jax.random.uniform(kw, (K, din, dout), jnp.float32, -scale, scale))
        bs.append(jax.random.uniform(kb, (K, 1, dout), jnp.float32, -scale, scale))
    return Ws, bs


def pack_params(Ws, bs):
    """Fold b1->g_b / b2->g_f in f32, cast weights to bf16, pack biases."""
    # folded weights / biases (done in f32 for accuracy, then quantized once)
    Wfold_b = jnp.einsum('kij,kjl->kil', Ws[4], Ws[6])           # (K, HID, IN)
    bfold_b = jnp.einsum('kij,kjl->kil', bs[4], Ws[6]) + bs[6]   # (K, 1, IN)
    Wfold_f = jnp.einsum('kij,kjl->kil', Ws[5], Ws[7])           # (K, HID, H)
    bfold_f = jnp.einsum('kij,kjl->kil', bs[5], Ws[7]) + bs[7]   # (K, 1, H)

    W0 = Ws[0].astype(jnp.bfloat16)                                       # (K, IN, HID)
    Wsq = jnp.stack([Ws[1], Ws[2], Ws[3]], axis=1).astype(jnp.bfloat16)   # (K, 3, HID, HID)
    Wfb = Wfold_b.astype(jnp.bfloat16)                                    # (K, HID, IN)
    Wff = Wfold_f.astype(jnp.bfloat16)                                    # (K, HID, H)

    def pad_lane(b):
        return jnp.pad(b, ((0, 0), (0, 0), (0, HID - b.shape[-1])))

    Bpk = jnp.concatenate(
        [bs[0], bs[1], bs[2], bs[3], pad_lane(bfold_b), pad_lane(bfold_f)],
        axis=1).astype(jnp.float32)                                       # (K, 6, HID)
    return W0, Wsq, Wfb, Wff, Bpk


def nbeats_stack_ref(x, Ws, bs, K, H, n):
    """Pure-JAX f32 reference (mirrors the PyTorch forward in eval mode)."""
    B = x.shape[0]
    residual = x
    fc_sum = jnp.zeros((B, H), dtype=x.dtype)
    for k in range(K):
        h = residual
        for i in range(4):
            h = jnp.maximum(h @ Ws[i][k] + bs[i][k], 0.0)
        theta_b = h @ Ws[4][k] + bs[4][k]
        theta_f = h @ Ws[5][k] + bs[5][k]
        x_bc = theta_b @ Ws[6][k] + bs[6][k]
        x_fc = theta_f @ Ws[7][k] + bs[7][k]
        residual = residual - x_bc
        fc_sum = fc_sum + x_fc
    return residual, fc_sum


if __name__ == "__main__":
    K, H, n = 2, 8, 4     # small: 2 blocks, horizon 8, lookback multiplier 4
    B = 8                 # batch
    IN = H * n            # 32

    key = jax.random.PRNGKey(0)
    key, kx = jax.random.split(key)
    x = jax.random.normal(kx, (B, IN), dtype=jnp.float32)

    Ws, bs = init_params(key, K, H, n)
    packed = pack_params(Ws, bs)

    residual, fc_sum = nbeats_stack(x, packed, K, H, n)
    residual = jax.block_until_ready(residual)
    fc_sum = jax.block_until_ready(fc_sum)

    res_ref, fc_ref = nbeats_stack_ref(x, Ws, bs, K, H, n)
    # Tolerance reflects deliberate bf16 weight/activation quantization + folding.
    assert jnp.allclose(residual, res_ref, atol=2e-2, rtol=2e-2), "residual mismatch"
    assert jnp.allclose(fc_sum, fc_ref, atol=2e-2, rtol=2e-2), "forecast mismatch"

    print("KERNEL_OK")
</pallas_src>

<mosaic_0001>
module attributes {stable_mosaic.version = 11 : i64} {
  func.func @nbeats_stack_kernel(%arg0: i32, %arg1: i32, %arg2: memref<8x32xf32, #tpu.memory_space<vmem>>, %arg3: memref<1x32x512xbf16, #tpu.memory_space<vmem>>, %arg4: memref<1x3x512x512xbf16, #tpu.memory_space<vmem>>, %arg5: memref<1x512x32xbf16, #tpu.memory_space<vmem>>, %arg6: memref<1x512x8xbf16, #tpu.memory_space<vmem>>, %arg7: memref<1x6x512xf32, #tpu.memory_space<vmem>>, %arg8: memref<8x32xf32, #tpu.memory_space<vmem>>, %arg9: memref<8x8xf32, #tpu.memory_space<vmem>>) attributes {dimension_semantics = [#tpu.dimension_semantics<parallel>, #tpu.dimension_semantics<arbitrary>], iteration_bounds = array<i64: 1, 2>, scalar_prefetch = 0 : i64, scratch_operands = 0 : i64, tpu.core_type = #tpu.core_type<tc>, window_params = [{transform_indices = @transform_0, window_bounds = array<i64: 8, 32>}, {transform_indices = @transform_1, window_bounds = array<i64: 1, 32, 512>}, {transform_indices = @transform_2, window_bounds = array<i64: 1, 3, 512, 512>}, {transform_indices = @transform_3, window_bounds = array<i64: 1, 512, 32>}, {transform_indices = @transform_4, window_bounds = array<i64: 1, 512, 8>}, {transform_indices = @transform_5, window_bounds = array<i64: 1, 6, 512>}, {transform_indices = @transform_6, window_bounds = array<i64: 8, 32>}, {transform_indices = @transform_7, window_bounds = array<i64: 8, 8>}]} {
    %c0_i32 = arith.constant 0 : i32
    %0 = arith.cmpi eq, %arg1, %c0_i32 : i32
    %1 = arith.extui %0 : i1 to i32
    %c0_i32_0 = arith.constant 0 : i32
    %2 = arith.cmpi ne, %1, %c0_i32_0 : i32
    scf.if %2 {
      %c0_51 = arith.constant 0 : index
      %c0_52 = arith.constant 0 : index
      %65 = vector.load %arg2[%c0_51, %c0_52] : memref<8x32xf32, #tpu.memory_space<vmem>>, vector<8x32xf32>
      %c0_53 = arith.constant 0 : index
      %c0_54 = arith.constant 0 : index
      %66 = vector.load %arg8[%c0_53, %c0_54] : memref<8x32xf32, #tpu.memory_space<vmem>>, vector<8x32xf32>
      tpu.vector_store %arg8[%c0_53, %c0_54], %65 {strides = array<i32>} : memref<8x32xf32, #tpu.memory_space<vmem>>, vector<8x32xf32>,
      %cst_55 = arith.constant 0.000000e+00 : f32
      %67 = vector.broadcast %cst_55 : f32 to vector<8x8xf32>
      %c0_56 = arith.constant 0 : index
      %c0_57 = arith.constant 0 : index
      %68 = vector.load %arg9[%c0_56, %c0_57] : memref<8x8xf32, #tpu.memory_space<vmem>>, vector<8x8xf32>
      tpu.vector_store %arg9[%c0_56, %c0_57], %67 {strides = array<i32>} : memref<8x8xf32, #tpu.memory_space<vmem>>, vector<8x8xf32>,
    } else {
    }
    %c0 = arith.constant 0 : index
    %c0_1 = arith.constant 0 : index
    %3 = vector.load %arg8[%c0, %c0_1] : memref<8x32xf32, #tpu.memory_space<vmem>>, vector<8x32xf32>
    %c0_2 = arith.constant 0 : index
    %c0_3 = arith.constant 0 : index
    %c0_4 = arith.constant 0 : index
    %4 = vector.load %arg3[%c0_2, %c0_3, %c0_4] : memref<1x32x512xbf16, #tpu.memory_space<vmem>>, vector<1x32x512xbf16>
    %5 = vector.shape_cast %4 : vector<1x32x512xbf16> to vector<32x512xbf16>
    %6 = arith.truncf %3 : vector<8x32xf32> to vector<8x32xbf16>
    %cst = arith.constant dense<0.000000e+00> : vector<8x512xf32>
    %7 = tpu.matmul %6, %5, %cst {dimension_numbers = #tpu.dot_dimension_numbers<[1], [0], [0], [1], [0, 0, 1, 1], [], []>} : vector<8x32xbf16>, vector<32x512xbf16>, vector<8x512xf32> -> vector<8x512xf32>
    %c0_5 = arith.constant 0 : index
    %c0_6 = arith.constant 0 : index
    %c0_7 = arith.constant 0 : index
    %8 = vector.load %arg7[%c0_5, %c0_6, %c0_7] : memref<1x6x512xf32, #tpu.memory_space<vmem>>, vector<1x1x512xf32>
    %9 = vector.shape_cast %8 : vector<1x1x512xf32> to vector<1x512xf32>
    %10 = vector.broadcast %9 : vector<1x512xf32> to vector<8x512xf32>
    %11 = arith.addf %7, %10 : vector<8x512xf32>
    %cst_8 = arith.constant 0.000000e+00 : f32
    %12 = vector.broadcast %cst_8 : f32 to vector<8x512xf32>
    %13 = arith.maximumf %11, %12 : vector<8x512xf32>
    %c0_9 = arith.constant 0 : index
    %c0_10 = arith.constant 0 : index
    %c0_11 = arith.constant 0 : index
    %c0_12 = arith.constant 0 : index
    %14 = vector.load %arg4[%c0_9, %c0_10, %c0_11, %c0_12] : memref<1x3x512x512xbf16, #tpu.memory_space<vmem>>, vector<1x1x512x512xbf16>
    %15 = vector.shape_cast %14 : vector<1x1x512x512xbf16> to vector<512x512xbf16>
    %16 = arith.truncf %13 : vector<8x512xf32> to vector<8x512xbf16>
    %cst_13 = arith.constant dense<0.000000e+00> : vector<8x512xf32>
    %17 = tpu.matmul %16, %15, %cst_13 {dimension_numbers = #tpu.dot_dimension_numbers<[1], [0], [0], [1], [0, 0, 1, 1], [], []>} : vector<8x512xbf16>, vector<512x512xbf16>, vector<8x512xf32> -> vector<8x512xf32>
    %c0_14 = arith.constant 0 : index
    %c1 = arith.constant 1 : index
    %c0_15 = arith.constant 0 : index
    %18 = vector.load %arg7[%c0_14, %c1, %c0_15] : memref<1x6x512xf32, #tpu.memory_space<vmem>>, vector<1x1x512xf32>
    %19 = vector.shape_cast %18 : vector<1x1x512xf32> to vector<1x512xf32>
    %20 = vector.broadcast %19 : vector<1x512xf32> to vector<8x512xf32>
    %21 = arith.addf %17, %20 : vector<8x512xf32>
    %cst_16 = arith.constant 0.000000e+00 : f32
    %22 = vector.broadcast %cst_16 : f32 to vector<8x512xf32>
    %23 = arith.maximumf %21, %22 : vector<8x512xf32>
    %c0_17 = arith.constant 0 : index
    %c1_18 = arith.constant 1 : index
    %c0_19 = arith.constant 0 : index
    %c0_20 = arith.constant 0 : index
    %24 = vector.load %arg4[%c0_17, %c1_18, %c0_19, %c0_20] : memref<1x3x512x512xbf16, #tpu.memory_space<vmem>>, vector<1x1x512x512xbf16>
    %25 = vector.shape_cast %24 : vector<1x1x512x512xbf16> to vector<512x512xbf16>
    %26 = arith.truncf %23 : vector<8x512xf32> to vector<8x512xbf16>
    %cst_21 = arith.constant dense<0.000000e+00> : vector<8x512xf32>
    %27 = tpu.matmul %26, %25, %cst_21 {dimension_numbers = #tpu.dot_dimension_numbers<[1], [0], [0], [1], [0, 0, 1, 1], [], []>} : vector<8x512xbf16>, vector<512x512xbf16>, vector<8x512xf32> -> vector<8x512xf32>
    %c0_22 = arith.constant 0 : index
    %c2 = arith.constant 2 : index
    %c0_23 = arith.constant 0 : index
    %28 = vector.load %arg7[%c0_22, %c2, %c0_23] : memref<1x6x512xf32, #tpu.memory_space<vmem>>, vector<1x1x512xf32>
    %29 = vector.shape_cast %28 : vector<1x1x512xf32> to vector<1x512xf32>
    %30 = vector.broadcast %29 : vector<1x512xf32> to vector<8x512xf32>
    %31 = arith.addf %27, %30 : vector<8x512xf32>
    %cst_24 = arith.constant 0.000000e+00 : f32
    %32 = vector.broadcast %cst_24 : f32 to vector<8x512xf32>
    %33 = arith.maximumf %31, %32 : vector<8x512xf32>
    %c0_25 = arith.constant 0 : index
    %c2_26 = arith.constant 2 : index
    %c0_27 = arith.constant 0 : index
    %c0_28 = arith.constant 0 : index
    %34 = vector.load %arg4[%c0_25, %c2_26, %c0_27, %c0_28] : memref<1x3x512x512xbf16, #tpu.memory_space<vmem>>, vector<1x1x512x512xbf16>
    %35 = vector.shape_cast %34 : vector<1x1x512x512xbf16> to vector<512x512xbf16>
    %36 = arith.truncf %33 : vector<8x512xf32> to vector<8x512xbf16>
    %cst_29 = arith.constant dense<0.000000e+00> : vector<8x512xf32>
    %37 = tpu.matmul %36, %35, %cst_29 {dimension_numbers = #tpu.dot_dimension_numbers<[1], [0], [0], [1], [0, 0, 1, 1], [], []>} : vector<8x512xbf16>, vector<512x512xbf16>, vector<8x512xf32> -> vector<8x512xf32>
    %c0_30 = arith.constant 0 : index
    %c3 = arith.constant 3 : index
    %c0_31 = arith.constant 0 : index
    %38 = vector.load %arg7[%c0_30, %c3, %c0_31] : memref<1x6x512xf32, #tpu.memory_space<vmem>>, vector<1x1x512xf32>
    %39 = vector.shape_cast %38 : vector<1x1x512xf32> to vector<1x512xf32>
    %40 = vector.broadcast %39 : vector<1x512xf32> to vector<8x512xf32>
    %41 = arith.addf %37, %40 : vector<8x512xf32>
    %cst_32 = arith.constant 0.000000e+00 : f32
    %42 = vector.broadcast %cst_32 : f32 to vector<8x512xf32>
    %43 = arith.maximumf %41, %42 : vector<8x512xf32>
    %c0_33 = arith.constant 0 : index
    %c0_34 = arith.constant 0 : index
    %c0_35 = arith.constant 0 : index
    %44 = vector.load %arg5[%c0_33, %c0_34, %c0_35] : memref<1x512x32xbf16, #tpu.memory_space<vmem>>, vector<1x512x32xbf16>
    %45 = vector.shape_cast %44 : vector<1x512x32xbf16> to vector<512x32xbf16>
    %46 = arith.truncf %43 : vector<8x512xf32> to vector<8x512xbf16>
    %cst_36 = arith.constant dense<0.000000e+00> : vector<8x32xf32>
    %47 = tpu.matmul %46, %45, %cst_36 {dimension_numbers = #tpu.dot_dimension_numbers<[1], [0], [0], [1], [0, 0, 1, 1], [], []>} : vector<8x512xbf16>, vector<512x32xbf16>, vector<8x32xf32> -> vector<8x32xf32>
    %c0_37 = arith.constant 0 : index
    %c4 = arith.constant 4 : index
    %c0_38 = arith.constant 0 : index
    %48 = vector.load %arg7[%c0_37, %c4, %c0_38] : memref<1x6x512xf32, #tpu.memory_space<vmem>>, vector<1x1x32xf32>
    %49 = vector.shape_cast %48 : vector<1x1x32xf32> to vector<1x32xf32>
    %50 = vector.broadcast %49 : vector<1x32xf32> to vector<8x32xf32>
    %51 = arith.addf %47, %50 : vector<8x32xf32>
    %c0_39 = arith.constant 0 : index
    %c0_40 = arith.constant 0 : index
    %c0_41 = arith.constant 0 : index
    %52 = vector.load %arg6[%c0_39, %c0_40, %c0_41] : memref<1x512x8xbf16, #tpu.memory_space<vmem>>, vector<1x512x8xbf16>
    %53 = vector.shape_cast %52 : vector<1x512x8xbf16> to vector<512x8xbf16>
    %54 = arith.truncf %43 : vector<8x512xf32> to vector<8x512xbf16>
    %cst_42 = arith.constant dense<0.000000e+00> : vector<8x8xf32>
    %55 = tpu.matmul %54, %53, %cst_42 {dimension_numbers = #tpu.dot_dimension_numbers<[1], [0], [0], [1], [0, 0, 1, 1], [], []>} : vector<8x512xbf16>, vector<512x8xbf16>, vector<8x8xf32> -> vector<8x8xf32>
    %c0_43 = arith.constant 0 : index
    %c5 = arith.constant 5 : index
    %c0_44 = arith.constant 0 : index
    %56 = vector.load %arg7[%c0_43, %c5, %c0_44] : memref<1x6x512xf32, #tpu.memory_space<vmem>>, vector<1x1x8xf32>
    %57 = vector.shape_cast %56 : vector<1x1x8xf32> to vector<1x8xf32>
    %58 = vector.broadcast %57 : vector<1x8xf32> to vector<8x8xf32>
    %59 = arith.addf %55, %58 : vector<8x8xf32>
    %60 = arith.subf %3, %51 : vector<8x32xf32>
    %c0_45 = arith.constant 0 : index
    %c0_46 = arith.constant 0 : index
    %61 = vector.load %arg8[%c0_45, %c0_46] : memref<8x32xf32, #tpu.memory_space<vmem>>, vector<8x32xf32>
    tpu.vector_store %arg8[%c0_45, %c0_46], %60 {strides = array<i32>} : memref<8x32xf32, #tpu.memory_space<vmem>>, vector<8x32xf32>,
    %c0_47 = arith.constant 0 : index
    %c0_48 = arith.constant 0 : index
    %62 = vector.load %arg9[%c0_47, %c0_48] : memref<8x8xf32, #tpu.memory_space<vmem>>, vector<8x8xf32>
    %63 = arith.addf %62, %59 : vector<8x8xf32>
    %c0_49 = arith.constant 0 : index
    %c0_50 = arith.constant 0 : index
    %64 = vector.load %arg9[%c0_49, %c0_50] : memref<8x8xf32, #tpu.memory_space<vmem>>, vector<8x8xf32>
    tpu.vector_store %arg9[%c0_49, %c0_50], %63 {strides = array<i32>} : memref<8x8xf32, #tpu.memory_space<vmem>>, vector<8x8xf32>,
    return
  }
  func.func @transform_0(%arg0: i32, %arg1: i32) -> (i32, i32) {
    %c0_i32 = arith.constant 0 : i32
    %c0_i32_0 = arith.constant 0 : i32
    return %arg0, %c0_i32 : i32, i32
  }
  func.func @transform_1(%arg0: i32, %arg1: i32) -> (i32, i32, i32) {
    %c0_i32 = arith.constant 0 : i32
    %c0_i32_0 = arith.constant 0 : i32
    %c0_i32_1 = arith.constant 0 : i32
    return %arg1, %c0_i32, %c0_i32_0 : i32, i32, i32
  }
  func.func @transform_2(%arg0: i32, %arg1: i32) -> (i32, i32, i32, i32) {
    %c0_i32 = arith.constant 0 : i32
    %c0_i32_0 = arith.constant 0 : i32
    %c0_i32_1 = arith.constant 0 : i32
    %c0_i32_2 = arith.constant 0 : i32
    return %arg1, %c0_i32, %c0_i32_0, %c0_i32_1 : i32, i32, i32, i32
  }
  func.func @transform_3(%arg0: i32, %arg1: i32) -> (i32, i32, i32) {
    %c0_i32 = arith.constant 0 : i32
    %c0_i32_0 = arith.constant 0 : i32
    %c0_i32_1 = arith.constant 0 : i32
    return %arg1, %c0_i32, %c0_i32_0 : i32, i32, i32
  }
  func.func @transform_4(%arg0: i32, %arg1: i32) -> (i32, i32, i32) {
    %c0_i32 = arith.constant 0 : i32
    %c0_i32_0 = arith.constant 0 : i32
    %c0_i32_1 = arith.constant 0 : i32
    return %arg1, %c0_i32, %c0_i32_0 : i32, i32, i32
  }
  func.func @transform_5(%arg0: i32, %arg1: i32) -> (i32, i32, i32) {
    %c0_i32 = arith.constant 0 : i32
    %c0_i32_0 = arith.constant 0 : i32
    %c0_i32_1 = arith.constant 0 : i32
    return %arg1, %c0_i32, %c0_i32_0 : i32, i32, i32
  }
  func.func @transform_6(%arg0: i32, %arg1: i32) -> (i32, i32) {
    %c0_i32 = arith.constant 0 : i32
    %c0_i32_0 = arith.constant 0 : i32
    return %arg0, %c0_i32 : i32, i32
  }
  func.func @transform_7(%arg0: i32, %arg1: i32) -> (i32, i32) {
    %c0_i32 = arith.constant 0 : i32
    %c0_i32_0 = arith.constant 0 : i32
    return %arg0, %c0_i32 : i32, i32
  }
}

</mosaic_0001>

<bundles_post_ra>
// kernel: tpu_custom_call.1
= control target key start
LH: loop header
LB: loop body
LE: loop exit
PB: predicated region body
PF: predicated region fallthrough
CT: control target
= control target key end

     0   :  { %s8441_s0 = inlined_call_operand.hbm [shape: f32[8,32], index: 0, kind: input, shape index: {}]   ;;  %s8442_s1 = inlined_call_operand.hbm [shape: bf16[2,32,512], index: 1, kind: input, shape index: {}]   ;;  %s8443_s2 = inlined_call_operand.hbm [shape: bf16[2,3,512,512], index: 2, kind: input, shape index: {}]   ;;  %s8444_s3 = inlined_call_operand.vmem [shape: bf16[2,512,32], index: 3, kind: input, shape index: {}]   ;;  %s8445_s4 = inlined_call_operand.vmem [shape: bf16[2,512,8], index: 4, kind: input, shape index: {}]   ;;  %s8446_s5 = inlined_call_operand.vmem [shape: f32[2,6,512], index: 5, kind: input, shape index: {}]   ;;  %s8447_s6 = inlined_call_operand.hbm [shape: f32[8,32], index: 6, kind: output, shape index: {0}]   ;;  %s8448_s7 = inlined_call_operand.hbm [shape: f32[8,8], index: 7, kind: output, shape index: {1}]  }
   0x1   :  { %8450 = sst [smem:[#allocation17_spill]] %s8442_s1 }
   0x2   :  { %13 = vsyncpa [#allocation3], 0 }
   0x3   :  { %14 = vsyncpa [#allocation6], 0 }
   0x4   :  { %16 = vsyncpa [#allocation6 + $0x1], 0 }
   0x5   :  { %17 = vsyncpa [#allocation4], 0 }
   0x6   :  { %18 = vsyncpa [#allocation10], 0  ;;  %s7263_s24 = smov 0   ;;  %s7265_s25 = smov 0  }
   0x7   :  { %s7267_s26 = smov 0   ;;  %s7269_s27 = smov 0  }
   0x8   :  { %s7271_s28 = smov 0   ;;  %s7273_s29 = smov 0  }
   0x9 LB: > { %s33_s30 = sadd.s32 1, %s7211_s28  ;;  %s69_s8 = sadd.s32 1, %s7203_s26  ;;  %s7215_s29 = sphi %s7273_s29, %s24_s29   ;;  %s7211_s28 = sphi %s7271_s28, %s8464_s28   ;;  %s7207_s27 = sphi %s7269_s27, %s8463_s27   ;;  %s7203_s26 = sphi %s7267_s26, %s8462_s26   ;;  %s7199_s25 = sphi %s7265_s25, %s8461_s25   ;;  %s7195_s24 = sphi %s7263_s24, %s8460_s24  }
   0xa   : > { %p34_p0 = scmp.ge.s32.totalorder %s33_s30, 2  ;;  %p76_p1 = scmp.ne.s32.totalorder %s7203_s26, %s7199_s25 }
   0xb   : > { %p77_p2 = scmp.eq.s32.totalorder %s7215_s29, 0  ;;  %p6946_p4 = scmp.lt.s32.totalorder %s7215_s29, 2 }
   0xc   : > { %s8466_s30 = smov (%p34_p0, %s33_s30), 0  ;;  %s276_s11 = sand.u32 1, %s7215_s29  }
   0xd   : > { %8451 = sst [smem:[#allocation15_spill]] %s8466_s30  ;;  %p7300_p3 = por %p77_p2, %p76_p1 }
   0xe   : > { %s66_s10 = ssub.s32 %s7211_s28, %s8466_s30  ;;  %s278_s12 = sand.u32 1, %s7203_s26  }
   0xf   : > { %p67_p5 = scmp.eq.s32.totalorder %s66_s10, 0  ;;  %s6455_s13 = sshll.u32 %s7211_s28, 6 }
  0x10   : > { %s4348_s15 = sshll.u32 %s278_s12, 6  ;;  %s8454_s1 = sld [smem:[#allocation17_spill]] }
  0x11   : > { %s7311_s14 = scalar_select %p67_p5, %s7203_s26, %s69_s8  }
  0x12   : > { %s280_s20 = scalar_lea.vmem [#allocation5], %s4348_s15  ;;  %p7320_p6 = pnand %p6946_p4, %p7300_p3 }
  0x13   : > { %8453 = sst [smem:[#allocation16_spill]] %s7311_s14  ;;  %s288_s21 = sshll.u32 %s280_s20, 4  ;;  %s289_s21 = int_to_ptr.vmem [resolvable:$true] %s288_s21 }
  0x14   : > { %s6915_s23 = smul.u32 3072, %s278_s12  ;;  %s7324_s8 = scalar_lea.sflag [#allocation6], %s276_s11 }
  0x15   : > { %s7217_s10 = smov 256   ;;  %s7330_s16 = sadd.s32 4294967295, %s7215_s29  }
  0x16   : > { %s285_s18 = scalar_lea.hbm %s8454_s1, %s6455_s13  ;;  %s7218_s13 = smov 16  }
  0x17   : > { %s286_s19 = sshll.u32 %s285_s18, 4  ;;  %p82_p7 = scmp.ne.s32.totalorder %s7199_s25, %s7195_s24  ;;  %s287_s19 = int_to_ptr.hbm [resolvable:$true] %s286_s19 }
  0x18   : > { %6941 = dma.hbm_to_vmem [thread:$0]  (!%p7320_p6), %s287_s19, 1024, %s289_s21, %s7324_s8, %s7217_s10, %s7217_s10, %s7218_s13  }
  0x19   : > { %p83_p8 = scmp.eq.s32.totalorder %s7330_s16, 0  ;;  %p4345_p9 = scmp.ge.s32.totalorder %s7215_s29, 1 }
  0x1a   : > { %p249_p10 = scmp.lt.s32.totalorder %s7215_s29, 3  ;;  %s263_s17 = sshll.u32 %s8441_s0, 4  ;;  %s264_s17 = int_to_ptr.hbm [resolvable:$true] %s263_s17 }
  0x1b   : > { %p7339_p11 = por %p83_p8, %p82_p7  ;;  %s7219_s24 = smov [#allocation2]  }
  0x1c   : > { %p7343_p12 = pnand %p4345_p9, %p249_p10  ;;  %s265_s18 = sshll.u32 %s7219_s24, 4  ;;  %s266_s18 = int_to_ptr.vmem [resolvable:$true] %s265_s18 }
  0x1d   : > { %s6916_s19 = smul.u32 3072, %s7211_s28  ;;  %s302_s20 = scalar_lea.vmem [#allocation7], %s6915_s23 }
  0x1e   : > { %p6934_p13 = pneg %p7343_p12  ;;  %s310_s21 = sshll.u32 %s302_s20, 4  ;;  %s311_s21 = int_to_ptr.vmem [resolvable:$true] %s310_s21 }
  0x1f   : > { %s307_s14 = scalar_lea.hbm %s8443_s2, %s6916_s19  ;;  %346 = sbr.rel (%p7343_p12) target bundleno = 970 (0x3ca), region = 44 }
  0x20   : > { %p6935_p0 = pnand %p6934_p13, %p83_p8  ;;  %s308_s12 = sshll.u32 %s307_s14, 4  ;;  %s309_s12 = int_to_ptr.hbm [resolvable:$true] %s308_s12 }
  0x21   : > { %6944 = dma.hbm_to_vmem [thread:$0]  (!%p7320_p6), %s309_s12, 49152, %s311_s21, %s7324_s8, %s7217_s10, %s7217_s10, %s7218_s13  }
  0x22   : > { %6937 = dma.hbm_to_vmem [thread:$0]  (!%p6935_p0), %s264_s17, 128, %s266_s18, [#allocation3]  }
  0x24   : > { %7178 = dma.done.wait (%p83_p8), [#allocation3], 128  }
  0x25   : > { %7180 = vsyncadd (%p83_p8), [#allocation3], 4294967168  ;;  %s353_s1 = sand.u32 1, %s7330_s16   ;;  %s355_s30 = sand.u32 1, %s7199_s25  }
  0x26   : > { %s4354_s23 = sshll.u32 %s355_s30, 6  ;;  %s354_s14 = scalar_lea.sflag [#allocation6], %s353_s1 }
  0x27   : > { %s7369_s15 = scalar_lea.vmem [#allocation5], %s4354_s23 }
  0x28   : > { %7182 = dma.done.wait (%p7339_p11), %s354_s14, 50176  }
  0x29   : > { %7184 = vsyncadd (%p7339_p11), %s354_s14, 4294917120  ;;  %s6917_s22 = smul.u32 3072, %s355_s30  ;;  %p414_p1 = scmp.lt.s32.totalorder %s7207_s27, 1 }
  0x2a   : > { %p4361_p2 = scmp.ne.s32.totalorder %s7207_s27, 0 }
  0x2b   : > { %s415_s8 = scalar_select %p414_p1, %s7207_s27, 1 }
  0x2c   : > { %s7392_s1 = scalar_lea.vmem [#allocation7], %s6917_s22  ;;  %433 = sbr.rel (%p4361_p2) target bundleno = 52 (0x34), region = 60 }
  0x2d   : > { %s6456_s10 = sshll.u32 %s415_s8, 8  ;;  %s6458_s13 = sshll.u32 %s415_s8, 5 }
  0x2e   : > { %s7380_s24 = scalar_lea.vmem %s8444_s3, %s6456_s10  ;;  %s7385_s20 = scalar_lea.vmem %s8445_s4, %s6456_s10 }
  0x2f   : > { %s7390_s12 = scalar_lea.vmem %s8446_s5, %s6458_s13 }
  0x31   : > { %v434_v0 = vld [vmem:[#allocation2] sm:$0xff]  ;;  %vm435_vm0 = vcmask 261120   ;;  %vm437_vm1 = vcmask 64512   ;;  %v7220_v1 = vmov 0.0  }
  0x32   : > { %436 = vst.msk [vmem:[#allocation8] sm:$0xff] %vm435_vm0, %v434_v0 }
  0x33   : > { %438 = vst.msk [vmem:[#allocation9] sm:$0xff] %vm437_vm1, %v7220_v1 }
  0x34 PF: > { %v4380_v2 = vld [vmem:[%s7369_s15 + $0x20] sm:$0xf]  ;;  %v6465_v3 = vld [vmem:[%s7369_s15 + $0x2c] sm:$0xf0]  ;;  %v6463_v4 = vld [vmem:[%s7369_s15 + $0x24] sm:$0xf] }
  0x35   : > { %v4381_v5 = vor.u32 %v6465_v3, %v4380_v2  ;;  %v4382_v6 = vld [vmem:[%s7369_s15 + $0x30] sm:$0xf0]  ;;  %v4388_v7 = vld [vmem:[%s7369_s15 + $0x28] sm:$0xf]  ;;  %v6466_v8 = vld [vmem:[%s7369_s15 + $0x34] sm:$0xf0] }
  0x36   : > { %v4385_v9 = vor.u32 %v6463_v4, %v4382_v6  ;;  %v4389_v10 = vor.u32 %v6466_v8, %v4388_v7  ;;  %v6464_v11 = vld [vmem:[%s7369_s15 + $0x2c] sm:$0xf]  ;;  %v4390_v12 = vld [vmem:[%s7369_s15 + $0x38] sm:$0xf0]  ;;  %v4364_v13 = vld [vmem:[%s7369_s15] sm:$0xf] }
  0x37   : > { %509 = vmatpush.bf16.msra.mxu0 %v4381_v5  ;;  %v4393_v14 = vor.u32 %v6464_v11, %v4390_v12  ;;  %v6461_v15 = vld [vmem:[%s7369_s15 + $0xc] sm:$0xf0]  ;;  %v6459_v16 = vld [vmem:[%s7369_s15 + $0x4] sm:$0xf]  ;;  %v4366_v17 = vld [vmem:[%s7369_s15 + $0x10] sm:$0xf0] }
  0x38   : > { %522 = vmatpush.bf16.msra.mxu1 %v4385_v9  ;;  %535 = vmatpush.bf16.msra.mxu2 %v4389_v10  ;;  %v4365_v18 = vor.u32 %v6461_v15, %v4364_v13  ;;  %v4369_v19 = vor.u32 %v6459_v16, %v4366_v17  ;;  %v4372_v20 = vld [vmem:[%s7369_s15 + $0x8] sm:$0xf]  ;;  %v6462_v21 = vld [vmem:[%s7369_s15 + $0x14] sm:$0xf0]  ;;  %v6460_v22 = vld [vmem:[%s7369_s15 + $0xc] sm:$0xf] }
  0x39   : > { %548 = vmatpush.bf16.msra.mxu3 %v4393_v14  ;;  %v4373_v23 = vor.u32 %v6462_v21, %v4372_v20  ;;  %v4374_v24 = vld [vmem:[%s7369_s15 + $0x18] sm:$0xf0]  ;;  %v439_v25 = vld [vmem:[#allocation8] sm:$0xff]  ;;  %vm499_vm2 = vcmask 261120   ;;  %v6497_v29 = vld [vmem:[%s7392_s1 + $0xec] sm:$0xf0] }
  0x3a   : > { %v4513_v26 = vld [vmem:[%s7392_s1 + $0xe0] sm:$0xf]  ;;  %v4377_v27 = vor.u32 %v6460_v22, %v4374_v24  ;;  %v448_v28 = vpack.c.bf16 %v439_v25, %v439_v25  ;;  %v6529_v31 = vld [vmem:[%s7392_s1 + $0x1ec] sm:$0xf0]  ;;  %s7221_s27 = smov [#allocation8]   ;;  %s4184_s15 = sshll.u32 %s8447_s6, 4  ;;  %s4185_s15 = int_to_ptr.hbm [resolvable:$true] %s4184_s15 }
  0x3b   : > { %v4641_v30 = vld [vmem:[%s7392_s1 + $0x1e0] sm:$0xf]  ;;  %510 = vmatpush.bf16.msra.mxu0 %v4365_v18  ;;  %v4514_v32 = vor.u32 %v6497_v29, %v4513_v26  ;;  %v6493_v35 = vld [vmem:[%s7392_s1 + $0xcc] sm:$0xf0]  ;;  %s4182_s30 = sshll.u32 %s7221_s27, 4  ;;  %p6948_p3 = scmp.eq.s32.totalorder %s7330_s16, 1  ;;  %s4183_s30 = int_to_ptr.vmem [resolvable:$true] %s4182_s30 }
  0x3c   : > { %v4642_v33 = vor.u32 %v6529_v31, %v4641_v30  ;;  %v4497_v34 = vld [vmem:[%s7392_s1 + $0xc0] sm:$0xf]  ;;  %523 = vmatpush.bf16.msra.mxu1 %v4369_v19  ;;  %536 = vmatpush.bf16.msra.mxu2 %v4373_v23  ;;  %v6525_v37 = vld [vmem:[%s7392_s1 + $0x1cc] sm:$0xf0]  ;;  %s7222_s22 = smov [#allocation9]   ;;  %s4198_s11 = sshll.u32 %s8448_s7, 4  ;;  %s4199_s11 = int_to_ptr.hbm [resolvable:$true] %s4198_s11 }
  0x3d   : > { %v4625_v36 = vld [vmem:[%s7392_s1 + $0x1c0] sm:$0xf]  ;;  %v6561_v39 = vld [vmem:[%s7392_s1 + $0x2ec] sm:$0xf0]  ;;  %549 = vmatpush.bf16.msra.mxu3 %v4377_v27  ;;  %v4498_v40 = vor.u32 %v6493_v35, %v4497_v34  ;;  %s4196_s8 = sshll.u32 %s7222_s22, 4  ;;  %vm4172_vm3 = vcmask 64512   ;;  %s4197_s8 = int_to_ptr.vmem [resolvable:$true] %s4196_s8 }
  0x3e   : > { %v4769_v38 = vld [vmem:[%s7392_s1 + $0x2e0] sm:$0xf]  ;;  %v6593_v43 = vld [vmem:[%s7392_s1 + $0x3ec] sm:$0xf0]  ;;  %4394 = vmatmul.msk.bf16.vlgmr.msra.gmra.mxu0 %vm499_vm2, %v448_v28  ;;  %v4626_v45 = vor.u32 %v6525_v37, %v4625_v36 }
  0x3f   : > { %1342 = vmatpush.bf16.msrb.mxu0 %v4514_v32  ;;  %v4770_v41 = vor.u32 %v6561_v39, %v4769_v38  ;;  %v4897_v42 = vld [vmem:[%s7392_s1 + $0x3e0] sm:$0xf]  ;;  %v6489_v47 = vld [vmem:[%s7392_s1 + $0xac] sm:$0xf0]  ;;  %4395 = vmatmul.msk.bf16.vlgmr.msra.gmra.mxu1 %vm499_vm2, %v448_v28 }
  0x40   : > { %v4481_v44 = vld [vmem:[%s7392_s1 + $0xa0] sm:$0xf]  ;;  %1355 = vmatpush.bf16.msrb.mxu1 %v4642_v33  ;;  %v4898_v46 = vor.u32 %v6593_v43, %v4897_v42  ;;  %v6521_v49 = vld [vmem:[%s7392_s1 + $0x1ac] sm:$0xf0]  ;;  %4396 = vmatmul.msk.bf16.vlgmr.msra.gmra.mxu2 %vm499_vm2, %v448_v28 }
  0x41   : > { %v4609_v48 = vld [vmem:[%s7392_s1 + $0x1a0] sm:$0xf]  ;;  %v6557_v51 = vld [vmem:[%s7392_s1 + $0x2cc] sm:$0xf0]  ;;  %4397 = vmatmul.msk.bf16.vlgmr.msra.gmra.mxu3 %vm499_vm2, %v448_v28  ;;  %1368 = vmatpush.bf16.msrb.mxu2 %v4770_v41  ;;  %v4482_v55 = vor.u32 %v6489_v47, %v4481_v44 }
  0x42   : > { %v4753_v50 = vld [vmem:[%s7392_s1 + $0x2c0] sm:$0xf]  ;;  %v6589_v54 = vld [vmem:[%s7392_s1 + $0x3cc] sm:$0xf0]  ;;  %1381 = vmatpush.bf16.msrb.mxu3 %v4898_v46  ;;  %v4610_v60 = vor.u32 %v6521_v49, %v4609_v48 }
  0x43   : > { %v4881_v52 = vld [vmem:[%s7392_s1 + $0x3c0] sm:$0xf]  ;;  %v4754_v53 = vor.u32 %v6557_v51, %v4753_v50  ;;  %1343 = vmatpush.bf16.msrb.mxu0 %v4498_v40  ;;  %v6485_v58 = vld [vmem:[%s7392_s1 + $0x8c] sm:$0xf0]  ;;  %v6495_v50 = vld [vmem:[%s7392_s1 + $0xe4] sm:$0xf] }
  0x44   : > { %v4882_v56 = vor.u32 %v6589_v54, %v4881_v52  ;;  %v4465_v57 = vld [vmem:[%s7392_s1 + $0x80] sm:$0xf]  ;;  %1356 = vmatpush.bf16.msrb.mxu1 %v4626_v45  ;;  %v6553_v61 = vld [vmem:[%s7392_s1 + $0x2ac] sm:$0xf0]  ;;  %v4515_v51 = vld [vmem:[%s7392_s1 + $0xf0] sm:$0xf0] }
  0x45   : > { %v4737_v59 = vld [vmem:[%s7392_s1 + $0x2a0] sm:$0xf]  ;;  %v6585_v63 = vld [vmem:[%s7392_s1 + $0x3ac] sm:$0xf0]  ;;  %1369 = vmatpush.bf16.msrb.mxu2 %v4754_v53  ;;  %v4466_v3 = vor.u32 %v6485_v58, %v4465_v57  ;;  %v6527_v52 = vld [vmem:[%s7392_s1 + $0x1e4] sm:$0xf] }
  0x46   : > { %v4865_v62 = vld [vmem:[%s7392_s1 + $0x3a0] sm:$0xf]  ;;  %v6517_v1 = vld [vmem:[%s7392_s1 + $0x18c] sm:$0xf0]  ;;  %v4738_v2 = vor.u32 %v6553_v61, %v4737_v59  ;;  %1382 = vmatpush.bf16.msrb.mxu3 %v4882_v56  ;;  %v4643_v53 = vld [vmem:[%s7392_s1 + $0x1f0] sm:$0xf0] }
  0x47   : > { %v4593_v0 = vld [vmem:[%s7392_s1 + $0x180] sm:$0xf]  ;;  %1344 = vmatpush.bf16.msrb.mxu0 %v4482_v55  ;;  %v4866_v4 = vor.u32 %v6585_v63, %v4865_v62  ;;  %v6549_v7 = vld [vmem:[%s7392_s1 + $0x28c] sm:$0xf0]  ;;  %v6491_v57 = vld [vmem:[%s7392_s1 + $0xc4] sm:$0xf]  ;;  %v4518_v62 = vor.u32 %v6495_v50, %v4515_v51 }
  0x48   : > { %v4449_v5 = vld [vmem:[%s7392_s1 + $0x60] sm:$0xf]  ;;  %1357 = vmatpush.bf16.msrb.mxu1 %v4610_v60  ;;  %v4594_v8 = vor.u32 %v6517_v1, %v4593_v0  ;;  %v6481_v9 = vld [vmem:[%s7392_s1 + $0x6c] sm:$0xf0]  ;;  %v6559_v0 = vld [vmem:[%s7392_s1 + $0x2e4] sm:$0xf] }
  0x49   : > { %v4721_v6 = vld [vmem:[%s7392_s1 + $0x280] sm:$0xf]  ;;  %v6581_v11 = vld [vmem:[%s7392_s1 + $0x38c] sm:$0xf0]  ;;  %1370 = vmatpush.bf16.msrb.mxu2 %v4738_v2  ;;  %v4450_v15 = vor.u32 %v6481_v9, %v4449_v5  ;;  %v4771_v1 = vld [vmem:[%s7392_s1 + $0x2f0] sm:$0xf0]  ;;  %v4646_v2 = vor.u32 %v6527_v52, %v4643_v53 }
  0x4a   : > { %v4849_v10 = vld [vmem:[%s7392_s1 + $0x380] sm:$0xf]  ;;  %v6513_v13 = vld [vmem:[%s7392_s1 + $0x16c] sm:$0xf0]  ;;  %v4722_v14 = vor.u32 %v6549_v7, %v4721_v6  ;;  %1383 = vmatpush.bf16.msrb.mxu3 %v4866_v4  ;;  %v6591_v4 = vld [vmem:[%s7392_s1 + $0x3e4] sm:$0xf] }
  0x4b   : > { %v4577_v12 = vld [vmem:[%s7392_s1 + $0x160] sm:$0xf]  ;;  %1345 = vmatpush.bf16.msrb.mxu0 %v4466_v3  ;;  %v4850_v16 = vor.u32 %v6581_v11, %v4849_v10  ;;  %v6545_v19 = vld [vmem:[%s7392_s1 + $0x26c] sm:$0xf0]  ;;  %v4499_v3 = vld [vmem:[%s7392_s1 + $0xd0] sm:$0xf0]  ;;  %v4774_v10 = vor.u32 %v6559_v0, %v4771_v1 }
  0x4c   : > { %v4433_v17 = vld [vmem:[%s7392_s1 + $0x40] sm:$0xf]  ;;  %1358 = vmatpush.bf16.msrb.mxu1 %v4594_v8  ;;  %v4578_v20 = vor.u32 %v6513_v13, %v4577_v12  ;;  %v6477_v21 = vld [vmem:[%s7392_s1 + $0x4c] sm:$0xf0]  ;;  %v4899_v5 = vld [vmem:[%s7392_s1 + $0x3f0] sm:$0xf0]  ;;  %v4502_v11 = vor.u32 %v6491_v57, %v4499_v3 }
  0x4d   : > { %v4705_v18 = vld [vmem:[%s7392_s1 + $0x260] sm:$0xf]  ;;  %v6577_v23 = vld [vmem:[%s7392_s1 + $0x36c] sm:$0xf0]  ;;  %1371 = vmatpush.bf16.msrb.mxu2 %v4722_v14  ;;  %v4434_v27 = vor.u32 %v6477_v21, %v4433_v17  ;;  %v6523_v6 = vld [vmem:[%s7392_s1 + $0x1c4] sm:$0xf]  ;;  %v4902_v12 = vor.u32 %v6591_v4, %v4899_v5 }
  0x4e   : > { %v4833_v22 = vld [vmem:[%s7392_s1 + $0x360] sm:$0xf]  ;;  %v6509_v25 = vld [vmem:[%s7392_s1 + $0x14c] sm:$0xf0]  ;;  %v4706_v26 = vor.u32 %v6545_v19, %v4705_v18  ;;  %1384 = vmatpush.bf16.msrb.mxu3 %v4850_v16  ;;  %v4627_v7 = vld [vmem:[%s7392_s1 + $0x1d0] sm:$0xf0] }
  0x4f   : > { %v4561_v24 = vld [vmem:[%s7392_s1 + $0x140] sm:$0xf]  ;;  %1346 = vmatpush.bf16.msrb.mxu0 %v4450_v15  ;;  %v4834_v28 = vor.u32 %v6577_v23, %v4833_v22  ;;  %v6541_v31 = vld [vmem:[%s7392_s1 + $0x24c] sm:$0xf0]  ;;  %v6487_v13 = vld [vmem:[%s7392_s1 + $0xa4] sm:$0xf]  ;;  %v4630_v16 = vor.u32 %v6523_v6, %v4627_v7 }
  0x50   : > { %v4417_v29 = vld [vmem:[%s7392_s1 + $0x20] sm:$0xf]  ;;  %1359 = vmatpush.bf16.msrb.mxu1 %v4578_v20  ;;  %v4562_v32 = vor.u32 %v6509_v25, %v4561_v24  ;;  %v6473_v33 = vld [vmem:[%s7392_s1 + $0x2c] sm:$0xf0]  ;;  %v6555_v14 = vld [vmem:[%s7392_s1 + $0x2c4] sm:$0xf] }
  0x51   : > { %v4689_v30 = vld [vmem:[%s7392_s1 + $0x240] sm:$0xf]  ;;  %v6573_v35 = vld [vmem:[%s7392_s1 + $0x34c] sm:$0xf0]  ;;  %1372 = vmatpush.bf16.msrb.mxu2 %v4706_v26  ;;  %v4418_v40 = vor.u32 %v6473_v33, %v4417_v29  ;;  %v4755_v15 = vld [vmem:[%s7392_s1 + $0x2d0] sm:$0xf0] }
  0x52   : > { %v4817_v34 = vld [vmem:[%s7392_s1 + $0x340] sm:$0xf]  ;;  %v6505_v37 = vld [vmem:[%s7392_s1 + $0x12c] sm:$0xf0]  ;;  %v4690_v38 = vor.u32 %v6541_v31, %v4689_v30  ;;  %1385 = vmatpush.bf16.msrb.mxu3 %v4834_v28  ;;  %v4483_v17 = vld [vmem:[%s7392_s1 + $0xb0] sm:$0xf0]  ;;  %v4758_v22 = vor.u32 %v6555_v14, %v4755_v15 }
  0x53   : > { %v4545_v36 = vld [vmem:[%s7392_s1 + $0x120] sm:$0xf]  ;;  %1347 = vmatpush.bf16.msrb.mxu0 %v4434_v27  ;;  %v4818_v41 = vor.u32 %v6573_v35, %v4817_v34  ;;  %v6469_v42 = vld [vmem:[%s7392_s1 + $0xc] sm:$0xf0]  ;;  %v6587_v18 = vld [vmem:[%s7392_s1 + $0x3c4] sm:$0xf]  ;;  %v4486_v23 = vor.u32 %v6487_v13, %v4483_v17 }
  0x54   : > { %v4401_v39 = vld [vmem:[%s7392_s1] sm:$0xf]  ;;  %v6537_v44 = vld [vmem:[%s7392_s1 + $0x22c] sm:$0xf0]  ;;  %1360 = vmatpush.bf16.msrb.mxu1 %v4562_v32  ;;  %v4546_v45 = vor.u32 %v6505_v37, %v4545_v36  ;;  %v4883_v19 = vld [vmem:[%s7392_s1 + $0x3d0] sm:$0xf0] }
  0x55   : > { %v4673_v43 = vld [vmem:[%s7392_s1 + $0x220] sm:$0xf]  ;;  %v6569_v48 = vld [vmem:[%s7392_s1 + $0x32c] sm:$0xf0]  ;;  %1373 = vmatpush.bf16.msrb.mxu2 %v4690_v38  ;;  %v4402_v55 = vor.u32 %v6469_v42, %v4401_v39  ;;  %v6519_v20 = vld [vmem:[%s7392_s1 + $0x1a4] sm:$0xf]  ;;  %v4886_v24 = vor.u32 %v6587_v18, %v4883_v19 }
  0x56   : > { %v4529_v46 = vld [vmem:[%s7392_s1 + $0x100] sm:$0xf]  ;;  %v6501_v49 = vld [vmem:[%s7392_s1 + $0x10c] sm:$0xf0]  ;;  %v4674_v54 = vor.u32 %v6537_v44, %v4673_v43  ;;  %1386 = vmatpush.bf16.msrb.mxu3 %v4818_v41  ;;  %v4611_v21 = vld [vmem:[%s7392_s1 + $0x1b0] sm:$0xf0] }
  0x57   : > { %v4801_v47 = vld [vmem:[%s7392_s1 + $0x320] sm:$0xf]  ;;  %1348 = vmatpush.bf16.msrb.mxu0 %v4418_v40  ;;  %v6533_v59 = vld [vmem:[%s7392_s1 + $0x20c] sm:$0xf0]  ;;  %v4530_v61 = vor.u32 %v6501_v49, %v4529_v46  ;;  %v6483_v25 = vld [vmem:[%s7392_s1 + $0x84] sm:$0xf]  ;;  %v4614_v28 = vor.u32 %v6519_v20, %v4611_v21 }
  0x58   : > { %v4802_v56 = vor.u32 %v6569_v48, %v4801_v47  ;;  %v4657_v58 = vld [vmem:[%s7392_s1 + $0x200] sm:$0xf]  ;;  %1361 = vmatpush.bf16.msrb.mxu1 %v4546_v45  ;;  %v6565_v63 = vld [vmem:[%s7392_s1 + $0x30c] sm:$0xf0]  ;;  %v6551_v26 = vld [vmem:[%s7392_s1 + $0x2a4] sm:$0xf] }
  0x59   : > { %v4785_v60 = vld [vmem:[%s7392_s1 + $0x300] sm:$0xf]  ;;  %1374 = vmatpush.bf16.msrb.mxu2 %v4674_v54  ;;  %v4658_v8 = vor.u32 %v6533_v59, %v4657_v58  ;;  %v4739_v27 = vld [vmem:[%s7392_s1 + $0x2b0] sm:$0xf0]  ;;  %v6583_v30 = vld [vmem:[%s7392_s1 + $0x3a4] sm:$0xf] }
  0x5a   : > { %1387 = vmatpush.bf16.msrb.mxu3 %v4802_v56  ;;  %v4786_v9 = vor.u32 %v6565_v63, %v4785_v60  ;;  %v4467_v29 = vld [vmem:[%s7392_s1 + $0x90] sm:$0xf0]  ;;  %v6515_v32 = vld [vmem:[%s7392_s1 + $0x184] sm:$0xf]  ;;  %v4742_v34 = vor.u32 %v6551_v26, %v4739_v27 }
  0x5b   : > { %1349 = vmatpush.bf16.msrb.mxu0 %v4402_v55  ;;  %v4867_v31 = vld [vmem:[%s7392_s1 + $0x3b0] sm:$0xf0]  ;;  %v4470_v35 = vor.u32 %v6483_v25, %v4467_v29  ;;  %v6479_v37 = vld [vmem:[%s7392_s1 + $0x64] sm:$0xf] }
  0x5c   : > { %1362 = vmatpush.bf16.msrb.mxu1 %v4530_v61  ;;  %v4595_v33 = vld [vmem:[%s7392_s1 + $0x190] sm:$0xf0]  ;;  %v4870_v36 = vor.u32 %v6583_v30, %v4867_v31  ;;  %v6547_v38 = vld [vmem:[%s7392_s1 + $0x284] sm:$0xf] }
  0x5d   : > { %1375 = vmatpush.bf16.msrb.mxu2 %v4658_v8  ;;  %v4723_v39 = vld [vmem:[%s7392_s1 + $0x290] sm:$0xf0]  ;;  %v4598_v40 = vor.u32 %v6515_v32, %v4595_v33  ;;  %v6579_v42 = vld [vmem:[%s7392_s1 + $0x384] sm:$0xf] }
  0x5e   : > { %1388 = vmatpush.bf16.msrb.mxu3 %v4786_v9  ;;  %v4451_v41 = vld [vmem:[%s7392_s1 + $0x70] sm:$0xf0]  ;;  %v6511_v44 = vld [vmem:[%s7392_s1 + $0x164] sm:$0xf]  ;;  %v4726_v46 = vor.u32 %v6547_v38, %v4723_v39  ;;  %v6530_v38 = vld [vmem:[%s7392_s1 + $0x1f4] sm:$0xf0] }
  0x5f   : > { %1394 = vmatpush.bf16.msra.mxu0 %v4518_v62  ;;  %v4851_v43 = vld [vmem:[%s7392_s1 + $0x390] sm:$0xf0]  ;;  %v4454_v47 = vor.u32 %v6479_v37, %v4451_v41  ;;  %v6475_v50 = vld [vmem:[%s7392_s1 + $0x44] sm:$0xf]  ;;  %v4649_v37 = vld [vmem:[%s7392_s1 + $0x1e8] sm:$0xf] }
  0x60   : > { %1407 = vmatpush.bf16.msra.mxu1 %v4646_v2  ;;  %v4579_v45 = vld [vmem:[%s7392_s1 + $0x170] sm:$0xf0]  ;;  %v4854_v48 = vor.u32 %v6579_v42, %v4851_v43  ;;  %v6507_v52 = vld [vmem:[%s7392_s1 + $0x144] sm:$0xf] }
  0x61   : > { %1420 = vmatpush.bf16.msra.mxu2 %v4774_v10  ;;  %v4582_v49 = vor.u32 %v6511_v44, %v4579_v45  ;;  %v4435_v51 = vld [vmem:[%s7392_s1 + $0x50] sm:$0xf0]  ;;  %v6543_v56 = vld [vmem:[%s7392_s1 + $0x264] sm:$0xf]  ;;  %v4650_v45 = vor.u32 %v6530_v38, %v4649_v37 }
  0x62   : > { %1433 = vmatpush.bf16.msra.mxu3 %v4902_v12  ;;  %v4563_v53 = vld [vmem:[%s7392_s1 + $0x150] sm:$0xf0]  ;;  %v4438_v54 = vor.u32 %v6475_v50, %v4435_v51  ;;  %v6575_v58 = vld [vmem:[%s7392_s1 + $0x364] sm:$0xf]  ;;  %v6526_v50 = vld [vmem:[%s7392_s1 + $0x1d4] sm:$0xf0] }
  0x63   : > { %1395 = vmatpush.bf16.msra.mxu0 %v4502_v11  ;;  %v4566_v55 = vor.u32 %v6507_v52, %v4563_v53  ;;  %v4707_v57 = vld [vmem:[%s7392_s1 + $0x270] sm:$0xf0]  ;;  %v6471_v62 = vld [vmem:[%s7392_s1 + $0x24] sm:$0xf] }
  0x64   : > { %1408 = vmatpush.bf16.msra.mxu1 %v4630_v16  ;;  %v4710_v59 = vor.u32 %v6543_v56, %v4707_v57  ;;  %v4835_v60 = vld [vmem:[%s7392_s1 + $0x370] sm:$0xf0]  ;;  %v6503_v1 = vld [vmem:[%s7392_s1 + $0x124] sm:$0xf]  ;;  %v4777_v56 = vld [vmem:[%s7392_s1 + $0x2e8] sm:$0xf] }
  0x65   : > { %1421 = vmatpush.bf16.msra.mxu2 %v4758_v22  ;;  %v4838_v61 = vor.u32 %v6575_v58, %v4835_v60  ;;  %v4419_v63 = vld [vmem:[%s7392_s1 + $0x30] sm:$0xf0]  ;;  %v6539_v4 = vld [vmem:[%s7392_s1 + $0x244] sm:$0xf]  ;;  %v6562_v57 = vld [vmem:[%s7392_s1 + $0x2f4] sm:$0xf0] }
  0x66   : > { %1434 = vmatpush.bf16.msra.mxu3 %v4886_v24  ;;  %v4422_v0 = vor.u32 %v6471_v62, %v4419_v63  ;;  %v4547_v2 = vld [vmem:[%s7392_s1 + $0x130] sm:$0xf0]  ;;  %v6571_v6 = vld [vmem:[%s7392_s1 + $0x344] sm:$0xf]  ;;  %v4905_v58 = vld [vmem:[%s7392_s1 + $0x3e8] sm:$0xf] }
  0x67   : > { %1396 = vmatpush.bf16.msra.mxu0 %v4486_v23  ;;  %v4550_v3 = vor.u32 %v6503_v1, %v4547_v2  ;;  %v4691_v5 = vld [vmem:[%s7392_s1 + $0x250] sm:$0xf0]  ;;  %v6467_v10 = vld [vmem:[%s7392_s1 + $0x4] sm:$0xf]  ;;  %v6594_v62 = vld [vmem:[%s7392_s1 + $0x3f4] sm:$0xf0] }
  0x68   : > { %1409 = vmatpush.bf16.msra.mxu1 %v4614_v28  ;;  %v4694_v7 = vor.u32 %v6539_v4, %v4691_v5  ;;  %v4819_v8 = vld [vmem:[%s7392_s1 + $0x350] sm:$0xf0]  ;;  %v6499_v12 = vld [vmem:[%s7392_s1 + $0x104] sm:$0xf]  ;;  %v4489_v63 = vld [vmem:[%s7392_s1 + $0xa8] sm:$0xf]  ;;  %v4778_v5 = vor.u32 %v6562_v57, %v4777_v56 }
  0x69   : > { %1422 = vmatpush.bf16.msra.mxu2 %v4742_v34  ;;  %v4822_v9 = vor.u32 %v6571_v6, %v4819_v8  ;;  %v4403_v11 = vld [vmem:[%s7392_s1 + $0x10] sm:$0xf0]  ;;  %v6535_v16 = vld [vmem:[%s7392_s1 + $0x224] sm:$0xf]  ;;  %v4521_v34 = vld [vmem:[%s7392_s1 + $0xe8] sm:$0xf] }
  0x6a   : > { %1435 = vmatpush.bf16.msra.mxu3 %v4870_v36  ;;  %v4406_v13 = vor.u32 %v6467_v10, %v4403_v11  ;;  %v4531_v14 = vld [vmem:[%s7392_s1 + $0x110] sm:$0xf0]  ;;  %v6567_v19 = vld [vmem:[%s7392_s1 + $0x324] sm:$0xf]  ;;  %v4617_v2 = vld [vmem:[%s7392_s1 + $0x1a8] sm:$0xf] }
  0x6b   : > { %1397 = vmatpush.bf16.msra.mxu0 %v4470_v35  ;;  %v4534_v15 = vor.u32 %v6499_v12, %v4531_v14  ;;  %v4675_v17 = vld [vmem:[%s7392_s1 + $0x230] sm:$0xf0]  ;;  %v6531_v22 = vld [vmem:[%s7392_s1 + $0x204] sm:$0xf]  ;;  %v6498_v35 = vld [vmem:[%s7392_s1 + $0xf4] sm:$0xf0] }
  0x6c   : > { %1410 = vmatpush.bf16.msra.mxu1 %v4598_v40  ;;  %v4678_v18 = vor.u32 %v6535_v16, %v4675_v17  ;;  %v4803_v20 = vld [vmem:[%s7392_s1 + $0x330] sm:$0xf0]  ;;  %v6563_v25 = vld [vmem:[%s7392_s1 + $0x304] sm:$0xf]  ;;  %v4522_v42 = vor.u32 %v6498_v35, %v4521_v34  ;;  %v6558_v10 = vld [vmem:[%s7392_s1 + $0x2d4] sm:$0xf0] }
  0x6d   : > { %1423 = vmatpush.bf16.msra.mxu2 %v4726_v46  ;;  %v4806_v21 = vor.u32 %v6567_v19, %v4803_v20  ;;  %v4659_v23 = vld [vmem:[%s7392_s1 + $0x210] sm:$0xf0]  ;;  %v449_v28 = vld [vmem:[%s7390_s12] ss:$8 sm:$0xf] }
  0x6e   : > { %1436 = vmatpush.bf16.msra.mxu3 %v4854_v48  ;;  %v4662_v24 = vor.u32 %v6531_v22, %v4659_v23  ;;  %v4787_v26 = vld [vmem:[%s7392_s1 + $0x310] sm:$0xf0]  ;;  %v451_v29 = vperm.slane %v449_v28, 0  ;;  %v452_v30 = vperm.slane %v449_v28, 1  ;;  %v453_v41 = vperm.slane %v449_v28, 2 }
  0x6f   : > { %1398 = vmatpush.bf16.msra.mxu0 %v4454_v47  ;;  %v4790_v27 = vor.u32 %v6563_v25, %v4787_v26  ;;  %v454_v44 = vperm.slane %v449_v28, 3  ;;  %v4505_v46 = vld [vmem:[%s7392_s1 + $0xc8] sm:$0xf]  ;;  %v6494_v47 = vld [vmem:[%s7392_s1 + $0xd4] sm:$0xf0] }
  0x70   : > { %1411 = vmatpush.bf16.msra.mxu1 %v4582_v49  ;;  %v4633_v49 = vld [vmem:[%s7392_s1 + $0x1c8] sm:$0xf]  ;;  %v6590_v14 = vld [vmem:[%s7392_s1 + $0x3d4] sm:$0xf0] }
  0x71   : > { %1424 = vmatpush.bf16.msra.mxu2 %v4710_v59  ;;  %v4889_v11 = vld [vmem:[%s7392_s1 + $0x3c8] sm:$0xf]  ;;  %v6486_v16 = vld [vmem:[%s7392_s1 + $0x94] sm:$0xf0] }
  0x72   : > { %1437 = vmatpush.bf16.msra.mxu3 %v4838_v61  ;;  %v4634_v61 = vor.u32 %v6526_v50, %v4633_v49  ;;  %v4601_v17 = vld [vmem:[%s7392_s1 + $0x188] sm:$0xf]  ;;  %v4890_v22 = vor.u32 %v6590_v14, %v4889_v11  ;;  %v6554_v25 = vld [vmem:[%s7392_s1 + $0x2b4] sm:$0xf0]  ;;  %v6528_v11 = vld [vmem:[%s7392_s1 + $0x1ec] sm:$0xf] }
  0x73   : > { %1399 = vmatpush.bf16.msra.mxu0 %v4438_v54  ;;  %v6586_v28 = vld [vmem:[%s7392_s1 + $0x3b4] sm:$0xf0]  ;;  %v4729_v35 = vld [vmem:[%s7392_s1 + $0x288] sm:$0xf] }
  0x74   : > { %1412 = vmatpush.bf16.msra.mxu1 %v4566_v55  ;;  %v4506_v55 = vor.u32 %v6494_v47, %v4505_v46  ;;  %v4713_v49 = vld [vmem:[%s7392_s1 + $0x268] sm:$0xf]  ;;  %v6546_v50 = vld [vmem:[%s7392_s1 + $0x274] sm:$0xf0] }
  0x75   : > { %1425 = vmatpush.bf16.msra.mxu2 %v4694_v7  ;;  %v4906_v7 = vor.u32 %v6594_v62, %v4905_v58  ;;  %v6474_v56 = vld [vmem:[%s7392_s1 + $0x34] sm:$0xf0]  ;;  %v4553_v57 = vld [vmem:[%s7392_s1 + $0x128] sm:$0xf] }
  0x76   : > { %1438 = vmatpush.bf16.msra.mxu3 %v4822_v9  ;;  %v4761_v9 = vld [vmem:[%s7392_s1 + $0x2c8] sm:$0xf]  ;;  %v6506_v58 = vld [vmem:[%s7392_s1 + $0x134] sm:$0xf0] }
  0x77   : > { %1400 = vmatpush.bf16.msra.mxu0 %v4422_v0  ;;  %v6490_v0 = vld [vmem:[%s7392_s1 + $0xb4] sm:$0xf0]  ;;  %v4762_v20 = vor.u32 %v6558_v10, %v4761_v9  ;;  %v4523_v10 = vld [vmem:[%s7392_s1 + $0xf8] sm:$0xf0] }
  0x78   : > { %1413 = vmatpush.bf16.msra.mxu1 %v4550_v3  ;;  %v6522_v3 = vld [vmem:[%s7392_s1 + $0x1b4] sm:$0xf0]  ;;  %v4490_v8 = vor.u32 %v6490_v0, %v4489_v63  ;;  %v4825_v63 = vld [vmem:[%s7392_s1 + $0x348] sm:$0xf] }
  0x79   : > { %1426 = vmatpush.bf16.msra.mxu2 %v4678_v18  ;;  %v6518_v18 = vld [vmem:[%s7392_s1 + $0x194] sm:$0xf0] }
  0x7a   : > { %1439 = vmatpush.bf16.msra.mxu3 %v4806_v21  ;;  %v4602_v26 = vor.u32 %v6518_v18, %v4601_v17  ;;  %v6542_v62 = vld [vmem:[%s7392_s1 + $0x254] sm:$0xf0] }
  0x7b   : > { %1401 = vmatpush.bf16.msra.mxu0 %v4406_v13  ;;  %v4618_v13 = vor.u32 %v6522_v3, %v4617_v2  ;;  %v6574_v2 = vld [vmem:[%s7392_s1 + $0x354] sm:$0xf0]  ;;  %v4409_v3 = vld [vmem:[%s7392_s1 + $0x8] sm:$0xf] }
  0x7c   : > { %1414 = vmatpush.bf16.msra.mxu1 %v4534_v15  ;;  %v4473_v15 = vld [vmem:[%s7392_s1 + $0x88] sm:$0xf]  ;;  %v4826_v14 = vor.u32 %v6574_v2, %v4825_v63  ;;  %v4875_v2 = vld [vmem:[%s7392_s1 + $0x3b8] sm:$0xf0] }
  0x7d   : > { %1427 = vmatpush.bf16.msra.mxu2 %v4662_v24  ;;  %v4474_v23 = vor.u32 %v6486_v16, %v4473_v15  ;;  %v4745_v24 = vld [vmem:[%s7392_s1 + $0x2a8] sm:$0xf]  ;;  %v6538_v16 = vld [vmem:[%s7392_s1 + $0x234] sm:$0xf0] }
  0x7e   : > { %1440 = vmatpush.bf16.msra.mxu3 %v4790_v27  ;;  %v4873_v27 = vld [vmem:[%s7392_s1 + $0x3a8] sm:$0xf] }
  0x7f   : > { %v4874_v34 = vor.u32 %v6586_v28, %v4873_v27  ;;  %v4681_v15 = vld [vmem:[%s7392_s1 + $0x228] sm:$0xf]  ;;  %v4635_v27 = vld [vmem:[%s7392_s1 + $0x1d8] sm:$0xf0] }
  0xbb   : > { %v512_v31 = vpop.f32.mrf.mxu0 }
  0xbc   : > { %v513_v32 = vadd.f32 %v512_v31, %v451_v29  ;;  %v525_v33 = vpop.f32.mrf.mxu1  ;;  %v4457_v29 = vld [vmem:[%s7392_s1 + $0x68] sm:$0xf] }
  0xbd   : > { %v526_v36 = vadd.f32 %v525_v33, %v452_v30  ;;  %v6482_v30 = vld [vmem:[%s7392_s1 + $0x74] sm:$0xf0]  ;;  %v4585_v31 = vld [vmem:[%s7392_s1 + $0x168] sm:$0xf]  ;;  %v4746_v33 = vor.u32 %v6554_v25, %v4745_v24  ;;  %v4682_v24 = vor.u32 %v6538_v16, %v4681_v15  ;;  %v4507_v25 = vld [vmem:[%s7392_s1 + $0xd8] sm:$0xf0] }
  0xbe   : > { %v555_v39 = vmax.f32 %v513_v32, 0.0  ;;  %v6514_v32 = vld [vmem:[%s7392_s1 + $0x174] sm:$0xf0]  ;;  %v4458_v37 = vor.u32 %v6482_v30, %v4457_v29  ;;  %v4665_v29 = vld [vmem:[%s7392_s1 + $0x208] sm:$0xf] }
  0xbf   : > { %v556_v40 = vmax.f32 %v526_v36, 0.0  ;;  %v6550_v36 = vld [vmem:[%s7392_s1 + $0x294] sm:$0xf0]  ;;  %v4586_v38 = vor.u32 %v6514_v32, %v4585_v31  ;;  %v4793_v31 = vld [vmem:[%s7392_s1 + $0x308] sm:$0xf] }
  0xc0   : > { %v7548_v43 = vpack.c.bf16 %v555_v39, %v555_v39  ;;  %v4857_v39 = vld [vmem:[%s7392_s1 + $0x388] sm:$0xf]  ;;  %v4730_v46 = vor.u32 %v6550_v36, %v4729_v35  ;;  %v6534_v30 = vld [vmem:[%s7392_s1 + $0x214] sm:$0xf0]  ;;  %v6580_v15 = vld [vmem:[%s7392_s1 + $0x38c] sm:$0xf] }
  0xc1   : > { %v7552_v48 = vpack.c.bf16 %v556_v40, %v556_v40  ;;  %v6582_v40 = vld [vmem:[%s7392_s1 + $0x394] sm:$0xf0]  ;;  %v4859_v16 = vld [vmem:[%s7392_s1 + $0x398] sm:$0xf0] }
  0xc2   : > { %1350 = vmatmul.bf16.vlgmr.msrb.gmra.mxu0 %v7548_v43  ;;  %v4858_v47 = vor.u32 %v6582_v40, %v4857_v39  ;;  %v6566_v32 = vld [vmem:[%s7392_s1 + $0x314] sm:$0xf0]  ;;  %v6488_v39 = vld [vmem:[%s7392_s1 + $0xac] sm:$0xf]  ;;  %v4666_v40 = vor.u32 %v6534_v30, %v4665_v29  ;;  %v4427_v30 = vld [vmem:[%s7392_s1 + $0x38] sm:$0xf0] }
  0xc3   : > { %v538_v51 = vpop.f32.mrf.mxu2  ;;  %1363 = vmatmul.bf16.vlgmr.msrb.gmra.mxu1 %v7552_v48  ;;  %1446 = vmatpush.bf16.msrb.mxu0 %v4522_v42  ;;  %v514_v54 = vpop.f32.mrf.mxu0  ;;  %v6478_v42 = vld [vmem:[%s7392_s1 + $0x54] sm:$0xf0]  ;;  %v6472_v29 = vld [vmem:[%s7392_s1 + $0x2c] sm:$0xf] }
  0xc4   : > { %v539_v52 = vadd.f32 %v538_v51, %v453_v41  ;;  %v551_v53 = vpop.f32.mrf.mxu3  ;;  %1459 = vmatpush.bf16.msrb.mxu1 %v4650_v45  ;;  %v527_v60 = vpop.f32.mrf.mxu1  ;;  %v4441_v41 = vld [vmem:[%s7392_s1 + $0x48] sm:$0xf]  ;;  %v6510_v45 = vld [vmem:[%s7392_s1 + $0x154] sm:$0xf0] }
  0xc5   : > { %v552_v59 = vadd.f32 %v551_v53, %v454_v44  ;;  %v4569_v44 = vld [vmem:[%s7392_s1 + $0x148] sm:$0xf]  ;;  %v4442_v51 = vor.u32 %v6478_v42, %v4441_v41  ;;  %v6578_v54 = vld [vmem:[%s7392_s1 + $0x374] sm:$0xf0]  ;;  %v4491_v41 = vld [vmem:[%s7392_s1 + $0xb8] sm:$0xf0] }
  0xc6   : > { %v557_v1 = vmax.f32 %v539_v52, 0.0  ;;  %v4570_v52 = vor.u32 %v6510_v45, %v4569_v44  ;;  %v4841_v53 = vld [vmem:[%s7392_s1 + $0x368] sm:$0xf]  ;;  %v6520_v42 = vld [vmem:[%s7392_s1 + $0x1ac] sm:$0xf]  ;;  %v4794_v45 = vor.u32 %v6566_v32, %v4793_v31 }
  0xc7   : > { %v558_v4 = vmax.f32 %v552_v59, 0.0  ;;  %1447 = vmatpush.bf16.msrb.mxu0 %v4506_v55  ;;  %v4425_v55 = vld [vmem:[%s7392_s1 + $0x28] sm:$0xf]  ;;  %v4714_v59 = vor.u32 %v6546_v50, %v4713_v49  ;;  %v4842_v60 = vor.u32 %v6578_v54, %v4841_v53  ;;  %v4619_v44 = vld [vmem:[%s7392_s1 + $0x1b8] sm:$0xf0] }
  0xc8   : > { %v7566_v6 = vpack.c.bf16 %v557_v1, %v557_v1  ;;  %1460 = vmatpush.bf16.msrb.mxu1 %v4634_v61  ;;  %v4697_v61 = vld [vmem:[%s7392_s1 + $0x248] sm:$0xf]  ;;  %v4426_v0 = vor.u32 %v6474_v56, %v4425_v55  ;;  %v4554_v1 = vor.u32 %v6506_v58, %v4553_v57  ;;  %v6556_v49 = vld [vmem:[%s7392_s1 + $0x2cc] sm:$0xf]  ;;  %v4763_v50 = vld [vmem:[%s7392_s1 + $0x2d8] sm:$0xf0] }
  0xc9   : > { %v7571_v12 = vpack.c.bf16 %v558_v4, %v558_v4  ;;  %v6470_v4 = vld [vmem:[%s7392_s1 + $0x14] sm:$0xf0]  ;;  %v4698_v9 = vor.u32 %v6542_v62, %v4697_v61  ;;  %v6588_v53 = vld [vmem:[%s7392_s1 + $0x3cc] sm:$0xf]  ;;  %v4891_v54 = vld [vmem:[%s7392_s1 + $0x3d8] sm:$0xf0] }
  0xca   : > { %1376 = vmatmul.bf16.vlgmr.msrb.gmra.mxu2 %v7566_v6  ;;  %v4410_v17 = vor.u32 %v6470_v4, %v4409_v3  ;;  %v6484_v55 = vld [vmem:[%s7392_s1 + $0x8c] sm:$0xf]  ;;  %v4475_v56 = vld [vmem:[%s7392_s1 + $0x98] sm:$0xf0] }
  0xcb   : > { %1389 = vmatmul.bf16.vlgmr.msrb.gmra.mxu3 %v7571_v12  ;;  %1472 = vmatpush.bf16.msrb.mxu2 %v4778_v5  ;;  %v540_v19 = vpop.f32.mrf.mxu2  ;;  %v4537_v5 = vld [vmem:[%s7392_s1 + $0x108] sm:$0xf]  ;;  %v6516_v57 = vld [vmem:[%s7392_s1 + $0x18c] sm:$0xf]  ;;  %v4603_v58 = vld [vmem:[%s7392_s1 + $0x198] sm:$0xf0]  ;;  %v4478_v63 = vor.u32 %v6484_v55, %v4475_v56 }
  0xcc   : > { %1485 = vmatpush.bf16.msrb.mxu3 %v4906_v7  ;;  %v553_v21 = vpop.f32.mrf.mxu3  ;;  %1448 = vmatpush.bf16.msrb.mxu0 %v4490_v8  ;;  %v6502_v7 = vld [vmem:[%s7392_s1 + $0x114] sm:$0xf0]  ;;  %v6496_v8 = vld [vmem:[%s7392_s1 + $0xec] sm:$0xf]  ;;  %v4809_v19 = vld [vmem:[%s7392_s1 + $0x328] sm:$0xf] }
  0xcd   : > { %1461 = vmatpush.bf16.msrb.mxu1 %v4618_v13  ;;  %v4651_v13 = vld [vmem:[%s7392_s1 + $0x1f8] sm:$0xf0]  ;;  %v4538_v18 = vor.u32 %v6502_v7, %v4537_v5  ;;  %v4526_v21 = vor.u32 %v6496_v8, %v4523_v10  ;;  %v6552_v61 = vld [vmem:[%s7392_s1 + $0x2ac] sm:$0xf] }
  0xce   : > { %v4747_v62 = vld [vmem:[%s7392_s1 + $0x2b8] sm:$0xf0]  ;;  %v6480_v3 = vld [vmem:[%s7392_s1 + $0x6c] sm:$0xf] }
  0xcf   : > { %1473 = vmatpush.bf16.msrb.mxu2 %v4762_v20  ;;  %v6570_v20 = vld [vmem:[%s7392_s1 + $0x334] sm:$0xf0]  ;;  %v4459_v4 = vld [vmem:[%s7392_s1 + $0x78] sm:$0xf0]  ;;  %v6512_v5 = vld [vmem:[%s7392_s1 + $0x16c] sm:$0xf]  ;;  %v4750_v8 = vor.u32 %v6552_v61, %v4747_v62 }
  0xd0   : > { %1486 = vmatpush.bf16.msrb.mxu3 %v4890_v22  ;;  %1449 = vmatpush.bf16.msrb.mxu0 %v4474_v23  ;;  %v4654_v22 = vor.u32 %v6528_v11, %v4651_v13  ;;  %v6492_v23 = vld [vmem:[%s7392_s1 + $0xcc] sm:$0xf]  ;;  %v4810_v28 = vor.u32 %v6570_v20, %v4809_v19  ;;  %v4587_v7 = vld [vmem:[%s7392_s1 + $0x178] sm:$0xf0]  ;;  %v4462_v13 = vor.u32 %v6480_v3, %v4459_v4 }
  0xd1   : > { %1462 = vmatpush.bf16.msrb.mxu1 %v4602_v26  ;;  %v6524_v26 = vld [vmem:[%s7392_s1 + $0x1cc] sm:$0xf]  ;;  %v4510_v35 = vor.u32 %v6492_v23, %v4507_v25  ;;  %v4731_v11 = vld [vmem:[%s7392_s1 + $0x298] sm:$0xf0] }
  0xd2   : > { %1402 = vmatmul.bf16.vlgmr.msra.gmra.mxu0 %v7548_v43  ;;  %v4638_v36 = vor.u32 %v6524_v26, %v4635_v27  ;;  %v6548_v10 = vld [vmem:[%s7392_s1 + $0x28c] sm:$0xf]  ;;  %v4571_v20 = vld [vmem:[%s7392_s1 + $0x158] sm:$0xf0] }
  0xd3   : > { %1474 = vmatpush.bf16.msrb.mxu2 %v4746_v33  ;;  %1415 = vmatmul.bf16.vlgmr.msra.gmra.mxu1 %v7552_v48  ;;  %v6560_v33 = vld [vmem:[%s7392_s1 + $0x2ec] sm:$0xf]  ;;  %v4555_v32 = vld [vmem:[%s7392_s1 + $0x138] sm:$0xf0] }
  0xd4   : > { %1487 = vmatpush.bf16.msrb.mxu3 %v4874_v34  ;;  %1450 = vmatpush.bf16.msrb.mxu0 %v4458_v37  ;;  %v4779_v34 = vld [vmem:[%s7392_s1 + $0x2f8] sm:$0xf0]  ;;  %v6592_v37 = vld [vmem:[%s7392_s1 + $0x3ec] sm:$0xf] }
  0xd5   : > { %1463 = vmatpush.bf16.msrb.mxu1 %v4586_v38  ;;  %v4907_v38 = vld [vmem:[%s7392_s1 + $0x3f8] sm:$0xf0]  ;;  %v6508_v19 = vld [vmem:[%s7392_s1 + $0x14c] sm:$0xf] }
  0xd6   : > { %v6544_v23 = vld [vmem:[%s7392_s1 + $0x26c] sm:$0xf]  ;;  %v4574_v26 = vor.u32 %v6508_v19, %v4571_v20  ;;  %v4667_v4 = vld [vmem:[%s7392_s1 + $0x218] sm:$0xf0]  ;;  %v5394_v20 = vld [vmem:[%s7392_s1 + $0x6c0] sm:$0xf] }
  0xd7   : > { %1475 = vmatpush.bf16.msrb.mxu2 %v4730_v46  ;;  %v4782_v46 = vor.u32 %v6560_v33, %v4779_v34  ;;  %v6576_v27 = vld [vmem:[%s7392_s1 + $0x36c] sm:$0xf] }
  0xd8   : > { %1488 = vmatpush.bf16.msrb.mxu3 %v4858_v47  ;;  %1451 = vmatpush.bf16.msrb.mxu0 %v4442_v51  ;;  %v4910_v47 = vor.u32 %v6592_v37, %v4907_v38  ;;  %v4494_v51 = vor.u32 %v6488_v39, %v4491_v41  ;;  %v6504_v31 = vld [vmem:[%s7392_s1 + $0x12c] sm:$0xf]  ;;  %v4430_v38 = vor.u32 %v6472_v29, %v4427_v30  ;;  %v6609_v29 = vld [vmem:[%s7392_s1 + $0x46c] sm:$0xf0] }
  0xd9   : > { %1464 = vmatpush.bf16.msrb.mxu1 %v4570_v52  ;;  %v4622_v52 = vor.u32 %v6520_v42, %v4619_v44  ;;  %v6572_v37 = vld [vmem:[%s7392_s1 + $0x34c] sm:$0xf]  ;;  %v4558_v39 = vor.u32 %v6504_v31, %v4555_v32  ;;  %v4411_v42 = vld [vmem:[%s7392_s1 + $0x18] sm:$0xf0]  ;;  %v5218_v31 = vld [vmem:[%s7392_s1 + $0x560] sm:$0xf] }
  0xda   : > { %1428 = vmatmul.bf16.vlgmr.msra.gmra.mxu2 %v7566_v6  ;;  %v6468_v41 = vld [vmem:[%s7392_s1 + $0xc] sm:$0xf]  ;;  %v6641_v32 = vld [vmem:[%s7392_s1 + $0x56c] sm:$0xf0] }
  0xdb   : > { %1441 = vmatmul.bf16.vlgmr.msra.gmra.mxu3 %v7571_v12  ;;  %1476 = vmatpush.bf16.msrb.mxu2 %v4714_v59  ;;  %v4766_v59 = vor.u32 %v6556_v49, %v4763_v50  ;;  %v6500_v44 = vld [vmem:[%s7392_s1 + $0x10c] sm:$0xf]  ;;  %v6625_v49 = vld [vmem:[%s7392_s1 + $0x4ec] sm:$0xf0]  ;;  %v5282_v50 = vld [vmem:[%s7392_s1 + $0x5e0] sm:$0xf]  ;;  %v4414_v55 = vor.u32 %v6468_v41, %v4411_v42 }
  0xdc   : > { %1489 = vmatpush.bf16.msrb.mxu3 %v4842_v60  ;;  %1452 = vmatpush.bf16.msrb.mxu0 %v4426_v0  ;;  %v4894_v60 = vor.u32 %v6588_v53, %v4891_v54  ;;  %v4606_v0 = vor.u32 %v6516_v57, %v4603_v58  ;;  %v6536_v53 = vld [vmem:[%s7392_s1 + $0x22c] sm:$0xf]  ;;  %v4683_v54 = vld [vmem:[%s7392_s1 + $0x238] sm:$0xf0]  ;;  %v5042_v42 = vld [vmem:[%s7392_s1 + $0x400] sm:$0xf] }
  0xdd   : > { %1465 = vmatpush.bf16.msrb.mxu1 %v4554_v1  ;;  %v6584_v1 = vld [vmem:[%s7392_s1 + $0x3ac] sm:$0xf]  ;;  %v4811_v58 = vld [vmem:[%s7392_s1 + $0x338] sm:$0xf0]  ;;  %v4686_v62 = vor.u32 %v6536_v53, %v4683_v54  ;;  %v6615_v53 = vld [vmem:[%s7392_s1 + $0x4a4] sm:$0xf] }
  0xde   : > { %v6568_v57 = vld [vmem:[%s7392_s1 + $0x32c] sm:$0xf]  ;;  %v5124_v54 = vld [vmem:[%s7392_s1 + $0x4b0] sm:$0xf0] }
  0xdf   : > { %1477 = vmatpush.bf16.msrb.mxu2 %v4698_v9  ;;  %v4878_v9 = vor.u32 %v6584_v1, %v4875_v2  ;;  %v6653_v1 = vld [vmem:[%s7392_s1 + $0x5cc] sm:$0xf0]  ;;  %v4814_v2 = vor.u32 %v6568_v57, %v4811_v58  ;;  %v6532_v3 = vld [vmem:[%s7392_s1 + $0x20c] sm:$0xf]  ;;  %v5378_v58 = vld [vmem:[%s7392_s1 + $0x6a0] sm:$0xf] }
  0xe0   : > { %1490 = vmatpush.bf16.msrb.mxu3 %v4826_v14  ;;  %1453 = vmatpush.bf16.msrb.mxu0 %v4410_v17  ;;  %v4590_v14 = vor.u32 %v6512_v5, %v4587_v7  ;;  %v6476_v17 = vld [vmem:[%s7392_s1 + $0x4c] sm:$0xf]  ;;  %v4795_v7 = vld [vmem:[%s7392_s1 + $0x318] sm:$0xf0]  ;;  %v6633_v57 = vld [vmem:[%s7392_s1 + $0x52c] sm:$0xf0] }
  0xe1   : > { %1466 = vmatpush.bf16.msrb.mxu1 %v4538_v18  ;;  %v4443_v18 = vld [vmem:[%s7392_s1 + $0x58] sm:$0xf0]  ;;  %v6564_v5 = vld [vmem:[%s7392_s1 + $0x30c] sm:$0xf] }
  0xe2   : > { %v4446_v25 = vor.u32 %v6476_v17, %v4443_v18  ;;  %v5250_v17 = vld [vmem:[%s7392_s1 + $0x5a0] sm:$0xf]  ;;  %v6649_v18 = vld [vmem:[%s7392_s1 + $0x5ac] sm:$0xf0] }
  0xe3   : > { %1478 = vmatpush.bf16.msrb.mxu2 %v4682_v24  ;;  %1454 = vmatmul.bf16.vlgmr.msrb.gmra.mxu0 %v7548_v43  ;;  %v4715_v24 = vld [vmem:[%s7392_s1 + $0x278] sm:$0xf0] }
  0xe4   : > { %1498 = vmatpush.bf16.msra.mxu0 %v4526_v21  ;;  %1491 = vmatpush.bf16.msrb.mxu3 %v4810_v28  ;;  %v4734_v21 = vor.u32 %v6548_v10, %v4731_v11  ;;  %v4843_v28 = vld [vmem:[%s7392_s1 + $0x378] sm:$0xf0]  ;;  %v4718_v33 = vor.u32 %v6544_v23, %v4715_v24  ;;  %v5106_v23 = vld [vmem:[%s7392_s1 + $0x480] sm:$0xf]  ;;  %v6613_v24 = vld [vmem:[%s7392_s1 + $0x48c] sm:$0xf0] }
  0xe5   : > { %1511 = vmatpush.bf16.msra.mxu1 %v4654_v22  ;;  %v4862_v22 = vor.u32 %v6580_v15, %v4859_v16  ;;  %v4846_v34 = vor.u32 %v6576_v27, %v4843_v28  ;;  %v6617_v15 = vld [vmem:[%s7392_s1 + $0x4ac] sm:$0xf0]  ;;  %v4798_v16 = vor.u32 %v6564_v5, %v4795_v7  ;;  %v5107_v27 = vor.u32 %v6613_v24, %v5106_v23  ;;  %v5090_v28 = vld [vmem:[%s7392_s1 + $0x460] sm:$0xf] }
  0xe6   : > { %1467 = vmatmul.bf16.vlgmr.msrb.gmra.mxu1 %v7552_v48  ;;  %v6677_v5 = vld [vmem:[%s7392_s1 + $0x68c] sm:$0xf0]  ;;  %v5330_v24 = vld [vmem:[%s7392_s1 + $0x640] sm:$0xf] }
  0xe7   : > { %1479 = vmatpush.bf16.msrb.mxu2 %v4666_v40  ;;  %v4827_v40 = vld [vmem:[%s7392_s1 + $0x358] sm:$0xf0] }
  0xe8   : > { %1499 = vmatpush.bf16.msra.mxu0 %v4510_v35  ;;  %1492 = vmatpush.bf16.msrb.mxu3 %v4794_v45  ;;  %v6540_v35 = vld [vmem:[%s7392_s1 + $0x24c] sm:$0xf]  ;;  %v4539_v45 = vld [vmem:[%s7392_s1 + $0x118] sm:$0xf0] }
  0xe9   : > { %1512 = vmatpush.bf16.msra.mxu1 %v4638_v36  ;;  %v4699_v36 = vld [vmem:[%s7392_s1 + $0x258] sm:$0xf0]  ;;  %v4542_v56 = vor.u32 %v6500_v44, %v4539_v45  ;;  %v6597_v44 = vld [vmem:[%s7392_s1 + $0x40c] sm:$0xf0]  ;;  %v6623_v45 = vld [vmem:[%s7392_s1 + $0x4e4] sm:$0xf] }
  0xea   : > { %1480 = vmatmul.bf16.vlgmr.msrb.gmra.mxu2 %v7566_v6 }
  0xeb   : > { %1524 = vmatpush.bf16.msra.mxu2 %v4782_v46  ;;  %1493 = vmatmul.bf16.vlgmr.msrb.gmra.mxu3 %v7571_v12  ;;  %v5154_v46 = vld [vmem:[%s7392_s1 + $0x4e0] sm:$0xf] }
  0xec   : > { %1537 = vmatpush.bf16.msra.mxu3 %v4910_v47  ;;  %1500 = vmatpush.bf16.msra.mxu0 %v4494_v51  ;;  %v4702_v47 = vor.u32 %v6540_v35, %v4699_v36  ;;  %v6657_v51 = vld [vmem:[%s7392_s1 + $0x5ec] sm:$0xf0]  ;;  %v5219_v35 = vor.u32 %v6641_v32, %v5218_v31  ;;  %v5314_v31 = vld [vmem:[%s7392_s1 + $0x620] sm:$0xf] }
  0xed   : > { %1513 = vmatpush.bf16.msra.mxu1 %v4622_v52  ;;  %v4830_v52 = vor.u32 %v6572_v37, %v4827_v40  ;;  %v5283_v61 = vor.u32 %v6657_v51, %v5282_v50  ;;  %v6637_v36 = vld [vmem:[%s7392_s1 + $0x54c] sm:$0xf0]  ;;  %v6619_v50 = vld [vmem:[%s7392_s1 + $0x4c4] sm:$0xf]  ;;  %v5140_v51 = vld [vmem:[%s7392_s1 + $0x4d0] sm:$0xf0] }
  0xee   : > { %v6665_v32 = vld [vmem:[%s7392_s1 + $0x62c] sm:$0xf0] }
  0xef   : > { %1525 = vmatpush.bf16.msra.mxu2 %v4766_v59  ;;  %v5155_v59 = vor.u32 %v6625_v49, %v5154_v46  ;;  %v5156_v46 = vld [vmem:[%s7392_s1 + $0x4f0] sm:$0xf0] }
  0xf0   : > { %1538 = vmatpush.bf16.msra.mxu3 %v4894_v60  ;;  %1501 = vmatpush.bf16.msra.mxu0 %v4478_v63  ;;  %v5138_v60 = vld [vmem:[%s7392_s1 + $0x4c0] sm:$0xf]  ;;  %v6621_v63 = vld [vmem:[%s7392_s1 + $0x4cc] sm:$0xf0]  ;;  %v5159_v49 = vor.u32 %v6623_v45, %v5156_v46  ;;  %v5220_v45 = vld [vmem:[%s7392_s1 + $0x570] sm:$0xf0] }
  0xf1   : > { %1514 = vmatpush.bf16.msra.mxu1 %v4606_v0  ;;  %v5266_v0 = vld [vmem:[%s7392_s1 + $0x5c0] sm:$0xf]  ;;  %v5139_v10 = vor.u32 %v6621_v63, %v5138_v60  ;;  %v6681_v60 = vld [vmem:[%s7392_s1 + $0x6ac] sm:$0xf0] }
  0xf2   : > { %v5267_v11 = vor.u32 %v6653_v1, %v5266_v0  ;;  %v5379_v63 = vor.u32 %v6681_v60, %v5378_v58  ;;  %v5170_v1 = vld [vmem:[%s7392_s1 + $0x500] sm:$0xf] }
  0xf3   : > { %1526 = vmatpush.bf16.msra.mxu2 %v4750_v8  ;;  %v5410_v8 = vld [vmem:[%s7392_s1 + $0x6e0] sm:$0xf] }
  0xf4   : > { %1539 = vmatpush.bf16.msra.mxu3 %v4878_v9  ;;  %1502 = vmatpush.bf16.msra.mxu0 %v4462_v13  ;;  %v6689_v9 = vld [vmem:[%s7392_s1 + $0x6ec] sm:$0xf0]  ;;  %v4670_v13 = vor.u32 %v6532_v3, %v4667_v4  ;;  %v5362_v3 = vld [vmem:[%s7392_s1 + $0x680] sm:$0xf] }
  0xf5   : > { %1515 = vmatpush.bf16.msra.mxu1 %v4590_v14  ;;  %v5122_v14 = vld [vmem:[%s7392_s1 + $0x4a0] sm:$0xf]  ;;  %v5411_v19 = vor.u32 %v6689_v9, %v5410_v8  ;;  %v5363_v7 = vor.u32 %v6677_v5, %v5362_v3  ;;  %v6607_v8 = vld [vmem:[%s7392_s1 + $0x464] sm:$0xf]  ;;  %v5092_v9 = vld [vmem:[%s7392_s1 + $0x470] sm:$0xf0] }
  0xf6   : > { %v7781_v60 = vld [vmem:[%s7390_s12 + $0x1] ss:$8 sm:$0xf]  ;;  %v5188_v3 = vld [vmem:[%s7392_s1 + $0x530] sm:$0xf0] }
  0xf7   : > { %1527 = vmatpush.bf16.msra.mxu2 %v4734_v21  ;;  %v6685_v21 = vld [vmem:[%s7392_s1 + $0x6cc] sm:$0xf0] }
  0xf8   : > { %1540 = vmatpush.bf16.msra.mxu3 %v4862_v22  ;;  %1503 = vmatpush.bf16.msra.mxu0 %v4446_v25  ;;  %v5123_v22 = vor.u32 %v6617_v15, %v5122_v14  ;;  %v5234_v25 = vld [vmem:[%s7392_s1 + $0x580] sm:$0xf]  ;;  %v6673_v15 = vld [vmem:[%s7392_s1 + $0x66c] sm:$0xf0] }
  0xf9   : > { %1516 = vmatpush.bf16.msra.mxu1 %v4574_v26  ;;  %v6645_v26 = vld [vmem:[%s7392_s1 + $0x58c] sm:$0xf0]  ;;  %v5346_v14 = vld [vmem:[%s7392_s1 + $0x660] sm:$0xf] }
  0xfa   : > { %v5235_v30 = vor.u32 %v6645_v26, %v5234_v25  ;;  %v6599_v26 = vld [vmem:[%s7392_s1 + $0x424] sm:$0xf] }
  0xfb   : > { %1528 = vmatpush.bf16.msra.mxu2 %v4718_v33  ;;  %v5091_v33 = vor.u32 %v6609_v29, %v5090_v28  ;;  %v5252_v29 = vld [vmem:[%s7392_s1 + $0x5b0] sm:$0xf0] }
  0xfc   : > { %1541 = vmatpush.bf16.msra.mxu3 %v4846_v34  ;;  %1504 = vmatpush.bf16.msra.mxu0 %v4430_v38  ;;  %v6605_v34 = vld [vmem:[%s7392_s1 + $0x44c] sm:$0xf0]  ;;  %v5058_v38 = vld [vmem:[%s7392_s1 + $0x420] sm:$0xf] }
  0xfd   : > { %1517 = vmatpush.bf16.msra.mxu1 %v4558_v39  ;;  %v6601_v39 = vld [vmem:[%s7392_s1 + $0x42c] sm:$0xf0] }
  0xfe   : > { %v5059_v41 = vor.u32 %v6601_v39, %v5058_v38  ;;  %v5298_v38 = vld [vmem:[%s7392_s1 + $0x600] sm:$0xf]  ;;  %v6661_v39 = vld [vmem:[%s7392_s1 + $0x60c] sm:$0xf0] }
  0xff   : > { %1529 = vmatpush.bf16.msra.mxu2 %v4702_v47  ;;  %v5043_v47 = vor.u32 %v6597_v44, %v5042_v42  ;;  %v6721_v42 = vld [vmem:[%s7392_s1 + $0x7ec] sm:$0xf0]  ;;  %v6639_v44 = vld [vmem:[%s7392_s1 + $0x564] sm:$0xf] }
 0x100   : > { %1542 = vmatpush.bf16.msra.mxu3 %v4830_v52  ;;  %1505 = vmatpush.bf16.msra.mxu0 %v4414_v55  ;;  %v5143_v52 = vor.u32 %v6619_v50, %v5140_v51  ;;  %v5127_v55 = vor.u32 %v6615_v53, %v5124_v54  ;;  %v5412_v50 = vld [vmem:[%s7392_s1 + $0x6f0] sm:$0xf0]  ;;  %v6717_v53 = vld [vmem:[%s7392_s1 + $0x7cc] sm:$0xf0] }
 0x101   : > { %1518 = vmatpush.bf16.msra.mxu1 %v4542_v56  ;;  %v5186_v56 = vld [vmem:[%s7392_s1 + $0x520] sm:$0xf] }
 0x103   : > { %1530 = vmatpush.bf16.msra.mxu2 %v4686_v62  ;;  %1506 = vmatmul.bf16.vlgmr.msra.gmra.mxu0 %v7548_v43  ;;  %v5251_v43 = vor.u32 %v6649_v18, %v5250_v17  ;;  %v5108_v62 = vld [vmem:[%s7392_s1 + $0x490] sm:$0xf0]  ;;  %v5347_v17 = vor.u32 %v6673_v15, %v5346_v14  ;;  %v6603_v18 = vld [vmem:[%s7392_s1 + $0x444] sm:$0xf] }
 0x104   : > { %2338 = vmatpush.bf16.msrb.mxu0 %v5155_v59  ;;  %1543 = vmatpush.bf16.msra.mxu3 %v4814_v2  ;;  %v5187_v59 = vor.u32 %v6633_v57, %v5186_v56  ;;  %v6629_v2 = vld [vmem:[%s7392_s1 + $0x50c] sm:$0xf0]  ;;  %v5204_v56 = vld [vmem:[%s7392_s1 + $0x550] sm:$0xf0]  ;;  %v6683_v57 = vld [vmem:[%s7392_s1 + $0x6c4] sm:$0xf] }
 0x105   : > { %2351 = vmatpush.bf16.msrb.mxu1 %v5283_v61  ;;  %v6611_v61 = vld [vmem:[%s7392_s1 + $0x484] sm:$0xf]  ;;  %v5171_v4 = vor.u32 %v6629_v2, %v5170_v1 }
 0x106   : > { %1519 = vmatmul.bf16.vlgmr.msra.gmra.mxu1 %v7552_v48  ;;  %v5395_v48 = vor.u32 %v6685_v21, %v5394_v20  ;;  %v5111_v0 = vor.u32 %v6611_v61, %v5108_v62  ;;  %v6651_v20 = vld [vmem:[%s7392_s1 + $0x5c4] sm:$0xf]  ;;  %v5506_v62 = vld [vmem:[%s7392_s1 + $0x7a0] sm:$0xf] }
 0x107   : > { %1531 = vmatpush.bf16.msra.mxu2 %v4670_v13  ;;  %v5284_v13 = vld [vmem:[%s7392_s1 + $0x5f0] sm:$0xf0]  ;;  %v6631_v2 = vld [vmem:[%s7392_s1 + $0x524] sm:$0xf] }
 0x108   : > { %2339 = vmatpush.bf16.msrb.mxu0 %v5139_v10  ;;  %1544 = vmatpush.bf16.msra.mxu3 %v4798_v16  ;;  %v6655_v10 = vld [vmem:[%s7392_s1 + $0x5e4] sm:$0xf] }
 0x109   : > { %2352 = vmatpush.bf16.msrb.mxu1 %v5267_v11  ;;  %v5095_v11 = vor.u32 %v6607_v8, %v5092_v9  ;;  %v5287_v16 = vor.u32 %v6655_v10, %v5284_v13  ;;  %v5380_v8 = vld [vmem:[%s7392_s1 + $0x6b0] sm:$0xf0]  ;;  %v694_v9 = vperm.slane %v7781_v60, 0  ;;  %v6709_v13 = vld [vmem:[%s7392_s1 + $0x78c] sm:$0xf0] }
 0x10a   : > { %1532 = vmatmul.bf16.vlgmr.msra.gmra.mxu2 %v7566_v6  ;;  %v5074_v6 = vld [vmem:[%s7392_s1 + $0x440] sm:$0xf]  ;;  %v6627_v15 = vld [vmem:[%s7392_s1 + $0x504] sm:$0xf] }
 0x10b   : > { %2364 = vmatpush.bf16.msrb.mxu2 %v5411_v19  ;;  %1545 = vmatmul.bf16.vlgmr.msra.gmra.mxu3 %v7571_v12  ;;  %v5202_v12 = vld [vmem:[%s7392_s1 + $0x540] sm:$0xf]  ;;  %v5075_v37 = vor.u32 %v6605_v34, %v5074_v6  ;;  %v5076_v19 = vld [vmem:[%s7392_s1 + $0x450] sm:$0xf0]  ;;  %v6595_v6 = vld [vmem:[%s7392_s1 + $0x404] sm:$0xf] }
 0x10c   : > { %2340 = vmatpush.bf16.msrb.mxu0 %v5123_v22  ;;  %v5203_v40 = vor.u32 %v6637_v36, %v5202_v12  ;;  %v5079_v21 = vor.u32 %v6603_v18, %v5076_v19  ;;  %v5268_v22 = vld [vmem:[%s7392_s1 + $0x5d0] sm:$0xf0] }
 0x10d   : > { %2353 = vmatpush.bf16.msrb.mxu1 %v5251_v43  ;;  %v5271_v23 = vor.u32 %v6651_v20, %v5268_v22  ;;  %v6669_v43 = vld [vmem:[%s7392_s1 + $0x64c] sm:$0xf0]  ;;  %v5044_v34 = vld [vmem:[%s7392_s1 + $0x410] sm:$0xf0]  ;;  %v5474_v22 = vld [vmem:[%s7392_s1 + $0x760] sm:$0xf] }
 0x10e   : > { %v5331_v25 = vor.u32 %v6669_v43, %v5330_v24  ;;  %v5047_v12 = vor.u32 %v6595_v6, %v5044_v34  ;;  %v5236_v36 = vld [vmem:[%s7392_s1 + $0x590] sm:$0xf0] }
 0x10f   : > { %2365 = vmatpush.bf16.msrb.mxu2 %v5395_v48  ;;  %v5060_v48 = vld [vmem:[%s7392_s1 + $0x430] sm:$0xf0] }
 0x110   : > { %2341 = vmatpush.bf16.msrb.mxu0 %v5107_v27  ;;  %v6647_v27 = vld [vmem:[%s7392_s1 + $0x5a4] sm:$0xf]  ;;  %v5063_v28 = vor.u32 %v6599_v26, %v5060_v48  ;;  %v5364_v19 = vld [vmem:[%s7392_s1 + $0x690] sm:$0xf0] }
 0x111   : > { %2354 = vmatpush.bf16.msrb.mxu1 %v5235_v30  ;;  %v5255_v30 = vor.u32 %v6647_v27, %v5252_v29  ;;  %v5348_v26 = vld [vmem:[%s7392_s1 + $0x670] sm:$0xf0]  ;;  %v5458_v29 = vld [vmem:[%s7392_s1 + $0x740] sm:$0xf] }
 0x113   : > { %2366 = vmatpush.bf16.msrb.mxu2 %v5379_v63  ;;  %v6713_v63 = vld [vmem:[%s7392_s1 + $0x7ac] sm:$0xf0] }
 0x114   : > { %2342 = vmatpush.bf16.msrb.mxu0 %v5091_v33  ;;  %v5315_v33 = vor.u32 %v6665_v32, %v5314_v31  ;;  %v5507_v1 = vor.u32 %v6713_v63, %v5506_v62  ;;  %v6667_v32 = vld [vmem:[%s7392_s1 + $0x644] sm:$0xf] }
 0x115   : > { %2355 = vmatpush.bf16.msrb.mxu1 %v5219_v35  ;;  %v6643_v35 = vld [vmem:[%s7392_s1 + $0x584] sm:$0xf] }
 0x117   : > { %2367 = vmatpush.bf16.msrb.mxu2 %v5363_v7  ;;  %v5191_v7 = vor.u32 %v6631_v2, %v5188_v3 }
 0x118   : > { %2343 = vmatpush.bf16.msrb.mxu0 %v5075_v37  ;;  %v5239_v37 = vor.u32 %v6643_v35, %v5236_v36  ;;  %v5162_v36 = vld [vmem:[%s7392_s1 + $0x4e8] sm:$0xf] }
 0x119   : > { %2356 = vmatpush.bf16.msrb.mxu1 %v5203_v40  ;;  %v5538_v40 = vld [vmem:[%s7392_s1 + $0x7e0] sm:$0xf] }
 0x11a   : > { %v5539_v46 = vor.u32 %v6721_v42, %v5538_v40 }
 0x11b   : > { %2368 = vmatpush.bf16.msrb.mxu2 %v5347_v17  ;;  %v6675_v17 = vld [vmem:[%s7392_s1 + $0x684] sm:$0xf] }
 0x11c   : > { %2344 = vmatpush.bf16.msrb.mxu0 %v5059_v41  ;;  %v5299_v41 = vor.u32 %v6661_v39, %v5298_v38  ;;  %2377 = vmatpush.bf16.msrb.mxu3 %v5539_v46  ;;  %v6697_v38 = vld [vmem:[%s7392_s1 + $0x72c] sm:$0xf0] }
 0x11d   : > { %2357 = vmatpush.bf16.msrb.mxu1 %v5187_v59  ;;  %v5396_v59 = vld [vmem:[%s7392_s1 + $0x6d0] sm:$0xf0] }
 0x11e   : > { %v5399_v61 = vor.u32 %v6683_v57, %v5396_v59  ;;  %v5300_v59 = vld [vmem:[%s7392_s1 + $0x610] sm:$0xf0] }
 0x11f   : > { %2369 = vmatpush.bf16.msrb.mxu2 %v5331_v25  ;;  %v6671_v25 = vld [vmem:[%s7392_s1 + $0x664] sm:$0xf] }
 0x120   : > { %2345 = vmatpush.bf16.msrb.mxu0 %v5043_v47  ;;  %v5223_v47 = vor.u32 %v6639_v44, %v5220_v45  ;;  %v5351_v27 = vor.u32 %v6671_v25, %v5348_v26  ;;  %v6663_v44 = vld [vmem:[%s7392_s1 + $0x624] sm:$0xf]  ;;  %v5316_v45 = vld [vmem:[%s7392_s1 + $0x630] sm:$0xf0]  ;;  %v6610_v25 = vld [vmem:[%s7392_s1 + $0x474] sm:$0xf0] }
 0x121   : > { %2358 = vmatpush.bf16.msrb.mxu1 %v5171_v4  ;;  %v6679_v4 = vld [vmem:[%s7392_s1 + $0x6a4] sm:$0xf]  ;;  %v5290_v26 = vld [vmem:[%s7392_s1 + $0x5e8] sm:$0xf] }
 0x122   : > { %v5383_v10 = vor.u32 %v6679_v4, %v5380_v8  ;;  %v5130_v4 = vld [vmem:[%s7392_s1 + $0x4a8] sm:$0xf]  ;;  %v6618_v8 = vld [vmem:[%s7392_s1 + $0x4b4] sm:$0xf0] }
 0x123   : > { %2370 = vmatpush.bf16.msrb.mxu2 %v5315_v33  ;;  %v5332_v33 = vld [vmem:[%s7392_s1 + $0x650] sm:$0xf0] }
 0x124   : > { %2390 = vmatpush.bf16.msra.mxu0 %v5159_v49  ;;  %v6687_v49 = vld [vmem:[%s7392_s1 + $0x6e4] sm:$0xf]  ;;  %v5335_v34 = vor.u32 %v6667_v32, %v5332_v33 }
 0x125   : > { %2403 = vmatpush.bf16.msra.mxu1 %v5287_v16  ;;  %v5415_v51 = vor.u32 %v6687_v49, %v5412_v50  ;;  %v5172_v16 = vld [vmem:[%s7392_s1 + $0x510] sm:$0xf0]  ;;  %v695_v50 = vperm.slane %v7781_v60, 1 }
 0x126   : > { %v5175_v18 = vor.u32 %v6627_v15, %v5172_v16  ;;  %v5114_v15 = vld [vmem:[%s7392_s1 + $0x488] sm:$0xf] }
 0x127   : > { %2371 = vmatpush.bf16.msrb.mxu2 %v5299_v41  ;;  %v6626_v41 = vld [vmem:[%s7392_s1 + $0x4f4] sm:$0xf0] }
 0x128   : > { %2391 = vmatpush.bf16.msra.mxu0 %v5143_v52  ;;  %v5522_v52 = vld [vmem:[%s7392_s1 + $0x7c0] sm:$0xf] }
 0x129   : > { %2404 = vmatpush.bf16.msra.mxu1 %v5271_v23  ;;  %v5523_v54 = vor.u32 %v6717_v53, %v5522_v52  ;;  %v6705_v23 = vld [vmem:[%s7392_s1 + $0x76c] sm:$0xf0]  ;;  %v5163_v52 = vor.u32 %v6626_v41, %v5162_v36  ;;  %v6622_v53 = vld [vmem:[%s7392_s1 + $0x4d4] sm:$0xf0]  ;;  %v5274_v36 = vld [vmem:[%s7392_s1 + $0x5c8] sm:$0xf] }
 0x12a   : > { %v5475_v43 = vor.u32 %v6705_v23, %v5474_v22  ;;  %v696_v41 = vperm.slane %v7781_v60, 2 }
 0x12b   : > { %2416 = vmatpush.bf16.msra.mxu2 %v5415_v51  ;;  %2378 = vmatpush.bf16.msrb.mxu3 %v5523_v54  ;;  %v5146_v51 = vld [vmem:[%s7392_s1 + $0x4c8] sm:$0xf]  ;;  %v5426_v54 = vld [vmem:[%s7392_s1 + $0x700] sm:$0xf] }
 0x12c   : > { %2392 = vmatpush.bf16.msra.mxu0 %v5127_v55  ;;  %v6635_v55 = vld [vmem:[%s7392_s1 + $0x544] sm:$0xf]  ;;  %v5147_v3 = vor.u32 %v6622_v53, %v5146_v51  ;;  %v5258_v51 = vld [vmem:[%s7392_s1 + $0x5a8] sm:$0xf] }
 0x12d   : > { %2405 = vmatpush.bf16.msra.mxu1 %v5255_v30  ;;  %v5207_v58 = vor.u32 %v6635_v55, %v5204_v56  ;;  %v6701_v30 = vld [vmem:[%s7392_s1 + $0x74c] sm:$0xf0]  ;;  %v6699_v53 = vld [vmem:[%s7392_s1 + $0x744] sm:$0xf] }
 0x12e   : > { %v5459_v31 = vor.u32 %v6701_v30, %v5458_v29  ;;  %v6693_v55 = vld [vmem:[%s7392_s1 + $0x70c] sm:$0xf0]  ;;  %v5492_v29 = vld [vmem:[%s7392_s1 + $0x790] sm:$0xf0] }
 0x12f   : > { %2417 = vmatpush.bf16.msra.mxu2 %v5399_v61  ;;  %2379 = vmatpush.bf16.msrb.mxu3 %v5507_v1  ;;  %v5427_v57 = vor.u32 %v6693_v55, %v5426_v54  ;;  %v6719_v61 = vld [vmem:[%s7392_s1 + $0x7e4] sm:$0xf]  ;;  %v5460_v54 = vld [vmem:[%s7392_s1 + $0x750] sm:$0xf0] }
 0x130   : > { %2393 = vmatpush.bf16.msra.mxu0 %v5111_v0 }
 0x131   : > { %2406 = vmatpush.bf16.msra.mxu1 %v5239_v37  ;;  %v5442_v37 = vld [vmem:[%s7392_s1 + $0x720] sm:$0xf] }
 0x132   : > { %v5443_v42 = vor.u32 %v6697_v38, %v5442_v37  ;;  %v6654_v38 = vld [vmem:[%s7392_s1 + $0x5d4] sm:$0xf0] }
 0x133   : > { %2418 = vmatpush.bf16.msra.mxu2 %v5383_v10  ;;  %v5524_v10 = vld [vmem:[%s7392_s1 + $0x7d0] sm:$0xf0] }
 0x134   : > { %2394 = vmatpush.bf16.msra.mxu0 %v5095_v11  ;;  %v5490_v11 = vld [vmem:[%s7392_s1 + $0x780] sm:$0xf] }
 0x135   : > { %2407 = vmatpush.bf16.msra.mxu1 %v5223_v47  ;;  %v5491_v14 = vor.u32 %v6709_v13, %v5490_v11  ;;  %v5319_v47 = vor.u32 %v6663_v44, %v5316_v45 }
 0x137   : > { %2380 = vmatpush.bf16.msrb.mxu3 %v5491_v14  ;;  %v5131_v14 = vor.u32 %v6618_v8, %v5130_v4  ;;  %v5444_v4 = vld [vmem:[%s7392_s1 + $0x730] sm:$0xf0]  ;;  %v5164_v8 = vld [vmem:[%s7392_s1 + $0x4f8] sm:$0xf0] }
 0x138   : > { %2395 = vmatpush.bf16.msra.mxu0 %v5079_v21  ;;  %v5367_v21 = vor.u32 %v6675_v17, %v5364_v19  ;;  %v6614_v17 = vld [vmem:[%s7392_s1 + $0x494] sm:$0xf0]  ;;  %v5508_v19 = vld [vmem:[%s7392_s1 + $0x7b0] sm:$0xf0] }
 0x139   : > { %2408 = vmatpush.bf16.msra.mxu1 %v5207_v58  ;;  %v6659_v58 = vld [vmem:[%s7392_s1 + $0x604] sm:$0xf] }
 0x13a   : > { %2419 = vmatpush.bf16.msra.mxu2 %v5367_v21  ;;  %v5303_v63 = vor.u32 %v6659_v58, %v5300_v59  ;;  %v5463_v58 = vor.u32 %v6699_v53, %v5460_v54  ;;  %v5370_v53 = vld [vmem:[%s7392_s1 + $0x688] sm:$0xf]  ;;  %v6678_v54 = vld [vmem:[%s7392_s1 + $0x694] sm:$0xf0] }
 0x13b   : > { %2381 = vmatpush.bf16.msrb.mxu3 %v5475_v43  ;;  %v5098_v43 = vld [vmem:[%s7392_s1 + $0x468] sm:$0xf] }
 0x13c   : > { %2396 = vmatpush.bf16.msra.mxu0 %v5063_v28 }
 0x13d   : > { %2409 = vmatpush.bf16.msra.mxu1 %v5191_v7 }
 0x13e   : > { %2420 = vmatpush.bf16.msra.mxu2 %v5351_v27  ;;  %v6658_v27 = vld [vmem:[%s7392_s1 + $0x5f4] sm:$0xf0] }
 0x13f   : > { %v1351_v0 = vpop.f32.mrf.mxu0  ;;  %2382 = vmatpush.bf16.msrb.mxu3 %v5459_v31 }
 0x140   : > { %2397 = vmatpush.bf16.msra.mxu0 %v5047_v12  ;;  %v1364_v5 = vpop.f32.mrf.mxu1  ;;  %v1352_v20 = vadd.f32 %v1351_v0, %v694_v9  ;;  %v5540_v0 = vld [vmem:[%s7392_s1 + $0x7f0] sm:$0xf0]  ;;  %v6715_v9 = vld [vmem:[%s7392_s1 + $0x7c4] sm:$0xf] }
 0x141   : > { %2410 = vmatpush.bf16.msra.mxu1 %v5175_v18  ;;  %v5543_v2 = vor.u32 %v6719_v61, %v5540_v0  ;;  %v5527_v13 = vor.u32 %v6715_v9, %v5524_v10  ;;  %v6711_v18 = vld [vmem:[%s7392_s1 + $0x7a4] sm:$0xf]  ;;  %v6598_v0 = vld [vmem:[%s7392_s1 + $0x414] sm:$0xf0] }
 0x142   : > { %v1365_v28 = vadd.f32 %v1364_v5, %v1352_v20  ;;  %2421 = vmatpush.bf16.msra.mxu2 %v5335_v34  ;;  %v5511_v21 = vor.u32 %v6711_v18, %v5508_v19  ;;  %v5291_v34 = vor.u32 %v6658_v27, %v5290_v26  ;;  %v5418_v19 = vld [vmem:[%s7392_s1 + $0x6e8] sm:$0xf] }
 0x143   : > { %2383 = vmatpush.bf16.msrb.mxu3 %v5443_v42 }
 0x146   : > { %2422 = vmatpush.bf16.msra.mxu2 %v5319_v47  ;;  %v5275_v47 = vor.u32 %v6654_v38, %v5274_v36 }
 0x147   : > { %v1353_v24 = vpop.f32.mrf.mxu0  ;;  %2384 = vmatpush.bf16.msrb.mxu3 %v5427_v57 }
 0x148   : > { %v1366_v48 = vpop.f32.mrf.mxu1  ;;  %v5115_v24 = vor.u32 %v6614_v17, %v5114_v15  ;;  %v6642_v17 = vld [vmem:[%s7392_s1 + $0x574] sm:$0xf0] }
 0x14a   : > { %2423 = vmatpush.bf16.msra.mxu2 %v5303_v63  ;;  %v5050_v63 = vld [vmem:[%s7392_s1 + $0x408] sm:$0xf] }
 0x14b   : > { %2429 = vmatpush.bf16.msra.mxu3 %v5543_v2  ;;  %v6646_v2 = vld [vmem:[%s7392_s1 + $0x594] sm:$0xf0] }
 0x14d   : > { %v1377_v6 = vpop.f32.mrf.mxu2 }
 0x14e   : > { %v1378_v35 = vadd.f32 %v1377_v6, %v1365_v28  ;;  %v1390_v12 = vpop.f32.mrf.mxu3  ;;  %v6707_v28 = vld [vmem:[%s7392_s1 + $0x784] sm:$0xf]  ;;  %v5099_v6 = vor.u32 %v6610_v25, %v5098_v43  ;;  %v5148_v43 = vld [vmem:[%s7392_s1 + $0x4d8] sm:$0xf0] }
 0x14f   : > { %v1403_v40 = vpop.f32.mrf.mxu0  ;;  %2430 = vmatpush.bf16.msra.mxu3 %v5527_v13  ;;  %v5495_v31 = vor.u32 %v6707_v28, %v5492_v29  ;;  %v5210_v29 = vld [vmem:[%s7392_s1 + $0x548] sm:$0xf] }
 0x150   : > { %v1391_v39 = vadd.f32 %v1390_v12, %v1378_v35  ;;  %v1416_v46 = vpop.f32.mrf.mxu1  ;;  %v1404_v5 = vadd.f32 %v1403_v40, %v695_v50  ;;  %v5082_v35 = vld [vmem:[%s7392_s1 + $0x448] sm:$0xf]  ;;  %v6606_v12 = vld [vmem:[%s7392_s1 + $0x454] sm:$0xf0]  ;;  %v5476_v40 = vld [vmem:[%s7392_s1 + $0x770] sm:$0xf0] }
 0x151   : > { %v6602_v50 = vld [vmem:[%s7392_s1 + $0x434] sm:$0xf0] }
 0x152   : > { %v1550_v49 = vmax.f32 %v1391_v39, 0.0  ;;  %v1417_v16 = vadd.f32 %v1416_v46, %v1404_v5  ;;  %v6703_v39 = vld [vmem:[%s7392_s1 + $0x764] sm:$0xf]  ;;  %v5083_v46 = vor.u32 %v6606_v12, %v5082_v35 }
 0x153   : > { %2431 = vmatpush.bf16.msra.mxu3 %v5511_v21  ;;  %v5479_v44 = vor.u32 %v6703_v39, %v5476_v40  ;;  %v5428_v21 = vld [vmem:[%s7392_s1 + $0x710] sm:$0xf0]  ;;  %v5194_v40 = vld [vmem:[%s7392_s1 + $0x528] sm:$0xf] }
 0x154   : > { %v7815_v56 = vpack.c.bf16 %v1550_v49, %v1550_v49  ;;  %v5066_v49 = vld [vmem:[%s7392_s1 + $0x428] sm:$0xf] }
 0x155   : > { %v1379_v62 = vpop.f32.mrf.mxu2  ;;  %v5067_v61 = vor.u32 %v6602_v50, %v5066_v49 }
 0x156   : > { %v1392_v1 = vpop.f32.mrf.mxu3  ;;  %2346 = vmatmul.bf16.vlgmr.msrb.gmra.mxu0 %v7815_v56 }
 0x157   : > { %2442 = vmatpush.bf16.msrb.mxu0 %v5163_v52  ;;  %v1405_v7 = vpop.f32.mrf.mxu0  ;;  %2432 = vmatpush.bf16.msra.mxu3 %v5495_v31  ;;  %v6650_v52 = vld [vmem:[%s7392_s1 + $0x5b4] sm:$0xf0]  ;;  %v5242_v1 = vld [vmem:[%s7392_s1 + $0x588] sm:$0xf] }
 0x158   : > { %v1418_v11 = vpop.f32.mrf.mxu1  ;;  %v5259_v62 = vor.u32 %v6650_v52, %v5258_v51  ;;  %v6624_v7 = vld [vmem:[%s7392_s1 + $0x4ec] sm:$0xf]  ;;  %v5243_v15 = vor.u32 %v6646_v2, %v5242_v1  ;;  %v5402_v31 = vld [vmem:[%s7392_s1 + $0x6c8] sm:$0xf]  ;;  %v6630_v52 = vld [vmem:[%s7392_s1 + $0x514] sm:$0xf0]  ;;  %v5371_v1 = vor.u32 %v6678_v54, %v5370_v53 }
 0x159   : > { %v5167_v18 = vor.u32 %v6624_v7, %v5164_v8  ;;  %v5178_v51 = vld [vmem:[%s7392_s1 + $0x508] sm:$0xf]  ;;  %v6604_v7 = vld [vmem:[%s7392_s1 + $0x44c] sm:$0xf]  ;;  %v5084_v8 = vld [vmem:[%s7392_s1 + $0x458] sm:$0xf0] }
 0x15a   : > { %v5530_v54 = vld [vmem:[%s7392_s1 + $0x7c8] sm:$0xf] }
 0x15b   : > { %2443 = vmatpush.bf16.msrb.mxu0 %v5147_v3  ;;  %2433 = vmatpush.bf16.msra.mxu3 %v5479_v44  ;;  %v6695_v3 = vld [vmem:[%s7392_s1 + $0x724] sm:$0xf]  ;;  %v6682_v44 = vld [vmem:[%s7392_s1 + $0x6b4] sm:$0xf0] }
 0x15c   : > { %v5447_v9 = vor.u32 %v6695_v3, %v5444_v4  ;;  %v5354_v3 = vld [vmem:[%s7392_s1 + $0x668] sm:$0xf] }
 0x15d   : > { %v1429_v20 = vpop.f32.mrf.mxu2 }
 0x15e   : > { %v1430_v22 = vadd.f32 %v1429_v20, %v1417_v16  ;;  %v1442_v23 = vpop.f32.mrf.mxu3  ;;  %v5226_v16 = vld [vmem:[%s7392_s1 + $0x568] sm:$0xf]  ;;  %v6691_v20 = vld [vmem:[%s7392_s1 + $0x704] sm:$0xf] }
 0x15f   : > { %2444 = vmatpush.bf16.msrb.mxu0 %v5131_v14  ;;  %2434 = vmatpush.bf16.msra.mxu3 %v5463_v58  ;;  %v5051_v14 = vor.u32 %v6598_v0, %v5050_v63  ;;  %v5431_v25 = vor.u32 %v6691_v20, %v5428_v21  ;;  %v5179_v63 = vor.u32 %v6630_v52, %v5178_v51  ;;  %v697_v0 = vperm.slane %v7781_v60, 3  ;;  %v6648_v20 = vld [vmem:[%s7392_s1 + $0x5ac] sm:$0xf]  ;;  %v5260_v21 = vld [vmem:[%s7392_s1 + $0x5b8] sm:$0xf0] }
 0x160   : > { %v1443_v48 = vadd.f32 %v1442_v23, %v1430_v22  ;;  %v1455_v30 = vpop.f32.mrf.mxu0  ;;  %v6690_v23 = vld [vmem:[%s7392_s1 + $0x6f4] sm:$0xf0] }
 0x161   : > { %v1456_v55 = vadd.f32 %v1455_v30, %v696_v41  ;;  %v5419_v27 = vor.u32 %v6690_v23, %v5418_v19  ;;  %v6638_v30 = vld [vmem:[%s7392_s1 + $0x554] sm:$0xf0] }
 0x162   : > { %v1551_v32 = vmax.f32 %v1443_v48, 0.0  ;;  %v5227_v48 = vor.u32 %v6642_v17, %v5226_v16  ;;  %v5211_v36 = vor.u32 %v6638_v30, %v5210_v29  ;;  %v6634_v41 = vld [vmem:[%s7392_s1 + $0x534] sm:$0xf0]  ;;  %v6600_v17 = vld [vmem:[%s7392_s1 + $0x42c] sm:$0xf] }
 0x163   : > { %v1468_v33 = vpop.f32.mrf.mxu1  ;;  %2445 = vmatpush.bf16.msrb.mxu0 %v5115_v24  ;;  %2435 = vmatpush.bf16.msra.mxu3 %v5447_v9  ;;  %v6620_v24 = vld [vmem:[%s7392_s1 + $0x4cc] sm:$0xf]  ;;  %v6670_v16 = vld [vmem:[%s7392_s1 + $0x654] sm:$0xf0] }
 0x164   : > { %v7839_v37 = vpack.c.bf16 %v1551_v32, %v1551_v32  ;;  %v1469_v5 = vadd.f32 %v1468_v33, %v1456_v55  ;;  %v5151_v28 = vor.u32 %v6620_v24, %v5148_v43  ;;  %v6686_v33 = vld [vmem:[%s7392_s1 + $0x6d4] sm:$0xf0]  ;;  %v6608_v55 = vld [vmem:[%s7392_s1 + $0x46c] sm:$0xf]  ;;  %v5322_v43 = vld [vmem:[%s7392_s1 + $0x628] sm:$0xf] }
 0x165   : > { %v1431_v42 = vpop.f32.mrf.mxu2  ;;  %v5403_v38 = vor.u32 %v6686_v33, %v5402_v31  ;;  %v6652_v9 = vld [vmem:[%s7392_s1 + $0x5cc] sm:$0xf]  ;;  %v5244_v31 = vld [vmem:[%s7392_s1 + $0x598] sm:$0xf0] }
 0x166   : > { %v1444_v45 = vpop.f32.mrf.mxu3  ;;  %2359 = vmatmul.bf16.vlgmr.msrb.gmra.mxu1 %v7839_v37  ;;  %2398 = vmatmul.bf16.vlgmr.msra.gmra.mxu0 %v7815_v56  ;;  %v5386_v42 = vld [vmem:[%s7392_s1 + $0x6a8] sm:$0xf]  ;;  %v6644_v30 = vld [vmem:[%s7392_s1 + $0x58c] sm:$0xf] }
 0x167   : > { %2446 = vmatpush.bf16.msrb.mxu0 %v5099_v6  ;;  %2455 = vmatpush.bf16.msrb.mxu1 %v5291_v34  ;;  %v6616_v6 = vld [vmem:[%s7392_s1 + $0x4ac] sm:$0xf]  ;;  %v5132_v34 = vld [vmem:[%s7392_s1 + $0x4b8] sm:$0xf0]  ;;  %v5387_v49 = vor.u32 %v6682_v44, %v5386_v42 }
 0x168   : > { %v1457_v57 = vpop.f32.mrf.mxu0  ;;  %2436 = vmatpush.bf16.msra.mxu3 %v5431_v25  ;;  %v5135_v39 = vor.u32 %v6616_v6, %v5132_v34  ;;  %v6612_v45 = vld [vmem:[%s7392_s1 + $0x48c] sm:$0xf]  ;;  %v5228_v44 = vld [vmem:[%s7392_s1 + $0x578] sm:$0xf0] }
 0x169   : > { %v5100_v57 = vld [vmem:[%s7392_s1 + $0x478] sm:$0xf0]  ;;  %v6640_v42 = vld [vmem:[%s7392_s1 + $0x56c] sm:$0xf] }
 0x16a   : > { %v5103_v2 = vor.u32 %v6608_v55, %v5100_v57  ;;  %v5231_v52 = vor.u32 %v6640_v42, %v5228_v44  ;;  %v6718_v55 = vld [vmem:[%s7392_s1 + $0x7d4] sm:$0xf0]  ;;  %v6636_v57 = vld [vmem:[%s7392_s1 + $0x54c] sm:$0xf] }
 0x16b   : > { %v1470_v59 = vpop.f32.mrf.mxu1  ;;  %2447 = vmatpush.bf16.msrb.mxu0 %v5083_v46  ;;  %2456 = vmatpush.bf16.msrb.mxu1 %v5275_v47  ;;  %v5116_v46 = vld [vmem:[%s7392_s1 + $0x498] sm:$0xf0]  ;;  %v5195_v47 = vor.u32 %v6634_v41, %v5194_v40  ;;  %v5546_v40 = vld [vmem:[%s7392_s1 + $0x7e8] sm:$0xf]  ;;  %v6722_v41 = vld [vmem:[%s7392_s1 + $0x7f4] sm:$0xf0] }
 0x16c   : > { %v5119_v50 = vor.u32 %v6612_v45, %v5116_v46  ;;  %v6656_v59 = vld [vmem:[%s7392_s1 + $0x5ec] sm:$0xf]  ;;  %v5420_v46 = vld [vmem:[%s7392_s1 + $0x6f8] sm:$0xf0] }
 0x16d   : > { %v1481_v10 = vpop.f32.mrf.mxu2  ;;  %v6688_v45 = vld [vmem:[%s7392_s1 + $0x6ec] sm:$0xf] }
 0x16e   : > { %v1494_v11 = vpop.f32.mrf.mxu3  ;;  %v1482_v13 = vadd.f32 %v1481_v10, %v1469_v5  ;;  %v6674_v5 = vld [vmem:[%s7392_s1 + $0x674] sm:$0xf0]  ;;  %v5276_v10 = vld [vmem:[%s7392_s1 + $0x5d8] sm:$0xf0]  ;;  %v5423_v53 = vor.u32 %v6688_v45, %v5420_v46  ;;  %v6716_v46 = vld [vmem:[%s7392_s1 + $0x7cc] sm:$0xf] }
 0x16f   : > { %2448 = vmatpush.bf16.msrb.mxu0 %v5067_v61  ;;  %2457 = vmatpush.bf16.msrb.mxu1 %v5259_v62  ;;  %v5292_v61 = vld [vmem:[%s7392_s1 + $0x5f8] sm:$0xf0]  ;;  %v5355_v60 = vor.u32 %v6674_v5, %v5354_v3  ;;  %v5514_v3 = vld [vmem:[%s7392_s1 + $0x7a8] sm:$0xf]  ;;  %v6632_v5 = vld [vmem:[%s7392_s1 + $0x52c] sm:$0xf] }
 0x170   : > { %v1495_v22 = vadd.f32 %v1494_v11, %v1482_v13  ;;  %v5295_v4 = vor.u32 %v6656_v59, %v5292_v61  ;;  %v5087_v11 = vor.u32 %v6604_v7, %v5084_v8  ;;  %v5338_v13 = vld [vmem:[%s7392_s1 + $0x648] sm:$0xf]  ;;  %v5212_v59 = vld [vmem:[%s7392_s1 + $0x558] sm:$0xf0]  ;;  %v6684_v61 = vld [vmem:[%s7392_s1 + $0x6cc] sm:$0xf] }
 0x171   : > { %v5339_v23 = vor.u32 %v6670_v16, %v5338_v13  ;;  %v5196_v7 = vld [vmem:[%s7392_s1 + $0x538] sm:$0xf0]  ;;  %v6680_v8 = vld [vmem:[%s7392_s1 + $0x6ac] sm:$0xf]  ;;  %v6710_v13 = vld [vmem:[%s7392_s1 + $0x794] sm:$0xf0] }
 0x172   : > { %v1552_v26 = vmax.f32 %v1495_v22, 0.0  ;;  %v6676_v16 = vld [vmem:[%s7392_s1 + $0x68c] sm:$0xf] }
 0x173   : > { %2449 = vmatpush.bf16.msrb.mxu0 %v5051_v14  ;;  %2458 = vmatpush.bf16.msrb.mxu1 %v5243_v15  ;;  %v5279_v15 = vor.u32 %v6652_v9, %v5276_v10  ;;  %v5388_v9 = vld [vmem:[%s7392_s1 + $0x6b8] sm:$0xf0]  ;;  %v5199_v10 = vor.u32 %v6632_v5, %v5196_v7  ;;  %v5779_v5 = vld [vmem:[%s7392_s1 + $0x8c0] sm:$0xf]  ;;  %v6749_v7 = vld [vmem:[%s7392_s1 + $0x8cc] sm:$0xf0] }
 0x174   : > { %v7872_v32 = vpack.c.bf16 %v1552_v26, %v1552_v26  ;;  %v5263_v26 = vor.u32 %v6648_v20, %v5260_v21  ;;  %v5482_v21 = vld [vmem:[%s7392_s1 + $0x768] sm:$0xf] }
 0x175   : > { %v1483_v35 = vpop.f32.mrf.mxu2 }
 0x176   : > { %v1496_v12 = vpop.f32.mrf.mxu3  ;;  %2411 = vmatmul.bf16.vlgmr.msra.gmra.mxu1 %v7839_v37  ;;  %2450 = vmatmul.bf16.vlgmr.msrb.gmra.mxu0 %v7815_v56 }
 0x177   : > { %2494 = vmatpush.bf16.msra.mxu0 %v5167_v18  ;;  %2372 = vmatmul.bf16.vlgmr.msrb.gmra.mxu2 %v7872_v32  ;;  %v5068_v18 = vld [vmem:[%s7392_s1 + $0x438] sm:$0xf0]  ;;  %v5306_v12 = vld [vmem:[%s7392_s1 + $0x608] sm:$0xf] }
 0x178   : > { %2459 = vmatpush.bf16.msrb.mxu1 %v5227_v48  ;;  %2468 = vmatpush.bf16.msrb.mxu2 %v5419_v27  ;;  %v5071_v24 = vor.u32 %v6600_v17, %v5068_v18  ;;  %v6666_v48 = vld [vmem:[%s7392_s1 + $0x634] sm:$0xf0]  ;;  %v6596_v27 = vld [vmem:[%s7392_s1 + $0x40c] sm:$0xf]  ;;  %v5372_v17 = vld [vmem:[%s7392_s1 + $0x698] sm:$0xf0] }
 0x179   : > { %v5323_v34 = vor.u32 %v6666_v48, %v5322_v43  ;;  %v5375_v20 = vor.u32 %v6676_v16, %v5372_v17  ;;  %v6702_v48 = vld [vmem:[%s7392_s1 + $0x754] sm:$0xf0]  ;;  %v6741_v16 = vld [vmem:[%s7392_s1 + $0x88c] sm:$0xf0]  ;;  %v5731_v17 = vld [vmem:[%s7392_s1 + $0x860] sm:$0xf] }
 0x17b   : > { %2495 = vmatpush.bf16.msra.mxu0 %v5151_v28  ;;  %v5052_v28 = vld [vmem:[%s7392_s1 + $0x418] sm:$0xf0] }
 0x17c   : > { %2460 = vmatpush.bf16.msrb.mxu1 %v5211_v36  ;;  %2469 = vmatpush.bf16.msrb.mxu2 %v5403_v38  ;;  %v5055_v35 = vor.u32 %v6596_v27, %v5052_v28  ;;  %v6662_v36 = vld [vmem:[%s7392_s1 + $0x614] sm:$0xf0]  ;;  %v6668_v27 = vld [vmem:[%s7392_s1 + $0x64c] sm:$0xf]  ;;  %v5340_v28 = vld [vmem:[%s7392_s1 + $0x658] sm:$0xf0] }
 0x17f   : > { %2496 = vmatpush.bf16.msra.mxu0 %v5135_v39  ;;  %v5247_v39 = vor.u32 %v6644_v30, %v5244_v31  ;;  %v5343_v30 = vor.u32 %v6668_v27, %v5340_v28  ;;  %v5450_v31 = vld [vmem:[%s7392_s1 + $0x728] sm:$0xf]  ;;  %v6781_v27 = vld [vmem:[%s7392_s1 + $0x9cc] sm:$0xf0] }
 0x180   : > { %v1507_v58 = vpop.f32.mrf.mxu0  ;;  %2461 = vmatpush.bf16.msrb.mxu1 %v5195_v47  ;;  %2470 = vmatpush.bf16.msrb.mxu2 %v5387_v49  ;;  %v5307_v49 = vor.u32 %v6662_v36, %v5306_v12  ;;  %v5434_v36 = vld [vmem:[%s7392_s1 + $0x708] sm:$0xf] }
 0x181   : > { %v1508_v14 = vadd.f32 %v1507_v58, %v697_v0  ;;  %v5531_v0 = vor.u32 %v6718_v55, %v5530_v54  ;;  %v6708_v54 = vld [vmem:[%s7392_s1 + $0x78c] sm:$0xf]  ;;  %v5500_v55 = vld [vmem:[%s7392_s1 + $0x798] sm:$0xf0] }
 0x183   : > { %v1520_v62 = vpop.f32.mrf.mxu1  ;;  %2497 = vmatpush.bf16.msra.mxu0 %v5119_v50  ;;  %v5547_v50 = vor.u32 %v6722_v41, %v5546_v40  ;;  %v6720_v40 = vld [vmem:[%s7392_s1 + $0x7ec] sm:$0xf]  ;;  %v5548_v41 = vld [vmem:[%s7392_s1 + $0x7f8] sm:$0xf0] }
 0x184   : > { %2462 = vmatpush.bf16.msrb.mxu1 %v5179_v63  ;;  %2471 = vmatpush.bf16.msrb.mxu2 %v5371_v1  ;;  %v1521_v25 = vadd.f32 %v1520_v62, %v1508_v14  ;;  %v5404_v62 = vld [vmem:[%s7392_s1 + $0x6d8] sm:$0xf0]  ;;  %v5215_v1 = vor.u32 %v6636_v57, %v5212_v59  ;;  %v6628_v14 = vld [vmem:[%s7392_s1 + $0x50c] sm:$0xf]  ;;  %v5551_v45 = vor.u32 %v6720_v40, %v5548_v41  ;;  %v5797_v40 = vld [vmem:[%s7392_s1 + $0x8f0] sm:$0xf0] }
 0x185   : > { %v5503_v57 = vor.u32 %v6708_v54, %v5500_v55  ;;  %v5484_v59 = vld [vmem:[%s7392_s1 + $0x778] sm:$0xf0] }
 0x187   : > { %2498 = vmatpush.bf16.msra.mxu0 %v5103_v2  ;;  %2463 = vmatmul.bf16.vlgmr.msrb.gmra.mxu1 %v7839_v37  ;;  %v5407_v2 = vor.u32 %v6684_v61, %v5404_v62  ;;  %v5795_v61 = vld [vmem:[%s7392_s1 + $0x8e0] sm:$0xf]  ;;  %v6753_v62 = vld [vmem:[%s7392_s1 + $0x8ec] sm:$0xf0] }
 0x188   : > { %2507 = vmatpush.bf16.msra.mxu1 %v5295_v4  ;;  %v1509_v19 = vpop.f32.mrf.mxu0  ;;  %2424 = vmatmul.bf16.vlgmr.msra.gmra.mxu2 %v7872_v32  ;;  %v6714_v4 = vld [vmem:[%s7392_s1 + $0x7b4] sm:$0xf0] }
 0x189   : > { %2472 = vmatpush.bf16.msrb.mxu2 %v5355_v60  ;;  %v5391_v60 = vor.u32 %v6680_v8, %v5388_v9  ;;  %v5780_v9 = vor.u32 %v6749_v7, %v5779_v5  ;;  %v6019_v5 = vld [vmem:[%s7392_s1 + $0xaa0] sm:$0xf] }
 0x18b   : > { %v1522_v22 = vpop.f32.mrf.mxu1  ;;  %2499 = vmatpush.bf16.msra.mxu0 %v5087_v11  ;;  %v5498_v11 = vld [vmem:[%s7392_s1 + $0x788] sm:$0xf] }
 0x18c   : > { %2508 = vmatpush.bf16.msra.mxu1 %v5279_v15  ;;  %v5180_v15 = vld [vmem:[%s7392_s1 + $0x518] sm:$0xf0]  ;;  %v5499_v18 = vor.u32 %v6710_v13, %v5498_v11  ;;  %v6706_v22 = vld [vmem:[%s7392_s1 + $0x774] sm:$0xf0] }
 0x18d   : > { %v1533_v29 = vpop.f32.mrf.mxu2  ;;  %2473 = vmatpush.bf16.msrb.mxu2 %v5339_v23  ;;  %v5183_v19 = vor.u32 %v6628_v14, %v5180_v15  ;;  %v6672_v23 = vld [vmem:[%s7392_s1 + $0x66c] sm:$0xf]  ;;  %v5483_v43 = vor.u32 %v6706_v22, %v5482_v21  ;;  %v5436_v11 = vld [vmem:[%s7392_s1 + $0x718] sm:$0xf0]  ;;  %v5747_v15 = vld [vmem:[%s7392_s1 + $0x880] sm:$0xf] }
 0x18e   : > { %v1534_v33 = vadd.f32 %v1533_v29, %v1521_v25  ;;  %v1546_v6 = vpop.f32.mrf.mxu3  ;;  %v6785_v21 = vld [vmem:[%s7392_s1 + $0x9ec] sm:$0xf0] }
 0x18f   : > { %2500 = vmatpush.bf16.msra.mxu0 %v5071_v24  ;;  %v5356_v24 = vld [vmem:[%s7392_s1 + $0x678] sm:$0xf0] }
 0x190   : > { %v1547_v38 = vadd.f32 %v1546_v6, %v1534_v33  ;;  %2509 = vmatpush.bf16.msra.mxu1 %v5263_v26  ;;  %v5359_v25 = vor.u32 %v6672_v23, %v5356_v24  ;;  %v5466_v26 = vld [vmem:[%s7392_s1 + $0x748] sm:$0xf]  ;;  %v6698_v33 = vld [vmem:[%s7392_s1 + $0x734] sm:$0xf0]  ;;  %v6664_v6 = vld [vmem:[%s7392_s1 + $0x62c] sm:$0xf] }
 0x191   : > { %2474 = vmatpush.bf16.msrb.mxu2 %v5323_v34  ;;  %v5467_v29 = vor.u32 %v6702_v48, %v5466_v26  ;;  %v5324_v34 = vld [vmem:[%s7392_s1 + $0x638] sm:$0xf0]  ;;  %v5907_v48 = vld [vmem:[%s7392_s1 + $0x9c0] sm:$0xf] }
 0x192   : > { %v1553_v47 = vmax.f32 %v1547_v38, 0.0  ;;  %v5327_v12 = vor.u32 %v6664_v6, %v5324_v34  ;;  %v6694_v38 = vld [vmem:[%s7392_s1 + $0x714] sm:$0xf0]  ;;  %v5908_v28 = vor.u32 %v6781_v27, %v5907_v48  ;;  %v6801_v48 = vld [vmem:[%s7392_s1 + $0xa6c] sm:$0xf0] }
 0x193   : > { %2501 = vmatpush.bf16.msra.mxu0 %v5055_v35  ;;  %v5451_v35 = vor.u32 %v6698_v33, %v5450_v31  ;;  %v5435_v42 = vor.u32 %v6694_v38, %v5434_v36  ;;  %v6777_v33 = vld [vmem:[%s7392_s1 + $0x9ac] sm:$0xf0]  ;;  %v5875_v36 = vld [vmem:[%s7392_s1 + $0x980] sm:$0xf] }
 0x194   : > { %v7923_v51 = vpack.c.bf16 %v1553_v47, %v1553_v47  ;;  %2510 = vmatpush.bf16.msra.mxu1 %v5247_v39  ;;  %v6660_v39 = vld [vmem:[%s7392_s1 + $0x60c] sm:$0xf]  ;;  %v5532_v47 = vld [vmem:[%s7392_s1 + $0x7d8] sm:$0xf0] }
 0x195   : > { %v1535_v58 = vpop.f32.mrf.mxu2  ;;  %2475 = vmatpush.bf16.msrb.mxu2 %v5307_v49  ;;  %v5535_v49 = vor.u32 %v6716_v46, %v5532_v47  ;;  %v6051_v46 = vld [vmem:[%s7392_s1 + $0xae0] sm:$0xf] }
 0x196   : > { %v1548_v63 = vpop.f32.mrf.mxu3  ;;  %2385 = vmatmul.bf16.vlgmr.msrb.gmra.mxu3 %v7923_v51  ;;  %2502 = vmatmul.bf16.vlgmr.msra.gmra.mxu0 %v7815_v56  ;;  %v5515_v56 = vor.u32 %v6714_v4, %v5514_v3  ;;  %v6704_v58 = vld [vmem:[%s7392_s1 + $0x76c] sm:$0xf]  ;;  %v5452_v4 = vld [vmem:[%s7392_s1 + $0x738] sm:$0xf0] }
 0x197   : > { %2481 = vmatpush.bf16.msrb.mxu3 %v5547_v50  ;;  %v6712_v50 = vld [vmem:[%s7392_s1 + $0x7ac] sm:$0xf]  ;;  %v5796_v63 = vor.u32 %v6753_v62, %v5795_v61  ;;  %v6035_v61 = vld [vmem:[%s7392_s1 + $0xac0] sm:$0xf] }
 0x198   : > { %2511 = vmatpush.bf16.msra.mxu1 %v5231_v52  ;;  %2476 = vmatmul.bf16.vlgmr.msrb.gmra.mxu2 %v7872_v32  ;;  %v5516_v52 = vld [vmem:[%s7392_s1 + $0x7b8] sm:$0xf0]  ;;  %v6696_v3 = vld [vmem:[%s7392_s1 + $0x72c] sm:$0xf] }
 0x199   : > { %2520 = vmatpush.bf16.msra.mxu2 %v5423_v53  ;;  %v5519_v53 = vor.u32 %v6712_v50, %v5516_v52  ;;  %3334 = vmatpush.bf16.msrb.mxu0 %v5796_v63  ;;  %v5455_v8 = vor.u32 %v6696_v3, %v5452_v4  ;;  %v6747_v50 = vld [vmem:[%s7392_s1 + $0x8c4] sm:$0xf]  ;;  %v5781_v52 = vld [vmem:[%s7392_s1 + $0x8d0] sm:$0xf0]  ;;  %v6813_v63 = vld [vmem:[%s7392_s1 + $0xacc] sm:$0xf0] }
 0x19a   : > { %v5827_v3 = vld [vmem:[%s7392_s1 + $0x920] sm:$0xf]  ;;  %v6761_v4 = vld [vmem:[%s7392_s1 + $0x92c] sm:$0xf0] }
 0x19b   : > { %2482 = vmatpush.bf16.msrb.mxu3 %v5531_v0  ;;  %v6700_v0 = vld [vmem:[%s7392_s1 + $0x74c] sm:$0xf]  ;;  %v5828_v7 = vor.u32 %v6761_v4, %v5827_v3  ;;  %v5861_v3 = vld [vmem:[%s7392_s1 + $0x970] sm:$0xf0] }
 0x19c   : > { %2512 = vmatpush.bf16.msra.mxu1 %v5215_v1  ;;  %v5468_v1 = vld [vmem:[%s7392_s1 + $0x758] sm:$0xf0] }
 0x19d   : > { %2521 = vmatpush.bf16.msra.mxu2 %v5407_v2  ;;  %v5471_v2 = vor.u32 %v6700_v0, %v5468_v1  ;;  %3335 = vmatpush.bf16.msrb.mxu0 %v5780_v9  ;;  %v5765_v0 = vld [vmem:[%s7392_s1 + $0x8b0] sm:$0xf0]  ;;  %v6036_v1 = vor.u32 %v6813_v63, %v6035_v61  ;;  %v6739_v9 = vld [vmem:[%s7392_s1 + $0x884] sm:$0xf]  ;;  %v6789_v63 = vld [vmem:[%s7392_s1 + $0xa0c] sm:$0xf0] }
 0x19f   : > { %2483 = vmatpush.bf16.msrb.mxu3 %v5515_v56  ;;  %v5763_v56 = vld [vmem:[%s7392_s1 + $0x8a0] sm:$0xf] }
 0x1a0   : > { %2513 = vmatpush.bf16.msra.mxu1 %v5199_v10  ;;  %v6745_v10 = vld [vmem:[%s7392_s1 + $0x8ac] sm:$0xf0] }
 0x1a1   : > { %2522 = vmatpush.bf16.msra.mxu2 %v5391_v60  ;;  %v6692_v60 = vld [vmem:[%s7392_s1 + $0x70c] sm:$0xf]  ;;  %v5764_v13 = vor.u32 %v6745_v10, %v5763_v56  ;;  %v5749_v56 = vld [vmem:[%s7392_s1 + $0x890] sm:$0xf0] }
 0x1a2   : > { %v5439_v14 = vor.u32 %v6692_v60, %v5436_v11 }
 0x1a3   : > { %2484 = vmatpush.bf16.msrb.mxu3 %v5499_v18  ;;  %3336 = vmatpush.bf16.msrb.mxu0 %v5764_v13  ;;  %v5748_v18 = vor.u32 %v6741_v16, %v5747_v15  ;;  %v5752_v13 = vor.u32 %v6739_v9, %v5749_v56  ;;  %v6757_v15 = vld [vmem:[%s7392_s1 + $0x90c] sm:$0xf0]  ;;  %v6003_v16 = vld [vmem:[%s7392_s1 + $0xa80] sm:$0xf] }
 0x1a4   : > { %2514 = vmatpush.bf16.msra.mxu1 %v5183_v19  ;;  %v6737_v19 = vld [vmem:[%s7392_s1 + $0x86c] sm:$0xf0]  ;;  %v6163_v56 = vld [vmem:[%s7392_s1 + $0xbc0] sm:$0xf] }
 0x1a5   : > { %2523 = vmatpush.bf16.msra.mxu2 %v5375_v20  ;;  %v5923_v20 = vld [vmem:[%s7392_s1 + $0x9e0] sm:$0xf]  ;;  %v5732_v23 = vor.u32 %v6737_v19, %v5731_v17  ;;  %v6805_v17 = vld [vmem:[%s7392_s1 + $0xa8c] sm:$0xf0] }
 0x1a6   : > { %2437 = vmatmul.bf16.vlgmr.msra.gmra.mxu3 %v7923_v51  ;;  %v5924_v22 = vor.u32 %v6785_v21, %v5923_v20  ;;  %v6004_v19 = vor.u32 %v6805_v17, %v6003_v16  ;;  %v6735_v20 = vld [vmem:[%s7392_s1 + $0x864] sm:$0xf]  ;;  %v5733_v21 = vld [vmem:[%s7392_s1 + $0x870] sm:$0xf0] }
 0x1a7   : > { %2485 = vmatpush.bf16.msrb.mxu3 %v5483_v43  ;;  %2515 = vmatmul.bf16.vlgmr.msra.gmra.mxu1 %v7839_v37  ;;  %v5308_v37 = vld [vmem:[%s7392_s1 + $0x618] sm:$0xf0]  ;;  %v5715_v43 = vld [vmem:[%s7392_s1 + $0x840] sm:$0xf] }
 0x1a8   : > { %v5311_v44 = vor.u32 %v6660_v39, %v5308_v37  ;;  %3337 = vmatpush.bf16.msrb.mxu0 %v5748_v18  ;;  %3347 = vmatpush.bf16.msrb.mxu1 %v5924_v22  ;;  %v6773_v39 = vld [vmem:[%s7392_s1 + $0x98c] sm:$0xf0]  ;;  %v6751_v37 = vld [vmem:[%s7392_s1 + $0x8e4] sm:$0xf] }
 0x1a9   : > { %2524 = vmatpush.bf16.msra.mxu2 %v5359_v25  ;;  %v6733_v25 = vld [vmem:[%s7392_s1 + $0x84c] sm:$0xf0]  ;;  %v5876_v41 = vor.u32 %v6773_v39, %v5875_v36  ;;  %v6783_v22 = vld [vmem:[%s7392_s1 + $0x9e4] sm:$0xf]  ;;  %v5701_v39 = vld [vmem:[%s7392_s1 + $0x830] sm:$0xf0] }
 0x1aa   : > { %v5716_v26 = vor.u32 %v6733_v25, %v5715_v43  ;;  %v5925_v43 = vld [vmem:[%s7392_s1 + $0x9f0] sm:$0xf0] }
 0x1ab   : > { %2486 = vmatpush.bf16.msrb.mxu3 %v5467_v29  ;;  %v5699_v29 = vld [vmem:[%s7392_s1 + $0x820] sm:$0xf]  ;;  %v5928_v25 = vor.u32 %v6783_v22, %v5925_v43  ;;  %v5829_v43 = vld [vmem:[%s7392_s1 + $0x930] sm:$0xf0] }
 0x1ac   : > { %3338 = vmatpush.bf16.msrb.mxu0 %v5732_v23  ;;  %3348 = vmatpush.bf16.msrb.mxu1 %v5908_v28  ;;  %v5736_v23 = vor.u32 %v6735_v20, %v5733_v21  ;;  %v6731_v28 = vld [vmem:[%s7392_s1 + $0x844] sm:$0xf]  ;;  %v6147_v20 = vld [vmem:[%s7392_s1 + $0xba0] sm:$0xf]  ;;  %v6841_v21 = vld [vmem:[%s7392_s1 + $0xbac] sm:$0xf0] }
 0x1ad   : > { %2525 = vmatpush.bf16.msra.mxu2 %v5343_v30  ;;  %v6729_v30 = vld [vmem:[%s7392_s1 + $0x82c] sm:$0xf0]  ;;  %v6148_v22 = vor.u32 %v6841_v21, %v6147_v20  ;;  %v5787_v20 = vld [vmem:[%s7392_s1 + $0x8c8] sm:$0xf]  ;;  %v6750_v21 = vld [vmem:[%s7392_s1 + $0x8d4] sm:$0xf0] }
 0x1ae   : > { %v5700_v31 = vor.u32 %v6729_v30, %v5699_v29  ;;  %v5717_v29 = vld [vmem:[%s7392_s1 + $0x850] sm:$0xf0]  ;;  %v6779_v30 = vld [vmem:[%s7392_s1 + $0x9c4] sm:$0xf] }
 0x1af   : > { %2487 = vmatpush.bf16.msrb.mxu3 %v5451_v35  ;;  %v5683_v35 = vld [vmem:[%s7392_s1 + $0x800] sm:$0xf] }
 0x1b0   : > { %3339 = vmatpush.bf16.msrb.mxu0 %v5716_v26  ;;  %v5987_v26 = vld [vmem:[%s7392_s1 + $0xa60] sm:$0xf] }
 0x1b1   : > { %2526 = vmatpush.bf16.msra.mxu2 %v5327_v12  ;;  %v6725_v12 = vld [vmem:[%s7392_s1 + $0x80c] sm:$0xf0]  ;;  %v5988_v27 = vor.u32 %v6801_v48, %v5987_v26  ;;  %v6021_v48 = vld [vmem:[%s7392_s1 + $0xab0] sm:$0xf0] }
 0x1b2   : > { %v5684_v38 = vor.u32 %v6725_v12, %v5683_v35  ;;  %v5971_v35 = vld [vmem:[%s7392_s1 + $0xa40] sm:$0xf]  ;;  %v6797_v12 = vld [vmem:[%s7392_s1 + $0xa4c] sm:$0xf0] }
 0x1b3   : > { %2488 = vmatpush.bf16.msrb.mxu3 %v5435_v42  ;;  %v5800_v42 = vor.u32 %v6751_v37, %v5797_v40  ;;  %v5972_v36 = vor.u32 %v6797_v12, %v5971_v35  ;;  %v6775_v37 = vld [vmem:[%s7392_s1 + $0x9a4] sm:$0xf]  ;;  %v5813_v35 = vld [vmem:[%s7392_s1 + $0x910] sm:$0xf0] }
 0x1b4   : > { %3340 = vmatpush.bf16.msrb.mxu0 %v5700_v31  ;;  %v6803_v12 = vld [vmem:[%s7392_s1 + $0xa84] sm:$0xf] }
 0x1b5   : > { %2527 = vmatpush.bf16.msra.mxu2 %v5311_v44  ;;  %v5859_v44 = vld [vmem:[%s7392_s1 + $0x960] sm:$0xf] }
 0x1b6   : > { %2489 = vmatmul.bf16.vlgmr.msrb.gmra.mxu3 %v7923_v51 }
 0x1b7   : > { %2533 = vmatpush.bf16.msra.mxu3 %v5551_v45  ;;  %v6769_v45 = vld [vmem:[%s7392_s1 + $0x96c] sm:$0xf0] }
 0x1b8   : > { %2528 = vmatmul.bf16.vlgmr.msra.gmra.mxu2 %v7872_v32  ;;  %v5487_v32 = vor.u32 %v6704_v58, %v5484_v59  ;;  %3341 = vmatpush.bf16.msrb.mxu0 %v5684_v38  ;;  %v5860_v47 = vor.u32 %v6769_v45, %v5859_v44  ;;  %v5843_v58 = vld [vmem:[%s7392_s1 + $0x940] sm:$0xf]  ;;  %v6765_v59 = vld [vmem:[%s7392_s1 + $0x94c] sm:$0xf0]  ;;  %v6727_v38 = vld [vmem:[%s7392_s1 + $0x824] sm:$0xf] }
 0x1b9   : > { %v5844_v62 = vor.u32 %v6765_v59, %v5843_v58  ;;  %v5704_v40 = vor.u32 %v6727_v38, %v5701_v39  ;;  %v5955_v44 = vld [vmem:[%s7392_s1 + $0xa20] sm:$0xf]  ;;  %v6793_v45 = vld [vmem:[%s7392_s1 + $0xa2c] sm:$0xf0]  ;;  %v5877_v59 = vld [vmem:[%s7392_s1 + $0x990] sm:$0xf0] }
 0x1ba   : > { %v6005_v39 = vld [vmem:[%s7392_s1 + $0xa90] sm:$0xf0] }
 0x1bb   : > { %2534 = vmatpush.bf16.msra.mxu3 %v5535_v49  ;;  %v6817_v49 = vld [vmem:[%s7392_s1 + $0xaec] sm:$0xf0] }
 0x1bc   : > { %3386 = vmatpush.bf16.msra.mxu0 %v5800_v42  ;;  %v6052_v55 = vor.u32 %v6817_v49, %v6051_v46  ;;  %v6723_v49 = vld [vmem:[%s7392_s1 + $0x804] sm:$0xf] }
 0x1be   : > { %3360 = vmatpush.bf16.msrb.mxu2 %v6052_v55 }
 0x1bf   : > { %2535 = vmatpush.bf16.msra.mxu3 %v5519_v53 }
 0x1c2   : > { %3361 = vmatpush.bf16.msrb.mxu2 %v6036_v1  ;;  %v6849_v1 = vld [vmem:[%s7392_s1 + $0xbec] sm:$0xf0] }
 0x1c3   : > { %2536 = vmatpush.bf16.msra.mxu3 %v5503_v57  ;;  %v5784_v57 = vor.u32 %v6747_v50, %v5781_v52  ;;  %v5685_v50 = vld [vmem:[%s7392_s1 + $0x810] sm:$0xf0]  ;;  %v6771_v52 = vld [vmem:[%s7392_s1 + $0x984] sm:$0xf] }
 0x1c4   : > { %v5688_v58 = vor.u32 %v6723_v49, %v5685_v50  ;;  %v5880_v61 = vor.u32 %v6771_v52, %v5877_v59 }
 0x1c5   : > { %3387 = vmatpush.bf16.msra.mxu0 %v5784_v57 }
 0x1c7   : > { %2537 = vmatpush.bf16.msra.mxu3 %v5487_v32  ;;  %v6743_v32 = vld [vmem:[%s7392_s1 + $0x8a4] sm:$0xf] }
 0x1cb   : > { %2538 = vmatpush.bf16.msra.mxu3 %v5471_v2  ;;  %v5768_v2 = vor.u32 %v6743_v32, %v5765_v0  ;;  %v6179_v32 = vld [vmem:[%s7392_s1 + $0xbe0] sm:$0xf] }
 0x1cc   : > { %v6180_v4 = vor.u32 %v6849_v1, %v6179_v32  ;;  %v6825_v1 = vld [vmem:[%s7392_s1 + $0xb2c] sm:$0xf0] }
 0x1cd   : > { %3388 = vmatpush.bf16.msra.mxu0 %v5768_v2  ;;  %v6767_v2 = vld [vmem:[%s7392_s1 + $0x964] sm:$0xf] }
 0x1cf   : > { %2539 = vmatpush.bf16.msra.mxu3 %v5455_v8  ;;  %v6809_v8 = vld [vmem:[%s7392_s1 + $0xaac] sm:$0xf0] }
 0x1d0   : > { %v6020_v11 = vor.u32 %v6809_v8, %v6019_v5  ;;  %v5864_v5 = vor.u32 %v6767_v2, %v5861_v3  ;;  %v6053_v8 = vld [vmem:[%s7392_s1 + $0xaf0] sm:$0xf0] }
 0x1d1   : > { %3389 = vmatpush.bf16.msra.mxu0 %v5752_v13  ;;  %v6763_v13 = vld [vmem:[%s7392_s1 + $0x944] sm:$0xf] }
 0x1d2   : > { %3362 = vmatpush.bf16.msrb.mxu2 %v6020_v11 }
 0x1d3   : > { %2540 = vmatpush.bf16.msra.mxu3 %v5439_v14  ;;  %v7995_v24 = vpop.f32.mrf.mxu0  ;;  %v5811_v14 = vld [vmem:[%s7392_s1 + $0x900] sm:$0xf] }
 0x1d4   : > { %v5812_v18 = vor.u32 %v6757_v15, %v5811_v14  ;;  %v5845_v14 = vld [vmem:[%s7392_s1 + $0x950] sm:$0xf0]  ;;  %v6811_v15 = vld [vmem:[%s7392_s1 + $0xac4] sm:$0xf] }
 0x1d5   : > { %3390 = vmatpush.bf16.msra.mxu0 %v5736_v23  ;;  %v5848_v17 = vor.u32 %v6763_v13, %v5845_v14  ;;  %v6759_v23 = vld [vmem:[%s7392_s1 + $0x924] sm:$0xf] }
 0x1d6   : > { %2541 = vmatmul.bf16.vlgmr.msra.gmra.mxu3 %v7923_v51  ;;  %v5891_v51 = vld [vmem:[%s7392_s1 + $0x9a0] sm:$0xf]  ;;  %3363 = vmatpush.bf16.msrb.mxu2 %v6004_v19  ;;  %v5832_v26 = vor.u32 %v6759_v23, %v5829_v43  ;;  %v6181_v23 = vld [vmem:[%s7392_s1 + $0xbf0] sm:$0xf0] }
 0x1d7   : > { %v5892_v34 = vor.u32 %v6777_v33, %v5891_v51  ;;  %v5720_v33 = vor.u32 %v6731_v28, %v5717_v29  ;;  %3373 = vmatpush.bf16.msrb.mxu3 %v6180_v4  ;;  %v6131_v29 = vld [vmem:[%s7392_s1 + $0xb80] sm:$0xf]  ;;  %v6791_v4 = vld [vmem:[%s7392_s1 + $0xa24] sm:$0xf] }
 0x1d9   : > { %3349 = vmatpush.bf16.msrb.mxu1 %v5892_v34  ;;  %3391 = vmatpush.bf16.msra.mxu0 %v5720_v33 }
 0x1da   : > { %3364 = vmatpush.bf16.msrb.mxu2 %v5988_v27  ;;  %v8088_v27 = vld [vmem:[%s7390_s12 + $0x2] ss:$8 sm:$0xf] }
 0x1db   : > { %v2349_v6 = vpop.f32.mrf.mxu0 }
 0x1dc   : > { %v5909_v6 = vld [vmem:[%s7392_s1 + $0x9d0] sm:$0xf0] }
 0x1dd   : > { %3350 = vmatpush.bf16.msrb.mxu1 %v5876_v41  ;;  %v5912_v34 = vor.u32 %v6779_v30, %v5909_v6  ;;  %v5893_v41 = vld [vmem:[%s7392_s1 + $0x9b0] sm:$0xf0]  ;;  %3392 = vmatpush.bf16.msra.mxu0 %v5704_v40  ;;  %v6837_v30 = vld [vmem:[%s7392_s1 + $0xb8c] sm:$0xf0]  ;;  %v1690_v40 = vperm.slane %v8088_v27, 0 }
 0x1de   : > { %v5896_v42 = vor.u32 %v6775_v37, %v5893_v41  ;;  %3365 = vmatpush.bf16.msrb.mxu2 %v5972_v36  ;;  %v6132_v6 = vor.u32 %v6837_v30, %v6131_v29  ;;  %v6008_v37 = vor.u32 %v6803_v12, %v6005_v39  ;;  %v6115_v41 = vld [vmem:[%s7392_s1 + $0xb60] sm:$0xf]  ;;  %v6746_v29 = vld [vmem:[%s7392_s1 + $0x8b4] sm:$0xf0]  ;;  %v6843_v30 = vld [vmem:[%s7392_s1 + $0xbc4] sm:$0xf] }
 0x1df   : > { %v2348_v52 = vadd.f32 %v7995_v24, %v1690_v40  ;;  %v6083_v24 = vld [vmem:[%s7392_s1 + $0xb20] sm:$0xf]  ;;  %v5755_v39 = vld [vmem:[%s7392_s1 + $0x888] sm:$0xf]  ;;  %v6742_v40 = vld [vmem:[%s7392_s1 + $0x894] sm:$0xf0] }
 0x1e0   : > { %v6084_v3 = vor.u32 %v6825_v1, %v6083_v24  ;;  %v6734_v24 = vld [vmem:[%s7392_s1 + $0x854] sm:$0xf0]  ;;  %v5915_v1 = vld [vmem:[%s7392_s1 + $0x9c8] sm:$0xf] }
 0x1e1   : > { %3351 = vmatpush.bf16.msrb.mxu1 %v5860_v47  ;;  %v5956_v47 = vor.u32 %v6793_v45, %v5955_v44  ;;  %3393 = vmatpush.bf16.msra.mxu0 %v5688_v58  ;;  %v6799_v45 = vld [vmem:[%s7392_s1 + $0xa64] sm:$0xf] }
 0x1e3   : > { %v8017_v53 = vpop.f32.mrf.mxu1  ;;  %v8019_v54 = vpop.f32.mrf.mxu0  ;;  %3366 = vmatpush.bf16.msrb.mxu2 %v5956_v47  ;;  %v5989_v47 = vld [vmem:[%s7392_s1 + $0xa70] sm:$0xf0] }
 0x1e4   : > { %v5992_v49 = vor.u32 %v6799_v45, %v5989_v47  ;;  %v5756_v47 = vor.u32 %v6742_v40, %v5755_v39 }
 0x1e5   : > { %3352 = vmatpush.bf16.msrb.mxu1 %v5844_v62  ;;  %v5939_v62 = vld [vmem:[%s7392_s1 + $0xa00] sm:$0xf] }
 0x1e6   : > { %v5940_v0 = vor.u32 %v6789_v63, %v5939_v62  ;;  %v5973_v62 = vld [vmem:[%s7392_s1 + $0xa50] sm:$0xf0]  ;;  %v2361_v63 = vadd.f32 %v8017_v53, %v2348_v52  ;;  %v6754_v53 = vld [vmem:[%s7392_s1 + $0x8f4] sm:$0xf0] }
 0x1e7   : > { %v6738_v52 = vld [vmem:[%s7392_s1 + $0x874] sm:$0xf0] }
 0x1e8   : > { %3367 = vmatpush.bf16.msrb.mxu2 %v5940_v0 }
 0x1e9   : > { %3353 = vmatpush.bf16.msrb.mxu1 %v5828_v7  ;;  %v6815_v7 = vld [vmem:[%s7392_s1 + $0xae4] sm:$0xf] }
 0x1ea   : > { %v6056_v9 = vor.u32 %v6815_v7, %v6053_v8  ;;  %v5803_v8 = vld [vmem:[%s7392_s1 + $0x8e8] sm:$0xf] }
 0x1eb   : > { %v2362_v10 = vpop.f32.mrf.mxu1  ;;  %v2401_v60 = vpop.f32.mrf.mxu0  ;;  %v5804_v13 = vor.u32 %v6754_v53, %v5803_v8  ;;  %v1692_v8 = vperm.slane %v8088_v27, 2 }
 0x1ec   : > { %v6845_v10 = vld [vmem:[%s7392_s1 + $0xbcc] sm:$0xf0]  ;;  %3412 = vmatpush.bf16.msra.mxu2 %v6056_v9 }
 0x1ed   : > { %3354 = vmatpush.bf16.msrb.mxu1 %v5812_v18  ;;  %v6164_v11 = vor.u32 %v6845_v10, %v6163_v56  ;;  %v6037_v18 = vld [vmem:[%s7392_s1 + $0xad0] sm:$0xf0]  ;;  %v6067_v10 = vld [vmem:[%s7392_s1 + $0xb00] sm:$0xf] }
 0x1ee   : > { %v6040_v19 = vor.u32 %v6811_v15, %v6037_v18  ;;  %v6787_v15 = vld [vmem:[%s7392_s1 + $0xa04] sm:$0xf] }
 0x1ef   : > { %3374 = vmatpush.bf16.msrb.mxu3 %v6164_v11  ;;  %v6847_v18 = vld [vmem:[%s7392_s1 + $0xbe4] sm:$0xf] }
 0x1f0   : > { %3413 = vmatpush.bf16.msra.mxu2 %v6040_v19  ;;  %v6184_v43 = vor.u32 %v6847_v18, %v6181_v23  ;;  %v6726_v23 = vld [vmem:[%s7392_s1 + $0x814] sm:$0xf0] }
 0x1f1   : > { %3399 = vmatpush.bf16.msra.mxu1 %v5928_v25  ;;  %v6807_v25 = vld [vmem:[%s7392_s1 + $0xaa4] sm:$0xf] }
 0x1f2   : > { %v6024_v28 = vor.u32 %v6807_v25, %v6021_v48  ;;  %v1691_v25 = vperm.slane %v8088_v27, 1  ;;  %v5788_v48 = vor.u32 %v6750_v21, %v5787_v20 }
 0x1f3   : > { %v8046_v51 = vpop.f32.mrf.mxu1  ;;  %v8048_v31 = vpop.f32.mrf.mxu0  ;;  %3375 = vmatpush.bf16.msrb.mxu3 %v6148_v22 }
 0x1f4   : > { %3414 = vmatpush.bf16.msra.mxu2 %v6024_v28  ;;  %v5771_v28 = vld [vmem:[%s7392_s1 + $0x8a8] sm:$0xf]  ;;  %v2452_v18 = vadd.f32 %v8048_v31, %v1692_v8  ;;  %v6810_v8 = vld [vmem:[%s7392_s1 + $0xab4] sm:$0xf0] }
 0x1f5   : > { %3400 = vmatpush.bf16.msra.mxu1 %v5912_v34  ;;  %v6755_v34 = vld [vmem:[%s7392_s1 + $0x904] sm:$0xf] }
 0x1f6   : > { %v5816_v38 = vor.u32 %v6755_v34, %v5813_v35  ;;  %v2400_v35 = vadd.f32 %v8019_v54, %v1691_v25 }
 0x1f7   : > { %3376 = vmatpush.bf16.msrb.mxu3 %v6132_v6  ;;  %v6165_v6 = vld [vmem:[%s7392_s1 + $0xbd0] sm:$0xf0] }
 0x1f8   : > { %3415 = vmatpush.bf16.msra.mxu2 %v6008_v37  ;;  %v6168_v34 = vor.u32 %v6843_v30, %v6165_v6  ;;  %v2413_v37 = vadd.f32 %v8046_v51, %v2400_v35  ;;  %v5805_v30 = vld [vmem:[%s7392_s1 + $0x8f8] sm:$0xf0] }
 0x1f9   : > { %3401 = vmatpush.bf16.msra.mxu1 %v5896_v42  ;;  %v6833_v42 = vld [vmem:[%s7392_s1 + $0xb6c] sm:$0xf0] }
 0x1fa   : > { %v8059_v46 = vpop.f32.mrf.mxu2  ;;  %v6116_v44 = vor.u32 %v6833_v42, %v6115_v41  ;;  %v6839_v41 = vld [vmem:[%s7392_s1 + $0xba4] sm:$0xf]  ;;  %v6149_v42 = vld [vmem:[%s7392_s1 + $0xbb0] sm:$0xf0] }
 0x1fb   : > { %v2414_v55 = vpop.f32.mrf.mxu1  ;;  %v2453_v57 = vpop.f32.mrf.mxu0  ;;  %v2374_v0 = vadd.f32 %v8059_v46, %v2361_v63 }
 0x1fc   : > { %3377 = vmatpush.bf16.msrb.mxu3 %v6116_v44  ;;  %v6099_v55 = vld [vmem:[%s7392_s1 + $0xb40] sm:$0xf]  ;;  %v6829_v57 = vld [vmem:[%s7392_s1 + $0xb4c] sm:$0xf0]  ;;  %3416 = vmatpush.bf16.msra.mxu2 %v5992_v49  ;;  %v6152_v44 = vor.u32 %v6839_v41, %v6149_v42  ;;  %v5739_v49 = vld [vmem:[%s7392_s1 + $0x868] sm:$0xf] }
 0x1fd   : > { %3402 = vmatpush.bf16.msra.mxu1 %v5880_v61  ;;  %v6100_v59 = vor.u32 %v6829_v57, %v6099_v55  ;;  %v6795_v61 = vld [vmem:[%s7392_s1 + $0xa44] sm:$0xf]  ;;  %v5931_v55 = vld [vmem:[%s7392_s1 + $0x9e8] sm:$0xf]  ;;  %v6786_v57 = vld [vmem:[%s7392_s1 + $0x9f4] sm:$0xf0]  ;;  %v5740_v63 = vor.u32 %v6738_v52, %v5739_v49 }
 0x1fe   : > { %v5976_v32 = vor.u32 %v6795_v61, %v5973_v62  ;;  %v6059_v41 = vld [vmem:[%s7392_s1 + $0xae8] sm:$0xf]  ;;  %v6819_v42 = vld [vmem:[%s7392_s1 + $0xb04] sm:$0xf] }
 0x200   : > { %3378 = vmatpush.bf16.msrb.mxu3 %v6100_v59  ;;  %3417 = vmatpush.bf16.msra.mxu2 %v5976_v32  ;;  %v6133_v59 = vld [vmem:[%s7392_s1 + $0xb90] sm:$0xf0]  ;;  %v5932_v32 = vor.u32 %v6786_v57, %v5931_v55 }
 0x201   : > { %3403 = vmatpush.bf16.msra.mxu1 %v5864_v5  ;;  %v5957_v5 = vld [vmem:[%s7392_s1 + $0xa30] sm:$0xf0] }
 0x202   : > { %v2375_v60 = vpop.f32.mrf.mxu2  ;;  %v5960_v9 = vor.u32 %v6791_v4, %v5957_v5  ;;  %v6831_v4 = vld [vmem:[%s7392_s1 + $0xb64] sm:$0xf]  ;;  %v6117_v5 = vld [vmem:[%s7392_s1 + $0xb70] sm:$0xf0] }
 0x203   : > { %v6821_v60 = vld [vmem:[%s7392_s1 + $0xb0c] sm:$0xf0] }
 0x204   : > { %v8078_v16 = vpop.f32.mrf.mxu1  ;;  %3379 = vmatpush.bf16.msrb.mxu3 %v6084_v3  ;;  %3418 = vmatpush.bf16.msra.mxu2 %v5960_v9  ;;  %v6068_v14 = vor.u32 %v6821_v60, %v6067_v10  ;;  %v6782_v3 = vld [vmem:[%s7392_s1 + $0x9d4] sm:$0xf0]  ;;  %v5899_v60 = vld [vmem:[%s7392_s1 + $0x9a8] sm:$0xf] }
 0x205   : > { %3404 = vmatpush.bf16.msra.mxu1 %v5848_v17  ;;  %v5941_v17 = vld [vmem:[%s7392_s1 + $0xa10] sm:$0xf0]  ;;  %v6730_v10 = vld [vmem:[%s7392_s1 + $0x834] sm:$0xf0]  ;;  %v2465_v25 = vadd.f32 %v8078_v16, %v2452_v18  ;;  %v5741_v18 = vld [vmem:[%s7392_s1 + $0x878] sm:$0xf0] }
 0x206   : > { %v5944_v22 = vor.u32 %v6787_v15, %v5941_v17  ;;  %v6101_v15 = vld [vmem:[%s7392_s1 + $0xb50] sm:$0xf0] }
 0x208   : > { %3380 = vmatpush.bf16.msrb.mxu3 %v6068_v14  ;;  %3419 = vmatpush.bf16.msra.mxu2 %v5944_v22  ;;  %v6827_v14 = vld [vmem:[%s7392_s1 + $0xb44] sm:$0xf]  ;;  %v5691_v22 = vld [vmem:[%s7392_s1 + $0x808] sm:$0xf] }
 0x209   : > { %3405 = vmatpush.bf16.msra.mxu1 %v5832_v26  ;;  %v6104_v17 = vor.u32 %v6827_v14, %v6101_v15  ;;  %v5692_v35 = vor.u32 %v6726_v23, %v5691_v22  ;;  %v6011_v14 = vld [vmem:[%s7392_s1 + $0xa88] sm:$0xf]  ;;  %v6806_v15 = vld [vmem:[%s7392_s1 + $0xa94] sm:$0xf0] }
 0x20a   : > { %v6012_v23 = vor.u32 %v6806_v15, %v6011_v14  ;;  %v6812_v14 = vld [vmem:[%s7392_s1 + $0xacc] sm:$0xf]  ;;  %v6045_v15 = vld [vmem:[%s7392_s1 + $0xad8] sm:$0xf0] }
 0x20b   : > { %v8092_v33 = vpop.f32.mrf.mxu2 }
 0x20c   : > { %v2466_v36 = vpop.f32.mrf.mxu1  ;;  %3425 = vmatpush.bf16.msra.mxu3 %v6184_v43  ;;  %v2426_v54 = vadd.f32 %v8092_v33, %v2413_v37  ;;  %v5883_v43 = vld [vmem:[%s7392_s1 + $0x988] sm:$0xf] }
 0x20d   : > { %3406 = vmatpush.bf16.msra.mxu1 %v5816_v38  ;;  %v5772_v38 = vor.u32 %v6746_v29, %v5771_v28  ;;  %v6085_v28 = vld [vmem:[%s7392_s1 + $0xb30] sm:$0xf0]  ;;  %v6752_v29 = vld [vmem:[%s7392_s1 + $0x8ec] sm:$0xf] }
 0x20e   : > { %v5808_v40 = vor.u32 %v6752_v29, %v5805_v30  ;;  %v5725_v29 = vld [vmem:[%s7392_s1 + $0x858] sm:$0xf0]  ;;  %v6780_v30 = vld [vmem:[%s7392_s1 + $0x9cc] sm:$0xf] }
 0x210   : > { %3426 = vmatpush.bf16.msra.mxu3 %v6168_v34 }
 0x213   : > { %v8103_v50 = vpop.f32.mrf.mxu0  ;;  %v2427_v58 = vpop.f32.mrf.mxu2 }
 0x214   : > { %3427 = vmatpush.bf16.msra.mxu3 %v6152_v44  ;;  %v6835_v58 = vld [vmem:[%s7392_s1 + $0xb84] sm:$0xf]  ;;  %v6818_v44 = vld [vmem:[%s7392_s1 + $0xaf4] sm:$0xf0] }
 0x215   : > { %v6136_v61 = vor.u32 %v6835_v58, %v6133_v59  ;;  %v5851_v58 = vld [vmem:[%s7392_s1 + $0x948] sm:$0xf]  ;;  %v6766_v59 = vld [vmem:[%s7392_s1 + $0x954] sm:$0xf0] }
 0x218   : > { %3428 = vmatpush.bf16.msra.mxu3 %v6136_v61  ;;  %v6043_v61 = vld [vmem:[%s7392_s1 + $0xac8] sm:$0xf] }
 0x219   : > { %v2386_v2 = vpop.f32.mrf.mxu3 }
 0x21a   : > { %v2387_v7 = vadd.f32 %v2386_v2, %v2374_v0  ;;  %v5723_v0 = vld [vmem:[%s7392_s1 + $0x848] sm:$0xf] }
 0x21b   : > { %v2505_v46 = vpop.f32.mrf.mxu0  ;;  %v8120_v11 = vpop.f32.mrf.mxu2  ;;  %v5724_v9 = vor.u32 %v6734_v24, %v5723_v0  ;;  %v5852_v0 = vor.u32 %v6766_v59, %v5851_v58 }
 0x21c   : > { %v2546_v56 = vmax.f32 %v2387_v7, 0.0  ;;  %v6120_v7 = vor.u32 %v6831_v4, %v6117_v5  ;;  %v5916_v46 = vor.u32 %v6782_v3, %v5915_v1  ;;  %v2478_v6 = vadd.f32 %v8120_v11, %v2465_v25  ;;  %v6069_v11 = vld [vmem:[%s7392_s1 + $0xb10] sm:$0xf0]  ;;  %v5835_v4 = vld [vmem:[%s7392_s1 + $0x928] sm:$0xf] }
 0x21d   : > { %v6762_v5 = vld [vmem:[%s7392_s1 + $0x934] sm:$0xf0]  ;;  %v5995_v25 = vld [vmem:[%s7392_s1 + $0xa68] sm:$0xf] }
 0x21e   : > { %v8125_v19 = vpack.c.bf16 %v2546_v56, %v2546_v56  ;;  %v5707_v56 = vld [vmem:[%s7392_s1 + $0x828] sm:$0xf]  ;;  %3429 = vmatpush.bf16.msra.mxu3 %v6120_v7 }
 0x21f   : > { %v5708_v20 = vor.u32 %v6730_v10, %v5707_v56  ;;  %v6027_v7 = vld [vmem:[%s7392_s1 + $0xaa8] sm:$0xf] }
 0x220   : > { %3342 = vmatmul.bf16.vlgmr.msrb.gmra.mxu0 %v8125_v19  ;;  %v6028_v56 = vor.u32 %v6810_v8, %v6027_v7 }
 0x221   : > { %3438 = vmatpush.bf16.msrb.mxu0 %v5804_v13  ;;  %v2388_v26 = vpop.f32.mrf.mxu3  ;;  %v6778_v13 = vld [vmem:[%s7392_s1 + $0x9b4] sm:$0xf0] }
 0x222   : > { %v5900_v21 = vor.u32 %v6778_v13, %v5899_v60  ;;  %v6774_v26 = vld [vmem:[%s7392_s1 + $0x994] sm:$0xf0]  ;;  %3430 = vmatpush.bf16.msra.mxu3 %v6104_v17  ;;  %v5819_v60 = vld [vmem:[%s7392_s1 + $0x908] sm:$0xf]  ;;  %v6736_v17 = vld [vmem:[%s7392_s1 + $0x86c] sm:$0xf] }
 0x223   : > { %v2479_v36 = vpop.f32.mrf.mxu2  ;;  %v5884_v16 = vor.u32 %v6774_v26, %v5883_v43  ;;  %v6758_v13 = vld [vmem:[%s7392_s1 + $0x914] sm:$0xf0]  ;;  %v5744_v43 = vor.u32 %v6736_v17, %v5741_v18 }
 0x224   : > { %v8137_v12 = vpop.f32.mrf.mxu1  ;;  %v5867_v36 = vld [vmem:[%s7392_s1 + $0x968] sm:$0xf]  ;;  %v5820_v22 = vor.u32 %v6758_v13, %v5819_v60  ;;  %v6764_v60 = vld [vmem:[%s7392_s1 + $0x94c] sm:$0xf]  ;;  %v5853_v13 = vld [vmem:[%s7392_s1 + $0x958] sm:$0xf0] }
 0x225   : > { %3439 = vmatpush.bf16.msrb.mxu0 %v5788_v48  ;;  %v6823_v48 = vld [vmem:[%s7392_s1 + $0xb24] sm:$0xf] }
 0x226   : > { %v6088_v31 = vor.u32 %v6823_v48, %v6085_v28  ;;  %v6802_v48 = vld [vmem:[%s7392_s1 + $0xa74] sm:$0xf0]  ;;  %v6732_v28 = vld [vmem:[%s7392_s1 + $0x84c] sm:$0xf] }
 0x228   : > { %3431 = vmatpush.bf16.msra.mxu3 %v6088_v31  ;;  %v5917_v31 = vld [vmem:[%s7392_s1 + $0x9d8] sm:$0xf0] }
 0x229   : > { %3440 = vmatpush.bf16.msrb.mxu0 %v5772_v38  ;;  %v2438_v45 = vpop.f32.mrf.mxu3  ;;  %v6770_v38 = vld [vmem:[%s7392_s1 + $0x974] sm:$0xf0] }
 0x22a   : > { %v2439_v51 = vadd.f32 %v2438_v45, %v2426_v54  ;;  %v6748_v54 = vld [vmem:[%s7392_s1 + $0x8cc] sm:$0xf]  ;;  %v5789_v45 = vld [vmem:[%s7392_s1 + $0x8d8] sm:$0xf0]  ;;  %v5868_v52 = vor.u32 %v6770_v38, %v5867_v36  ;;  %v5920_v36 = vor.u32 %v6780_v30, %v5917_v31  ;;  %v6798_v38 = vld [vmem:[%s7392_s1 + $0xa54] sm:$0xf0] }
 0x22b   : > { %v5792_v57 = vor.u32 %v6748_v54, %v5789_v45  ;;  %v5963_v54 = vld [vmem:[%s7392_s1 + $0xa28] sm:$0xf]  ;;  %v6838_v31 = vld [vmem:[%s7392_s1 + $0xb94] sm:$0xf0] }
 0x22c   : > { %v2547_v62 = vmax.f32 %v2439_v51, 0.0  ;;  %v2518_v33 = vpop.f32.mrf.mxu1  ;;  %v6060_v51 = vor.u32 %v6818_v44, %v6059_v41  ;;  %v5901_v41 = vld [vmem:[%s7392_s1 + $0x9b8] sm:$0xf0]  ;;  %v6139_v30 = vld [vmem:[%s7392_s1 + $0xb88] sm:$0xf] }
 0x22d   : > { %3441 = vmatpush.bf16.msrb.mxu0 %v5756_v47  ;;  %v6072_v47 = vor.u32 %v6819_v42, %v6069_v11  ;;  %v6744_v33 = vld [vmem:[%s7392_s1 + $0x8ac] sm:$0xf] }
 0x22e   : > { %v8154_v2 = vpack.c.bf16 %v2547_v62, %v2547_v62  ;;  %v6814_v62 = vld [vmem:[%s7392_s1 + $0xad4] sm:$0xf0] }
 0x22f   : > { %3432 = vmatpush.bf16.msra.mxu3 %v6072_v47  ;;  %v6044_v1 = vor.u32 %v6814_v62, %v6043_v61  ;;  %v5947_v62 = vld [vmem:[%s7392_s1 + $0xa08] sm:$0xf] }
 0x230   : > { %3355 = vmatmul.bf16.vlgmr.msrb.gmra.mxu1 %v8154_v2  ;;  %3394 = vmatmul.bf16.vlgmr.msra.gmra.mxu0 %v8125_v19 }
 0x231   : > { %3442 = vmatpush.bf16.msrb.mxu0 %v5740_v63  ;;  %3451 = vmatpush.bf16.msrb.mxu1 %v5932_v32  ;;  %v2440_v53 = vpop.f32.mrf.mxu3  ;;  %v5773_v63 = vld [vmem:[%s7392_s1 + $0x8b8] sm:$0xf0] }
 0x232   : > { %v5776_v3 = vor.u32 %v6744_v33, %v5773_v63  ;;  %v6740_v53 = vld [vmem:[%s7392_s1 + $0x88c] sm:$0xf]  ;;  %v6790_v33 = vld [vmem:[%s7392_s1 + $0xa14] sm:$0xf0] }
 0x233   : > { %v5948_v7 = vor.u32 %v6790_v33, %v5947_v62  ;;  %v6075_v62 = vld [vmem:[%s7392_s1 + $0xb08] sm:$0xf]  ;;  %v6822_v33 = vld [vmem:[%s7392_s1 + $0xb14] sm:$0xf0] }
 0x235   : > { %3443 = vmatpush.bf16.msrb.mxu0 %v5724_v9  ;;  %3452 = vmatpush.bf16.msrb.mxu1 %v5916_v46  ;;  %v5757_v9 = vld [vmem:[%s7392_s1 + $0x898] sm:$0xf0]  ;;  %v5836_v46 = vor.u32 %v6762_v5, %v5835_v4 }
 0x236   : > { %v5760_v10 = vor.u32 %v6740_v53, %v5757_v9  ;;  %v6061_v4 = vld [vmem:[%s7392_s1 + $0xaf8] sm:$0xf0] }
 0x239   : > { %3444 = vmatpush.bf16.msrb.mxu0 %v5708_v20  ;;  %3453 = vmatpush.bf16.msrb.mxu1 %v5900_v21  ;;  %v2490_v34 = vpop.f32.mrf.mxu3  ;;  %v6784_v20 = vld [vmem:[%s7392_s1 + $0x9ec] sm:$0xf]  ;;  %v5933_v21 = vld [vmem:[%s7392_s1 + $0x9f8] sm:$0xf0] }
 0x23a   : > { %v2491_v39 = vadd.f32 %v2490_v34, %v2478_v6  ;;  %v5936_v26 = vor.u32 %v6784_v20, %v5933_v21  ;;  %v1693_v6 = vperm.slane %v8088_v27, 3  ;;  %v5996_v34 = vor.u32 %v6802_v48, %v5995_v25  ;;  %v6776_v27 = vld [vmem:[%s7392_s1 + $0x9ac] sm:$0xf]  ;;  %v5837_v25 = vld [vmem:[%s7392_s1 + $0x938] sm:$0xf0] }
 0x23b   : > { %v8181_v37 = vpop.f32.mrf.mxu2  ;;  %v5904_v47 = vor.u32 %v6776_v27, %v5901_v41  ;;  %v5856_v20 = vor.u32 %v6764_v60, %v5853_v13  ;;  %v6048_v21 = vor.u32 %v6812_v14, %v6045_v15  ;;  %v6834_v27 = vld [vmem:[%s7392_s1 + $0xb74] sm:$0xf0]  ;;  %v6800_v41 = vld [vmem:[%s7392_s1 + $0xa6c] sm:$0xf]  ;;  %v6125_v13 = vld [vmem:[%s7392_s1 + $0xb78] sm:$0xf0] }
 0x23c   : > { %v2548_v49 = vmax.f32 %v2491_v39, 0.0  ;;  %v6728_v39 = vld [vmem:[%s7392_s1 + $0x82c] sm:$0xf]  ;;  %v2504_v42 = vadd.f32 %v8103_v50, %v1693_v6  ;;  %v5885_v50 = vld [vmem:[%s7392_s1 + $0x998] sm:$0xf0] }
 0x23d   : > { %3445 = vmatpush.bf16.msrb.mxu0 %v5692_v35  ;;  %3454 = vmatpush.bf16.msrb.mxu1 %v5884_v16  ;;  %v5728_v35 = vor.u32 %v6732_v28, %v5725_v29  ;;  %v5979_v16 = vld [vmem:[%s7392_s1 + $0xa48] sm:$0xf]  ;;  %v6756_v6 = vld [vmem:[%s7392_s1 + $0x90c] sm:$0xf] }
 0x23e   : > { %v8189_v55 = vpack.c.bf16 %v2548_v49, %v2548_v49  ;;  %v5980_v11 = vor.u32 %v6798_v38, %v5979_v16  ;;  %v2517_v45 = vadd.f32 %v8137_v12, %v2504_v42  ;;  %v6794_v49 = vld [vmem:[%s7392_s1 + $0xa34] sm:$0xf0]  ;;  %v6013_v16 = vld [vmem:[%s7392_s1 + $0xa98] sm:$0xf0]  ;;  %v6832_v60 = vld [vmem:[%s7392_s1 + $0xb6c] sm:$0xf] }
 0x23f   : > { %v5964_v61 = vor.u32 %v6794_v49, %v5963_v54  ;;  %v5997_v42 = vld [vmem:[%s7392_s1 + $0xa78] sm:$0xf0]  ;;  %v6107_v54 = vld [vmem:[%s7392_s1 + $0xb48] sm:$0xf]  ;;  %v6128_v14 = vor.u32 %v6832_v60, %v6125_v13  ;;  %v6828_v15 = vld [vmem:[%s7392_s1 + $0xb4c] sm:$0xf] }
 0x240   : > { %3368 = vmatmul.bf16.vlgmr.msrb.gmra.mxu2 %v8189_v55  ;;  %3407 = vmatmul.bf16.vlgmr.msra.gmra.mxu1 %v8154_v2  ;;  %v2530_v58 = vadd.f32 %v8181_v37, %v2517_v45  ;;  %v6816_v37 = vld [vmem:[%s7392_s1 + $0xaec] sm:$0xf]  ;;  %v6830_v45 = vld [vmem:[%s7392_s1 + $0xb54] sm:$0xf0]  ;;  %v5981_v49 = vld [vmem:[%s7392_s1 + $0xa58] sm:$0xf0] }
 0x241   : > { %3490 = vmatpush.bf16.msra.mxu0 %v5808_v40  ;;  %3455 = vmatpush.bf16.msrb.mxu1 %v5868_v52  ;;  %v2492_v32 = vpop.f32.mrf.mxu3  ;;  %v5709_v40 = vld [vmem:[%s7392_s1 + $0x838] sm:$0xf0]  ;;  %v6724_v52 = vld [vmem:[%s7392_s1 + $0x80c] sm:$0xf]  ;;  %v6882_v60 = vld [vmem:[%s7380_s24 + $0xf8] sm:$0xff] }
 0x242   : > { %3446 = vmatmul.bf16.vlgmr.msrb.gmra.mxu0 %v8125_v19  ;;  %3464 = vmatpush.bf16.msrb.mxu2 %v6060_v51  ;;  %v5712_v44 = vor.u32 %v6728_v39, %v5709_v40  ;;  %v5693_v51 = vld [vmem:[%s7392_s1 + $0x818] sm:$0xf0]  ;;  %v6123_v40 = vld [vmem:[%s7392_s1 + $0xb68] sm:$0xf] }
 0x243   : > { %v2531_v24 = vpop.f32.mrf.mxu2  ;;  %v5696_v12 = vor.u32 %v6724_v52, %v5693_v51  ;;  %v6108_v52 = vor.u32 %v6830_v45, %v6107_v54  ;;  %v6861_v54 = vld [vmem:[%s7380_s24 + $0x50] sm:$0xff] }
 0x244   : > { %v6850_v24 = vld [vmem:[%s7392_s1 + $0xbf4] sm:$0xf0]  ;;  %v6873_v45 = vld [vmem:[%s7380_s24 + $0xb0] sm:$0xff] }
 0x245   : > { %3491 = vmatpush.bf16.msra.mxu0 %v5792_v57  ;;  %3456 = vmatpush.bf16.msrb.mxu1 %v5852_v0  ;;  %v6772_v57 = vld [vmem:[%s7392_s1 + $0x98c] sm:$0xf]  ;;  %v6187_v0 = vld [vmem:[%s7392_s1 + $0xbe8] sm:$0xf] }
 0x246   : > { %3465 = vmatpush.bf16.msrb.mxu2 %v6044_v1  ;;  %v5888_v32 = vor.u32 %v6772_v57, %v5885_v50  ;;  %v6768_v1 = vld [vmem:[%s7392_s1 + $0x96c] sm:$0xf]  ;;  %v6188_v8 = vor.u32 %v6850_v24, %v6187_v0  ;;  %v6091_v57 = vld [vmem:[%s7392_s1 + $0xb28] sm:$0xf]  ;;  %v6826_v50 = vld [vmem:[%s7392_s1 + $0xb34] sm:$0xf0]  ;;  %v6076_v24 = vor.u32 %v6822_v33, %v6075_v62 }
 0x247   : > { %v6189_v0 = vld [vmem:[%s7392_s1 + $0xbf8] sm:$0xf0]  ;;  %v6886_v33 = vld [vmem:[%s7385_s20 + $0x18] sm:$0xff] }
 0x248   : > { %v6871_v62 = vld [vmem:[%s7380_s24 + $0xa0] sm:$0xff] }
 0x249   : > { %3492 = vmatpush.bf16.msra.mxu0 %v5776_v3  ;;  %3457 = vmatpush.bf16.msrb.mxu1 %v5836_v46  ;;  %v5869_v3 = vld [vmem:[%s7392_s1 + $0x978] sm:$0xf0]  ;;  %v6064_v46 = vor.u32 %v6816_v37, %v6061_v4  ;;  %v6844_v37 = vld [vmem:[%s7392_s1 + $0xbcc] sm:$0xf] }
 0x24a   : > { %3466 = vmatpush.bf16.msrb.mxu2 %v6028_v56  ;;  %v5872_v9 = vor.u32 %v6768_v1, %v5869_v3  ;;  %v6171_v56 = vld [vmem:[%s7392_s1 + $0xbc8] sm:$0xf]  ;;  %v6173_v4 = vld [vmem:[%s7392_s1 + $0xbd8] sm:$0xf0] }
 0x24d   : > { %3493 = vmatpush.bf16.msra.mxu0 %v5760_v10  ;;  %3458 = vmatpush.bf16.msrb.mxu1 %v5820_v22  ;;  %v6846_v10 = vld [vmem:[%s7392_s1 + $0xbd4] sm:$0xf0]  ;;  %v6155_v22 = vld [vmem:[%s7392_s1 + $0xba8] sm:$0xf] }
 0x24e   : > { %3467 = vmatpush.bf16.msrb.mxu2 %v6012_v23  ;;  %v6172_v18 = vor.u32 %v6846_v10, %v6171_v56  ;;  %v6842_v23 = vld [vmem:[%s7392_s1 + $0xbb4] sm:$0xf0]  ;;  %v6141_v56 = vld [vmem:[%s7392_s1 + $0xb98] sm:$0xf0] }
 0x24f   : > { %v6156_v48 = vor.u32 %v6842_v23, %v6155_v22  ;;  %v6820_v22 = vld [vmem:[%s7392_s1 + $0xb0c] sm:$0xf]  ;;  %v6077_v23 = vld [vmem:[%s7392_s1 + $0xb18] sm:$0xf0] }
 0x250   : > { %3420 = vmatmul.bf16.vlgmr.msra.gmra.mxu2 %v8189_v55  ;;  %3459 = vmatmul.bf16.vlgmr.msrb.gmra.mxu1 %v8154_v2 }
 0x251   : > { %3494 = vmatpush.bf16.msra.mxu0 %v5744_v43  ;;  %3503 = vmatpush.bf16.msra.mxu1 %v5936_v26  ;;  %v6760_v43 = vld [vmem:[%s7392_s1 + $0x92c] sm:$0xf] }
 0x252   : > { %3468 = vmatpush.bf16.msrb.mxu2 %v5996_v34  ;;  %v6808_v26 = vld [vmem:[%s7392_s1 + $0xaac] sm:$0xf]  ;;  %v5840_v28 = vor.u32 %v6760_v43, %v5837_v25  ;;  %v5821_v34 = vld [vmem:[%s7392_s1 + $0x918] sm:$0xf0]  ;;  %v6080_v43 = vor.u32 %v6820_v22, %v6077_v23  ;;  %v6858_v25 = vld [vmem:[%s7380_s24 + $0x38] sm:$0xff] }
 0x253   : > { %v5824_v38 = vor.u32 %v6756_v6, %v5821_v34  ;;  %v6853_v34 = vld [vmem:[%s7380_s24 + $0x10] sm:$0xff]  ;;  %v6880_v23 = vld [vmem:[%s7380_s24 + $0xe8] sm:$0xff] }
 0x255   : > { %3495 = vmatpush.bf16.msra.mxu0 %v5728_v35  ;;  %3504 = vmatpush.bf16.msra.mxu1 %v5920_v36  ;;  %v6804_v35 = vld [vmem:[%s7392_s1 + $0xa8c] sm:$0xf]  ;;  %v6140_v36 = vor.u32 %v6838_v31, %v6139_v30  ;;  %v6866_v30 = vld [vmem:[%s7380_s24 + $0x78] sm:$0xff] }
 0x256   : > { %3469 = vmatpush.bf16.msrb.mxu2 %v5980_v11  ;;  %v6016_v39 = vor.u32 %v6804_v35, %v6013_v16  ;;  %v6124_v11 = vor.u32 %v6834_v27, %v6123_v40  ;;  %v6854_v31 = vld [vmem:[%s7380_s24 + $0x18] sm:$0xff]  ;;  %v6865_v35 = vld [vmem:[%s7380_s24 + $0x70] sm:$0xff]  ;;  %v6852_v16 = vld [vmem:[%s7380_s24 + $0x8] sm:$0xff] }
 0x257   : > { %v6851_v40 = vld [vmem:[%s7380_s24] sm:$0xff] }
 0x258   : > { %v6863_v27 = vld [vmem:[%s7380_s24 + $0x60] sm:$0xff] }
 0x259   : > { %v2542_v59 = vpop.f32.mrf.mxu3  ;;  %3496 = vmatpush.bf16.msra.mxu0 %v5712_v44  ;;  %3505 = vmatpush.bf16.msra.mxu1 %v5904_v47  ;;  %v6000_v44 = vor.u32 %v6800_v41, %v5997_v42  ;;  %v6796_v47 = vld [vmem:[%s7392_s1 + $0xa4c] sm:$0xf]  ;;  %v6890_v41 = vld [vmem:[%s7385_s20 + $0x38] sm:$0xff] }
 0x25a   : > { %v2543_v63 = vadd.f32 %v2542_v59, %v2530_v58  ;;  %3470 = vmatpush.bf16.msrb.mxu2 %v5964_v61  ;;  %v5984_v51 = vor.u32 %v6796_v47, %v5981_v49  ;;  %v6792_v58 = vld [vmem:[%s7392_s1 + $0xa2c] sm:$0xf]  ;;  %v5965_v59 = vld [vmem:[%s7392_s1 + $0xa38] sm:$0xf0]  ;;  %v6092_v61 = vor.u32 %v6826_v50, %v6091_v57  ;;  %v6862_v42 = vld [vmem:[%s7380_s24 + $0x58] sm:$0xff] }
 0x25b   : > { %v6872_v57 = vld [vmem:[%s7380_s24 + $0xa8] sm:$0xff] }
 0x25c   : > { %v2549_v5 = vmax.f32 %v2543_v63, 0.0  ;;  %v6788_v63 = vld [vmem:[%s7392_s1 + $0xa0c] sm:$0xf] }
 0x25d   : > { %3497 = vmatpush.bf16.msra.mxu0 %v5696_v12  ;;  %3506 = vmatpush.bf16.msra.mxu1 %v5888_v32  ;;  %v5968_v12 = vor.u32 %v6792_v58, %v5965_v59  ;;  %v6848_v32 = vld [vmem:[%s7392_s1 + $0xbec] sm:$0xf]  ;;  %v6887_v58 = vld [vmem:[%s7385_s20 + $0x20] sm:$0xff] }
 0x25e   : > { %v8246_v53 = vpack.c.bf16 %v2549_v5, %v2549_v5  ;;  %3471 = vmatpush.bf16.msrb.mxu2 %v5948_v7  ;;  %v6192_v3 = vor.u32 %v6848_v32, %v6189_v0  ;;  %v6176_v5 = vor.u32 %v6844_v37, %v6173_v4  ;;  %v6840_v7 = vld [vmem:[%s7392_s1 + $0xbac] sm:$0xf]  ;;  %v6884_v37 = vld [vmem:[%s7385_s20 + $0x8] sm:$0xff] }
 0x25f   : > { %v6885_v0 = vld [vmem:[%s7385_s20 + $0x10] sm:$0xff]  ;;  %v6896_v4 = vld [vmem:[%s7385_s20 + $0x68] sm:$0xff] }
 0x260   : > { %3381 = vmatmul.bf16.vlgmr.msrb.gmra.mxu3 %v8246_v53  ;;  %3498 = vmatmul.bf16.vlgmr.msra.gmra.mxu0 %v8125_v19  ;;  %v6029_v19 = vld [vmem:[%s7392_s1 + $0xab8] sm:$0xf0] }
 0x261   : > { %3477 = vmatpush.bf16.msrb.mxu3 %v6188_v8  ;;  %v2544_v17 = vpop.f32.mrf.mxu3  ;;  %3507 = vmatpush.bf16.msra.mxu1 %v5872_v9  ;;  %v6032_v29 = vor.u32 %v6808_v26, %v6029_v19  ;;  %v6157_v8 = vld [vmem:[%s7392_s1 + $0xbb8] sm:$0xf0]  ;;  %v6857_v19 = vld [vmem:[%s7380_s24 + $0x30] sm:$0xff] }
 0x262   : > { %3516 = vmatpush.bf16.msra.mxu2 %v6064_v46  ;;  %v6160_v9 = vor.u32 %v6840_v7, %v6157_v8  ;;  %v6836_v46 = vld [vmem:[%s7392_s1 + $0xb8c] sm:$0xf]  ;;  %v6109_v17 = vld [vmem:[%s7392_s1 + $0xb58] sm:$0xf0]  ;;  %3807 = vmatpush.bf16.msrb.mxu0 %v6858_v25 }
 0x263   : > { %3472 = vmatmul.bf16.vlgmr.msrb.gmra.mxu2 %v8189_v55  ;;  %v6144_v10 = vor.u32 %v6836_v46, %v6141_v56  ;;  %v6883_v8 = vld [vmem:[%s7385_s20] sm:$0xff] }
 0x264   : > { %v8356_v46 = vld [vmem:[%s7390_s12 + $0x3] ss:$8 sm:$0xf] }
 0x265   : > { %3478 = vmatpush.bf16.msrb.mxu3 %v6172_v18  ;;  %3508 = vmatpush.bf16.msra.mxu1 %v5856_v20  ;;  %v6112_v18 = vor.u32 %v6828_v15, %v6109_v17  ;;  %v6093_v20 = vld [vmem:[%s7392_s1 + $0xb38] sm:$0xf0]  ;;  %v2686_v13 = vperm.slane %v8356_v46, 0  ;;  %v6906_v15 = vld [vmem:[%s7385_s20 + $0xb8] sm:$0xff]  ;;  %v6881_v17 = vld [vmem:[%s7380_s24 + $0xf0] sm:$0xff] }
 0x266   : > { %3517 = vmatpush.bf16.msra.mxu2 %v6048_v21  ;;  %3808 = vmatpush.bf16.msrb.mxu0 %v6857_v19  ;;  %v6892_v19 = vld [vmem:[%s7385_s20 + $0x48] sm:$0xff] }
 0x269   : > { %3479 = vmatpush.bf16.msrb.mxu3 %v6156_v48  ;;  %3509 = vmatpush.bf16.msra.mxu1 %v5840_v28  ;;  %v6856_v48 = vld [vmem:[%s7380_s24 + $0x28] sm:$0xff] }
 0x26a   : > { %3518 = vmatpush.bf16.msra.mxu2 %v6032_v29  ;;  %3809 = vmatpush.bf16.msrb.mxu0 %v6856_v48  ;;  %v6855_v29 = vld [vmem:[%s7380_s24 + $0x20] sm:$0xff]  ;;  %v6904_v48 = vld [vmem:[%s7385_s20 + $0xa8] sm:$0xff] }
 0x26d   : > { %3480 = vmatpush.bf16.msrb.mxu3 %v6140_v36  ;;  %3510 = vmatpush.bf16.msra.mxu1 %v5824_v38  ;;  %v6864_v36 = vld [vmem:[%s7380_s24 + $0x68] sm:$0xff] }
 0x26e   : > { %3519 = vmatpush.bf16.msra.mxu2 %v6016_v39  ;;  %3810 = vmatpush.bf16.msrb.mxu0 %v6855_v29 }
 0x270   : > { %3433 = vmatmul.bf16.vlgmr.msra.gmra.mxu3 %v8246_v53  ;;  %3511 = vmatmul.bf16.vlgmr.msra.gmra.mxu1 %v8154_v2  ;;  %v5949_v2 = vld [vmem:[%s7392_s1 + $0xa18] sm:$0xf0] }
 0x271   : > { %3481 = vmatpush.bf16.msrb.mxu3 %v6124_v11  ;;  %v5952_v1 = vor.u32 %v6788_v63, %v5949_v2  ;;  %3820 = vmatpush.bf16.msrb.mxu1 %v6866_v30  ;;  %v6874_v11 = vld [vmem:[%s7380_s24 + $0xb8] sm:$0xff]  ;;  %v6879_v30 = vld [vmem:[%s7380_s24 + $0xe0] sm:$0xff] }
 0x272   : > { %3520 = vmatpush.bf16.msra.mxu2 %v6000_v44  ;;  %3811 = vmatpush.bf16.msrb.mxu0 %v6854_v31  ;;  %v6889_v44 = vld [vmem:[%s7385_s20 + $0x30] sm:$0xff]  ;;  %v6898_v63 = vld [vmem:[%s7385_s20 + $0x78] sm:$0xff] }
 0x273   : > { %v6870_v2 = vld [vmem:[%s7380_s24 + $0x98] sm:$0xff] }
 0x275   : > { %3482 = vmatpush.bf16.msrb.mxu3 %v6108_v52  ;;  %3821 = vmatpush.bf16.msrb.mxu1 %v6865_v35  ;;  %v6888_v52 = vld [vmem:[%s7385_s20 + $0x28] sm:$0xff]  ;;  %v6903_v35 = vld [vmem:[%s7385_s20 + $0xa0] sm:$0xff] }
 0x276   : > { %3521 = vmatpush.bf16.msra.mxu2 %v5984_v51  ;;  %3812 = vmatpush.bf16.msrb.mxu0 %v6853_v34  ;;  %v6860_v51 = vld [vmem:[%s7380_s24 + $0x48] sm:$0xff]  ;;  %v6891_v34 = vld [vmem:[%s7385_s20 + $0x40] sm:$0xff] }
 0x279   : > { %3483 = vmatpush.bf16.msrb.mxu3 %v6092_v61  ;;  %3822 = vmatpush.bf16.msrb.mxu1 %v6864_v36  ;;  %v6878_v36 = vld [vmem:[%s7380_s24 + $0xd8] sm:$0xff] }
 0x27a   : > { %3522 = vmatpush.bf16.msra.mxu2 %v5968_v12  ;;  %3813 = vmatpush.bf16.msrb.mxu0 %v6852_v16  ;;  %v6859_v12 = vld [vmem:[%s7380_s24 + $0x40] sm:$0xff] }
 0x27d   : > { %3484 = vmatpush.bf16.msrb.mxu3 %v6076_v24  ;;  %3823 = vmatpush.bf16.msrb.mxu1 %v6863_v27  ;;  %v6897_v24 = vld [vmem:[%s7385_s20 + $0x70] sm:$0xff] }
 0x27e   : > { %3523 = vmatpush.bf16.msra.mxu2 %v5952_v1  ;;  %3814 = vmatpush.bf16.msrb.mxu0 %v6851_v40  ;;  %v6869_v1 = vld [vmem:[%s7380_s24 + $0x90] sm:$0xff] }
 0x27f   : > { %v6877_v27 = vld [vmem:[%s7380_s24 + $0xd0] sm:$0xff] }
 0x280   : > { %3485 = vmatmul.bf16.vlgmr.msrb.gmra.mxu3 %v8246_v53 }
 0x281   : > { %3529 = vmatpush.bf16.msra.mxu3 %v6192_v3  ;;  %3524 = vmatmul.bf16.vlgmr.msra.gmra.mxu2 %v8189_v55  ;;  %v6824_v55 = vld [vmem:[%s7392_s1 + $0xb2c] sm:$0xf] }
 0x282   : > { %v6096_v21 = vor.u32 %v6824_v55, %v6093_v20  ;;  %4116 = vmatpush.bf16.msra.mxu0 %v6890_v41  ;;  %3824 = vmatpush.bf16.msrb.mxu1 %v6862_v42  ;;  %v6905_v55 = vld [vmem:[%s7385_s20 + $0xb0] sm:$0xff] }
 0x283   : > { %3833 = vmatpush.bf16.msrb.mxu2 %v6874_v11  ;;  %v6901_v41 = vld [vmem:[%s7385_s20 + $0x90] sm:$0xff] }
 0x285   : > { %3530 = vmatpush.bf16.msra.mxu3 %v6176_v5  ;;  %v6868_v5 = vld [vmem:[%s7380_s24 + $0x88] sm:$0xff] }
 0x286   : > { %4117 = vmatpush.bf16.msra.mxu0 %v6889_v44  ;;  %3825 = vmatpush.bf16.msrb.mxu1 %v6861_v54  ;;  %v6876_v54 = vld [vmem:[%s7380_s24 + $0xc8] sm:$0xff] }
 0x287   : > { %3834 = vmatpush.bf16.msrb.mxu2 %v6873_v45 }
 0x289   : > { %3531 = vmatpush.bf16.msra.mxu3 %v6160_v9  ;;  %v6895_v9 = vld [vmem:[%s7385_s20 + $0x60] sm:$0xff] }
 0x28a   : > { %4118 = vmatpush.bf16.msra.mxu0 %v6888_v52  ;;  %3826 = vmatpush.bf16.msrb.mxu1 %v6860_v51  ;;  %v6900_v52 = vld [vmem:[%s7385_s20 + $0x88] sm:$0xff] }
 0x28b   : > { %3835 = vmatpush.bf16.msrb.mxu2 %v6872_v57 }
 0x28d   : > { %3532 = vmatpush.bf16.msra.mxu3 %v6144_v10  ;;  %v6867_v10 = vld [vmem:[%s7380_s24 + $0x80] sm:$0xff] }
 0x28e   : > { %4119 = vmatpush.bf16.msra.mxu0 %v6887_v58  ;;  %3827 = vmatpush.bf16.msrb.mxu1 %v6859_v12 }
 0x28f   : > { %3836 = vmatpush.bf16.msrb.mxu2 %v6871_v62 }
 0x291   : > { %3533 = vmatpush.bf16.msra.mxu3 %v6128_v14  ;;  %v6894_v14 = vld [vmem:[%s7385_s20 + $0x58] sm:$0xff] }
 0x292   : > { %4120 = vmatpush.bf16.msra.mxu0 %v6886_v33  ;;  %4129 = vmatpush.bf16.msra.mxu1 %v6898_v63  ;;  %v6913_v33 = vld [vmem:[%s7385_s20 + $0xf0] sm:$0xff] }
 0x293   : > { %3837 = vmatpush.bf16.msrb.mxu2 %v6870_v2 }
 0x295   : > { %3534 = vmatpush.bf16.msra.mxu3 %v6112_v18  ;;  %v6893_v18 = vld [vmem:[%s7385_s20 + $0x50] sm:$0xff] }
 0x296   : > { %4121 = vmatpush.bf16.msra.mxu0 %v6885_v0  ;;  %4130 = vmatpush.bf16.msra.mxu1 %v6897_v24 }
 0x297   : > { %3838 = vmatpush.bf16.msrb.mxu2 %v6869_v1  ;;  %v6911_v1 = vld [vmem:[%s7385_s20 + $0xe0] sm:$0xff] }
 0x299   : > { %3535 = vmatpush.bf16.msra.mxu3 %v6096_v21 }
 0x29a   : > { %4122 = vmatpush.bf16.msra.mxu0 %v6884_v37  ;;  %4131 = vmatpush.bf16.msra.mxu1 %v6896_v4 }
 0x29b   : > { %3839 = vmatpush.bf16.msrb.mxu2 %v6868_v5 }
 0x29d   : > { %3536 = vmatpush.bf16.msra.mxu3 %v6080_v43  ;;  %v8307_v26 = vpop.f32.mrf.mxu0 }
 0x29e   : > { %4123 = vmatpush.bf16.msra.mxu0 %v6883_v8  ;;  %4132 = vmatpush.bf16.msra.mxu1 %v6895_v9  ;;  %v3344_v21 = vadd.f32 %v8307_v26, %v2686_v13  ;;  %v6910_v8 = vld [vmem:[%s7385_s20 + $0xd8] sm:$0xff]  ;;  %v2689_v13 = vperm.slane %v8356_v46, 3 }
 0x29f   : > { %3840 = vmatpush.bf16.msrb.mxu2 %v6867_v10 }
 0x2a0   : > { %3537 = vmatmul.bf16.vlgmr.msra.gmra.mxu3 %v8246_v53 }
 0x2a1   : > { %3846 = vmatpush.bf16.msrb.mxu3 %v6882_v60  ;;  %v6907_v60 = vld [vmem:[%s7385_s20 + $0xc0] sm:$0xff] }
 0x2a2   : > { %4133 = vmatpush.bf16.msra.mxu1 %v6894_v14 }
 0x2a3   : > { %4142 = vmatpush.bf16.msra.mxu2 %v6906_v15 }
 0x2a5   : > { %v3345_v28 = vpop.f32.mrf.mxu0  ;;  %3847 = vmatpush.bf16.msrb.mxu3 %v6881_v17 }
 0x2a6   : > { %4134 = vmatpush.bf16.msra.mxu1 %v6893_v18 }
 0x2a7   : > { %4143 = vmatpush.bf16.msra.mxu2 %v6905_v55 }
 0x2a9   : > { %3848 = vmatpush.bf16.msrb.mxu3 %v6880_v23 }
 0x2aa   : > { %4135 = vmatpush.bf16.msra.mxu1 %v6892_v19 }
 0x2ab   : > { %4144 = vmatpush.bf16.msra.mxu2 %v6904_v48 }
 0x2ad   : > { %v8314_v53 = vpop.f32.mrf.mxu1  ;;  %v8316_v6 = vpop.f32.mrf.mxu0  ;;  %3849 = vmatpush.bf16.msrb.mxu3 %v6879_v30 }
 0x2ae   : > { %v3357_v43 = vadd.f32 %v8314_v53, %v3344_v21  ;;  %4136 = vmatpush.bf16.msra.mxu1 %v6891_v34  ;;  %v3614_v34 = vld [vmem:[%s7390_s12 + $0x4] ss:$0 sm:$0xff] }
 0x2af   : > { %4145 = vmatpush.bf16.msra.mxu2 %v6903_v35 }
 0x2b1   : > { %3850 = vmatpush.bf16.msrb.mxu3 %v6878_v36 }
 0x2b5   : > { %v3358_v38 = vpop.f32.mrf.mxu1  ;;  %v3397_v39 = vpop.f32.mrf.mxu0  ;;  %3851 = vmatpush.bf16.msrb.mxu3 %v6877_v27 }
 0x2b6   : > { %v2687_v38 = vperm.slane %v8356_v46, 1  ;;  %v6902_v39 = vld [vmem:[%s7385_s20 + $0x98] sm:$0xff] }
 0x2b7   : > { %4146 = vmatpush.bf16.msra.mxu2 %v6902_v39 }
 0x2b8   : > { %v3396_v42 = vadd.f32 %v8316_v6, %v2687_v38 }
 0x2b9   : > { %3852 = vmatpush.bf16.msrb.mxu3 %v6876_v54 }
 0x2bb   : > { %4147 = vmatpush.bf16.msra.mxu2 %v6901_v41  ;;  %v3923_v41 = vld [vmem:[%s7390_s12 + $0x5] ss:$0 sm:$0xff] }
 0x2bd   : > { %v8330_v47 = vpop.f32.mrf.mxu1 }
 0x2be   : > { %v3409_v45 = vadd.f32 %v8330_v47, %v3396_v42  ;;  %v2688_v47 = vperm.slane %v8356_v46, 2 }
 0x2bf   : > { %v8332_v49 = vpop.f32.mrf.mxu0  ;;  %4148 = vmatpush.bf16.msra.mxu2 %v6900_v52  ;;  %v4170_v52 = vld [vmem:[#allocation9] sm:$0xff] }
 0x2c0   : > { %v3448_v2 = vadd.f32 %v8332_v49, %v2688_v47 }
 0x2c3   : > { %v3369_v50 = vpop.f32.mrf.mxu2 }
 0x2c4   : > { %v3370_v25 = vadd.f32 %v3369_v50, %v3357_v43  ;;  %v6875_v50 = vld [vmem:[%s7380_s24 + $0xc0] sm:$0xff] }
 0x2c5   : > { %v3410_v59 = vpop.f32.mrf.mxu1  ;;  %3853 = vmatpush.bf16.msrb.mxu3 %v6875_v50 }
 0x2c6   : > { %v6899_v59 = vld [vmem:[%s7385_s20 + $0x80] sm:$0xff] }
 0x2c7   : > { %v3449_v61 = vpop.f32.mrf.mxu0  ;;  %4149 = vmatpush.bf16.msra.mxu2 %v6899_v59 }
 0x2c8   : > { %v6914_v61 = vld [vmem:[%s7385_s20 + $0xf8] sm:$0xff] }
 0x2c9   : > { %4155 = vmatpush.bf16.msra.mxu3 %v6914_v61 }
 0x2cb   : > { %v3371_v32 = vpop.f32.mrf.mxu2 }
 0x2cc   : > { %v6912_v32 = vld [vmem:[%s7385_s20 + $0xe8] sm:$0xff] }
 0x2cd   : > { %v8346_v3 = vpop.f32.mrf.mxu1  ;;  %4156 = vmatpush.bf16.msra.mxu3 %v6913_v33 }
 0x2ce   : > { %v3461_v0 = vadd.f32 %v8346_v3, %v3448_v2  ;;  %v6908_v3 = vld [vmem:[%s7385_s20 + $0xc8] sm:$0xff] }
 0x2d1   : > { %4157 = vmatpush.bf16.msra.mxu3 %v6912_v32 }
 0x2d3   : > { %v8351_v7 = vpop.f32.mrf.mxu2 }
 0x2d4   : > { %v3422_v51 = vadd.f32 %v8351_v7, %v3409_v45 }
 0x2d5   : > { %v3462_v56 = vpop.f32.mrf.mxu1  ;;  %4158 = vmatpush.bf16.msra.mxu3 %v6911_v1 }
 0x2d6   : > { %v6909_v56 = vld [vmem:[%s7385_s20 + $0xd0] sm:$0xff] }
 0x2d9   : > { %4159 = vmatpush.bf16.msra.mxu3 %v6910_v8 }
 0x2db   : > { %v3423_v22 = vpop.f32.mrf.mxu2 }
 0x2dd   : > { %v8366_v20 = vpop.f32.mrf.mxu0  ;;  %4160 = vmatpush.bf16.msra.mxu3 %v6909_v56 }
 0x2de   : > { %v3500_v14 = vadd.f32 %v8366_v20, %v2689_v13 }
 0x2e1   : > { %4161 = vmatpush.bf16.msra.mxu3 %v6908_v3 }
 0x2e3   : > { %v3382_v28 = vpop.f32.mrf.mxu3 }
 0x2e4   : > { %v3383_v29 = vadd.f32 %v3382_v28, %v3370_v25 }
 0x2e5   : > { %v3501_v26 = vpop.f32.mrf.mxu0  ;;  %4162 = vmatpush.bf16.msra.mxu3 %v6907_v60 }
 0x2e6   : > { %v3542_v31 = vmax.f32 %v3383_v29, 0.0  ;;  %v3473_v53 = vpop.f32.mrf.mxu2 }
 0x2e7   : > { %v3474_v24 = vadd.f32 %v3473_v53, %v3461_v0 }
 0x2e8   : > { %v3610_v16 = vpack.c.bf16 %v3542_v31, %v3542_v31 }
 0x2ea   : > { %3815 = vmatmul.bf16.vlgmr.msrb.gmra.mxu0 %v3610_v16 }
 0x2eb   : > { %v3384_v40 = vpop.f32.mrf.mxu3 }
 0x2ec   : > { %v7006_v40 = vld [vmem:[#allocation8] sm:$0xff] }
 0x2ed   : > { %v3512_v11 = vpop.f32.mrf.mxu1 }
 0x2ee   : > { %v3475_v44 = vpop.f32.mrf.mxu2  ;;  %v3513_v15 = vadd.f32 %v3512_v11, %v3500_v14 }
 0x2f3   : > { %v3434_v57 = vpop.f32.mrf.mxu3 }
 0x2f4   : > { %v3435_v58 = vadd.f32 %v3434_v57, %v3422_v51 }
 0x2f5   : > { %v3514_v12 = vpop.f32.mrf.mxu1 }
 0x2f6   : > { %v3543_v6 = vmax.f32 %v3435_v58, 0.0 }
 0x2f8   : > { %v3611_v62 = vpack.c.bf16 %v3543_v6, %v3543_v6 }
 0x2fa   : > { %3828 = vmatmul.bf16.vlgmr.msrb.gmra.mxu1 %v3611_v62  ;;  %4124 = vmatmul.bf16.vlgmr.msra.gmra.mxu0 %v3610_v16 }
 0x2fb   : > { %v3436_v63 = vpop.f32.mrf.mxu3 }
 0x303   : > { %v3486_v37 = vpop.f32.mrf.mxu3 }
 0x304   : > { %v3487_v4 = vadd.f32 %v3486_v37, %v3474_v24  ;;  %v3525_v5 = vpop.f32.mrf.mxu2 }
 0x305   : > { %v3526_v17 = vadd.f32 %v3525_v5, %v3513_v15 }
 0x306   : > { %v3544_v7 = vmax.f32 %v3487_v4, 0.0 }
 0x308   : > { %v3612_v9 = vpack.c.bf16 %v3544_v7, %v3544_v7 }
 0x30a   : > { %3841 = vmatmul.bf16.vlgmr.msrb.gmra.mxu2 %v3612_v9  ;;  %4137 = vmatmul.bf16.vlgmr.msra.gmra.mxu1 %v3611_v62 }
 0x30b   : > { %v3488_v49 = vpop.f32.mrf.mxu3 }
 0x30c   : > { %v3527_v10 = vpop.f32.mrf.mxu2 }
 0x31a   : > { %4150 = vmatmul.bf16.vlgmr.msra.gmra.mxu2 %v3612_v9 }
 0x323   : > { %v3538_v18 = vpop.f32.mrf.mxu3 }
 0x324   : > { %v3539_v55 = vadd.f32 %v3538_v18, %v3526_v17 }
 0x326   : > { %v3545_v21 = vmax.f32 %v3539_v55, 0.0 }
 0x328   : > { %v3613_v22 = vpack.c.bf16 %v3545_v21, %v3545_v21 }
 0x32a   : > { %3854 = vmatmul.bf16.vlgmr.msrb.gmra.mxu3 %v3613_v22 }
 0x32b   : > { %v3540_v23 = vpop.f32.mrf.mxu3 }
 0x33a   : > { %4163 = vmatmul.bf16.vlgmr.msra.gmra.mxu3 %v3613_v22 }
 0x367   : > { %v3816_v43 = vpop.f32.mrf.mxu0 }
 0x368   : > { %v3817_v35 = vadd.f32 %v3816_v43, %v3614_v34 }
 0x36f   : > { %v3818_v25 = vpop.f32.mrf.mxu0 }
 0x377   : > { %v3829_v19 = vpop.f32.mrf.mxu1  ;;  %v4125_v48 = vpop.f32.mrf.mxu0 }
 0x378   : > { %v3830_v16 = vadd.f32 %v3829_v19, %v3817_v35  ;;  %v4126_v11 = vadd.f32 %v4125_v48, %v3923_v41 }
 0x37f   : > { %v3831_v28 = vpop.f32.mrf.mxu1  ;;  %v4127_v29 = vpop.f32.mrf.mxu0 }
 0x387   : > { %v4138_v46 = vpop.f32.mrf.mxu1 }
 0x388   : > { %v4139_v44 = vadd.f32 %v4138_v46, %v4126_v11 }
 0x38d   : > { %v3842_v26 = vpop.f32.mrf.mxu2 }
 0x38e   : > { %v3843_v36 = vadd.f32 %v3842_v26, %v3830_v16 }
 0x38f   : > { %v4140_v20 = vpop.f32.mrf.mxu1 }
 0x395   : > { %v3844_v30 = vpop.f32.mrf.mxu2 }
 0x39d   : > { %v4151_v31 = vpop.f32.mrf.mxu2 }
 0x39e   : > { %v4152_v54 = vadd.f32 %v4151_v31, %v4139_v44 }
 0x3a5   : > { %v4153_v53 = vpop.f32.mrf.mxu2 }
 0x3ad   : > { %v3855_v38 = vpop.f32.mrf.mxu3 }
 0x3ae   : > { %v3856_v39 = vadd.f32 %v3855_v38, %v3843_v36 }
 0x3b0   : > { %v4168_v27 = vsub.f32 %v7006_v40, %v3856_v39 }
 0x3b2   : > { %4169 = vst.msk [vmem:[#allocation8] sm:$0xff] %vm499_vm2, %v4168_v27 }
 0x3b3   : > { %6927 = dma.vmem_to_hbm [thread:$0]  (%p6948_p3), %s4183_s30, 128, %s4185_s15, [#allocation4]  }
 0x3b5   : > { %v3857_v42 = vpop.f32.mrf.mxu3 }
 0x3bd   : > { %v4164_v45 = vpop.f32.mrf.mxu3 }
 0x3be   : > { %v4165_v51 = vadd.f32 %v4164_v45, %v4152_v54 }
 0x3c0   : > { %v4171_v57 = vadd.f32 %v4170_v52, %v4165_v51 }
 0x3c2   : > { %4173 = vst.msk [vmem:[#allocation9] sm:$0xff] %vm4172_vm3, %v4171_v57 }
 0x3c3   : > { %6929 = dma.vmem_to_hbm [thread:$0]  (%p6948_p3), %s4197_s8, 128, %s4199_s11, [#allocation10]  }
 0x3c5   : > { %v4166_v50 = vpop.f32.mrf.mxu3 }
 0x3c6   : > { %7186 = dma.done.wait (%p6948_p3), [#allocation4], 128  }
 0x3c7   : > { %7188 = vsyncadd (%p6948_p3), [#allocation4], 4294967168 }
 0x3c8   : > { %7190 = dma.done.wait (%p6948_p3), [#allocation10], 128  }
 0x3c9   : > { %7192 = vsyncadd (%p6948_p3), [#allocation10], 4294967168 }
 0x3ca PF: > { %s24_s29 = sadd.s32 1, %s7215_s29   ;;  %s8458_s17 = sld [smem:[#allocation16_spill]] }
 0x3cb   : > { %p21_p4 = scmp.ge.s32.totalorder %s24_s29, 4   ;;  %s8459_s18 = sld [smem:[#allocation15_spill]] }
 0x3cc   : > { %s8460_s24 = smov %s7199_s25  ;;  %s8461_s25 = smov %s7203_s26 }
 0x3cd   : > { %s8463_s27 = smov %s7211_s28  ;;  %23 = sbr.rel (!%p21_p4) target bundleno = 9 (0x9), region = 126 }
 0x3d0   : > { %s8462_s26 = smov %s8458_s17 }
 0x3d1   : > { %s8464_s28 = smov %s8459_s18 }
 0x3d2   :  { %4217 = vsyncpa [#allocation3], 1 }
 0x3d3   :  { %4219 = vsyncpa [#allocation3 + $0x1], 1 }
 0x3d4   :  { %4220 = vsyncpa [#allocation6], 1 }
 0x3d5   :  { %4222 = vsyncpa [#allocation6 + $0x1], 1 }
 0x3d6   :  { %4223 = vsyncpa [#allocation4], 1 }
 0x3d7   :  { %4225 = vsyncpa [#allocation4 + $0x1], 1 }
 0x3d8   :  { %4226 = vsyncpa [#allocation10], 1 }

</bundles_post_ra>
